<compile_context>
chip_gen: v7x
topology: tpu7x:2x2x1
jax: 0.10.0
libtpu: 0.0.40
codegen_flags: <defaults>
</compile_context>

<pallas_src>
import functools

import jax
import jax.numpy as jnp
from jax.experimental import pallas as pl
from jax.experimental.pallas import tpu as pltpu

# ----------------------- synthetic hyper-parameters ------------------------
XBOUND = (-8.0, 8.0)
YBOUND = (-8.0, 8.0)
ZBOUND = (-2.0, 2.0)
VSIZE = (1.0, 1.0, 1.0)
GX = int(round((XBOUND[1] - XBOUND[0]) / VSIZE[0]))   # 16  (W)
GY = int(round((YBOUND[1] - YBOUND[0]) / VSIZE[1]))   # 16  (H)
GZ = int(round((ZBOUND[1] - ZBOUND[0]) / VSIZE[2]))   # 4   (depth, collapsed)

NUM_POINT_FEATS = 3        # PointToVoxel(num_point_features=3)
ENC_OUT = 32               # sparse-encoder BEV channels (synthetic)
PROJ_HIDDEN = 64           # ProjectionHead hidden dim (synthetic)
PROJ_DIM = 64              # ProjectionHead.projection_dim == out_channels

NPIX = GY * GX             # BEV pixels per batch (lane dimension in the kernel)


# ------------------------------- fused kernel -------------------------------
def lidar2bev_kernel(pc_ref, wz_ref, eb_ref, w1_ref, b1_ref, w2_ref, b2_ref,
                     out_ref, *, bt):
    """Fused Lidar2BEV forward for `bt` packed batch items.

    pc_ref : (bt, 3, N)        points, rows = (x, y, z)
    wz_ref : (GZ, ENC_OUT, 3)  encoder weights per z slice, column reversal folded in
    eb_ref : (ENC_OUT, 1)      encoder bias
    w1_ref : (PROJ_HIDDEN, ENC_OUT), b1_ref: (PROJ_HIDDEN, 1)
    w2_ref : (PROJ_DIM, PROJ_HIDDEN), b2_ref: (PROJ_DIM, 1)
    out_ref: (bt, PROJ_DIM, H*W)  lane-dense NCHW output block
    """
    # Hoist all weights out of the batch loop (loaded once per grid step).
    wz = wz_ref[...]                       # (GZ, ENC_OUT, 3)
    eb = eb_ref[...]                       # (ENC_OUT, 1)
    w1 = w1_ref[...]
    b1 = b1_ref[...]
    w2 = w2_ref[...]
    b2 = b2_ref[...]

    for b in range(bt):                    # tiny static unroll over packed batch items
        pts = pc_ref[b]                    # (3, N)
        n = pts.shape[1]
        x = pts[0:1, :]                    # (1, N)
        y = pts[1:2, :]
        zc = pts[2:3, :]

        # ---- voxel / BEV-pixel index math (PointToVoxel grid, fused) ----
        xi = jnp.floor((x - XBOUND[0]) * (1.0 / VSIZE[0])).astype(jnp.int32)
        yi = jnp.floor((y - YBOUND[0]) * (1.0 / VSIZE[1])).astype(jnp.int32)
        zi = jnp.floor((zc - ZBOUND[0]) * (1.0 / VSIZE[2])).astype(jnp.int32)
        valid = ((xi >= 0) & (xi < GX) & (yi >= 0) & (yi < GY) &
                 (zi >= 0) & (zi < GZ))
        pix = jnp.where(valid, yi * GX + xi, -1)                        # (1, N)

        # ---- per-point encoder embedding (VPU broadcast-FMAs, K=3 off the MXU) ----
        # a[c, n] = (wz[zi[n]] @ pts[:, n])[c]   (zero for points outside the z range)
        def emb(z):
            return (wz[z, :, 0:1] * x + wz[z, :, 1:2] * y + wz[z, :, 2:3] * zc)

        a = (zi == 0).astype(jnp.float32) * emb(0)                      # (ENC_OUT, N)
        for z in range(1, GZ):
            a = a + (zi == z).astype(jnp.float32) * emb(z)

        # ---- bf16 one-hot scatter-sum on the MXU (single well-shaped matmul) ----
        # pixels on sublanes, points on lanes; -1 pix matches nothing (invalid points).
        pix_iota = jax.lax.broadcasted_iota(jnp.int32, (NPIX, n), 0)
        pixmask = (pix_iota == pix).astype(jnp.bfloat16)                # (NPIX, N)
        vox_enc = jnp.einsum('cn,pn->cp', a.astype(jnp.bfloat16), pixmask,
                             preferred_element_type=jnp.float32)        # (ENC_OUT, NPIX)

        # ---- encoder bias+ReLU, then ProjectionHead: Linear -> ReLU -> Linear ----
        feat = jnp.maximum(vox_enc + eb, 0.0)                           # (32, P)
        h = jnp.maximum(jnp.dot(w1, feat, preferred_element_type=jnp.float32)
                        + b1, 0.0)                                      # (64, P)
        out_ref[b] = (jnp.dot(w2, h, preferred_element_type=jnp.float32)
                      + b2)                                             # (64, P)


# --------------------------- pallas_call wrapper -----------------------------
def lidar2bev_forward(pc, params, *, batches_per_step=None):
    """pc: (B, 3, N) float32 -> BEV feats (B, PROJ_DIM, H=GY, W=GX)."""
    B, C, N = pc.shape
    assert C == NUM_POINT_FEATS
    pc = pc.astype(jnp.float32)

    # Pack several batch items per grid step to amortize per-step pipeline overhead.
    if batches_per_step is None:
        batches_per_step = B if B <= 8 else 4
    bt = batches_per_step
    assert B % bt == 0, (B, bt)
    grid = (B // bt,)

    kernel = functools.partial(lidar2bev_kernel, bt=bt)
    out = pl.pallas_call(
        kernel,
        out_shape=jax.ShapeDtypeStruct((B, PROJ_DIM, NPIX), jnp.float32),
        grid=grid,
        in_specs=[
            pl.BlockSpec((bt, C, N), lambda i: (i, 0, 0)),
            pl.BlockSpec((GZ, ENC_OUT, C), lambda i: (0, 0, 0)),
            pl.BlockSpec((ENC_OUT, 1), lambda i: (0, 0)),
            pl.BlockSpec((PROJ_HIDDEN, ENC_OUT), lambda i: (0, 0)),
            pl.BlockSpec((PROJ_HIDDEN, 1), lambda i: (0, 0)),
            pl.BlockSpec((PROJ_DIM, PROJ_HIDDEN), lambda i: (0, 0)),
            pl.BlockSpec((PROJ_DIM, 1), lambda i: (0, 0)),
        ],
        out_specs=pl.BlockSpec((bt, PROJ_DIM, NPIX), lambda i: (i, 0, 0)),
        compiler_params=pltpu.CompilerParams(dimension_semantics=("parallel",)),
    )(pc, params["wz"], params["eb"], params["w1t"], params["b1"],
      params["w2t"], params["b2"])

    # (B, PROJ_DIM, H*W) -> (B, PROJ_DIM, H, W): already NCHW, reshape is free.
    return out.reshape(B, PROJ_DIM, GY, GX)


# ------------------------------ parameters ----------------------------------
def init_params(key):
    """Logical (PyTorch-layout) parameters of the synthetic encoder / projection head."""
    cin = GZ * NUM_POINT_FEATS
    ks = jax.random.split(key, 6)
    return dict(
        enc_w=jax.random.normal(ks[0], (cin, ENC_OUT), jnp.float32) / jnp.sqrt(cin),
        enc_b=0.01 * jax.random.normal(ks[1], (ENC_OUT,), jnp.float32),
        w1=jax.random.normal(ks[2], (ENC_OUT, PROJ_HIDDEN), jnp.float32) / jnp.sqrt(ENC_OUT),
        b1=0.01 * jax.random.normal(ks[3], (PROJ_HIDDEN,), jnp.float32),
        w2=jax.random.normal(ks[4], (PROJ_HIDDEN, PROJ_DIM), jnp.float32) / jnp.sqrt(PROJ_HIDDEN),
        b2=0.01 * jax.random.normal(ks[5], (PROJ_DIM,), jnp.float32),
    )


def fold_params(lp):
    """One-time host-side re-layout for the fused kernel.

    Folds the PyTorch forward's feature-column reversal (vox[..., ::-1]) into the
    encoder weights (row permutation) and pre-transposes everything into the
    channels-on-sublanes orientation used inside the kernel.
    """
    C = NUM_POINT_FEATS
    # enc_w rows are indexed by (z, reversed-channel); re-index to (z, original-channel)
    wz = lp["enc_w"].reshape(GZ, C, ENC_OUT)[:, ::-1, :]      # (GZ, C_orig, ENC_OUT)
    wz = jnp.transpose(wz, (0, 2, 1))                         # (GZ, ENC_OUT, C_orig)
    return dict(
        wz=wz,
        eb=lp["enc_b"].reshape(ENC_OUT, 1),
        w1t=lp["w1"].T,                                       # (PROJ_HIDDEN, ENC_OUT)
        b1=lp["b1"].reshape(PROJ_HIDDEN, 1),
        w2t=lp["w2"].T,                                       # (PROJ_DIM, PROJ_HIDDEN)
        b2=lp["b2"].reshape(PROJ_DIM, 1),
    )


# ------------------------- pure-JAX semantic reference -----------------------
def lidar2bev_reference(pc, lp):
    """Straight transcription of the module's forward (logical params, plain jnp)."""
    B, C, N = pc.shape
    hp = jax.lax.Precision.HIGHEST
    pts = jnp.transpose(pc, (0, 2, 1)).astype(jnp.float32)    # (B, N, 3)
    x, y, z = pts[..., 0], pts[..., 1], pts[..., 2]
    xi = jnp.floor((x - XBOUND[0]) / VSIZE[0]).astype(jnp.int32)
    yi = jnp.floor((y - YBOUND[0]) / VSIZE[1]).astype(jnp.int32)
    zi = jnp.floor((z - ZBOUND[0]) / VSIZE[2]).astype(jnp.int32)
    valid = ((xi >= 0) & (xi < GX) & (yi >= 0) & (yi < GY) & (zi >= 0) & (zi < GZ))
    flat = jnp.where(valid, (zi * GY + yi) * GX + xi, -1)
    nvox = GZ * GY * GX
    onehot = (flat[..., None] == jnp.arange(nvox)[None, None, :]).astype(jnp.float32)
    vox = jnp.einsum('bnv,bnc->bvc', onehot, pts, precision=hp)        # voxelize_reduce
    vox = vox[..., ::-1]                                               # [c,x,y,z] reorder
    grid5 = vox.reshape(B, GZ, GY, GX, C)
    bev_in = jnp.transpose(grid5, (0, 2, 3, 1, 4)).reshape(B, GY * GX, GZ * C)
    feat = jax.nn.relu(jnp.einsum('bpi,io->bpo', bev_in, lp["enc_w"], precision=hp)
                       + lp["enc_b"])
    h = jax.nn.relu(jnp.einsum('bpi,io->bpo', feat, lp["w1"], precision=hp) + lp["b1"])
    out = jnp.einsum('bpi,io->bpo', h, lp["w2"], precision=hp) + lp["b2"]
    out = out.reshape(B, GY, GX, PROJ_DIM)
    return jnp.transpose(out, (0, 3, 1, 2))


# --------------------------------- main --------------------------------------
if __name__ == "__main__":
    B, C, N = 2, NUM_POINT_FEATS, 256

    key = jax.random.PRNGKey(0)
    k_pc, k_params = jax.random.split(key)

    # points slightly exceeding the voxel range to exercise the invalid mask
    lo = jnp.array([XBOUND[0] - 1.0, YBOUND[0] - 1.0, ZBOUND[0] - 0.5], jnp.float32)
    hi = jnp.array([XBOUND[1] + 1.0, YBOUND[1] + 1.0, ZBOUND[1] + 0.5], jnp.float32)
    pc = jax.random.uniform(k_pc, (B, C, N), jnp.float32,
                            minval=lo[None, :, None], maxval=hi[None, :, None])

    logical_params = init_params(k_params)
    kernel_params = fold_params(logical_params)

    fwd = jax.jit(lidar2bev_forward)
    out = fwd(pc, kernel_params)
    out = jax.block_until_ready(out)

    assert out.shape == (B, PROJ_DIM, GY, GX), out.shape
    assert out.dtype == jnp.float32
    assert bool(jnp.all(jnp.isfinite(out)))

    # semantic check against the plain-JAX transcription of the module forward
    ref = jax.block_until_ready(jax.jit(lidar2bev_reference)(pc, logical_params))
    rel_err = float(jnp.linalg.norm(out - ref) / (jnp.linalg.norm(ref) + 1e-6))
    assert rel_err < 1e-2, f"relative error too large: {rel_err}"

    print("KERNEL_OK")
</pallas_src>

<mosaic_0001>
module attributes {stable_mosaic.version = 11 : i64} {
  func.func @lidar2bev_kernel(%arg0: i32, %arg1: memref<2x3x256xf32, #tpu.memory_space<vmem>>, %arg2: memref<4x32x3xf32, #tpu.memory_space<vmem>>, %arg3: memref<32x1xf32, #tpu.memory_space<vmem>>, %arg4: memref<64x32xf32, #tpu.memory_space<vmem>>, %arg5: memref<64x1xf32, #tpu.memory_space<vmem>>, %arg6: memref<64x64xf32, #tpu.memory_space<vmem>>, %arg7: memref<64x1xf32, #tpu.memory_space<vmem>>, %arg8: memref<2x64x256xf32, #tpu.memory_space<vmem>>) attributes {dimension_semantics = [#tpu.dimension_semantics<parallel>], iteration_bounds = array<i64: 1>, scalar_prefetch = 0 : i64, scratch_operands = 0 : i64, tpu.core_type = #tpu.core_type<tc>, window_params = [{transform_indices = @transform_0, window_bounds = array<i64: 2, 3, 256>}, {pipeline_mode = #tpu.pipeline_mode<synchronous>, transform_indices = @transform_1, window_bounds = array<i64: 4, 32, 3>}, {pipeline_mode = #tpu.pipeline_mode<synchronous>, transform_indices = @transform_2, window_bounds = array<i64: 32, 1>}, {pipeline_mode = #tpu.pipeline_mode<synchronous>, transform_indices = @transform_3, window_bounds = array<i64: 64, 32>}, {pipeline_mode = #tpu.pipeline_mode<synchronous>, transform_indices = @transform_4, window_bounds = array<i64: 64, 1>}, {pipeline_mode = #tpu.pipeline_mode<synchronous>, transform_indices = @transform_5, window_bounds = array<i64: 64, 64>}, {pipeline_mode = #tpu.pipeline_mode<synchronous>, transform_indices = @transform_6, window_bounds = array<i64: 64, 1>}, {transform_indices = @transform_7, window_bounds = array<i64: 2, 64, 256>}]} {
    %c0 = arith.constant 0 : index
    %c0_0 = arith.constant 0 : index
    %c0_1 = arith.constant 0 : index
    %0 = vector.load %arg2[%c0, %c0_0, %c0_1] : memref<4x32x3xf32, #tpu.memory_space<vmem>>, vector<4x32x3xf32>
    %c0_2 = arith.constant 0 : index
    %c0_3 = arith.constant 0 : index
    %1 = vector.load %arg3[%c0_2, %c0_3] : memref<32x1xf32, #tpu.memory_space<vmem>>, vector<32x1xf32>
    %c0_4 = arith.constant 0 : index
    %c0_5 = arith.constant 0 : index
    %2 = vector.load %arg4[%c0_4, %c0_5] : memref<64x32xf32, #tpu.memory_space<vmem>>, vector<64x32xf32>
    %c0_6 = arith.constant 0 : index
    %c0_7 = arith.constant 0 : index
    %3 = vector.load %arg5[%c0_6, %c0_7] : memref<64x1xf32, #tpu.memory_space<vmem>>, vector<64x1xf32>
    %c0_8 = arith.constant 0 : index
    %c0_9 = arith.constant 0 : index
    %4 = vector.load %arg6[%c0_8, %c0_9] : memref<64x64xf32, #tpu.memory_space<vmem>>, vector<64x64xf32>
    %c0_10 = arith.constant 0 : index
    %c0_11 = arith.constant 0 : index
    %5 = vector.load %arg7[%c0_10, %c0_11] : memref<64x1xf32, #tpu.memory_space<vmem>>, vector<64x1xf32>
    %c0_12 = arith.constant 0 : index
    %c0_13 = arith.constant 0 : index
    %c0_14 = arith.constant 0 : index
    %6 = vector.load %arg1[%c0_12, %c0_13, %c0_14] : memref<2x3x256xf32, #tpu.memory_space<vmem>>, vector<1x3x256xf32>
    %7 = vector.shape_cast %6 : vector<1x3x256xf32> to vector<3x256xf32>
    %8 = vector.extract_strided_slice %7 {offsets = [0, 0], sizes = [1, 256], strides = [1, 1]} : vector<3x256xf32> to vector<1x256xf32>
    %9 = vector.extract_strided_slice %7 {offsets = [1, 0], sizes = [1, 256], strides = [1, 1]} : vector<3x256xf32> to vector<1x256xf32>
    %10 = vector.extract_strided_slice %7 {offsets = [2, 0], sizes = [1, 256], strides = [1, 1]} : vector<3x256xf32> to vector<1x256xf32>
    %cst = arith.constant -8.000000e+00 : f32
    %11 = vector.broadcast %cst : f32 to vector<1x256xf32>
    %12 = arith.subf %8, %11 : vector<1x256xf32>
    %cst_15 = arith.constant 1.000000e+00 : f32
    %13 = vector.broadcast %cst_15 : f32 to vector<1x256xf32>
    %14 = arith.mulf %12, %13 : vector<1x256xf32>
    %15 = math.floor %14 : vector<1x256xf32>
    %16 = arith.fptosi %15 : vector<1x256xf32> to vector<1x256xi32>
    %cst_16 = arith.constant -8.000000e+00 : f32
    %17 = vector.broadcast %cst_16 : f32 to vector<1x256xf32>
    %18 = arith.subf %9, %17 : vector<1x256xf32>
    %cst_17 = arith.constant 1.000000e+00 : f32
    %19 = vector.broadcast %cst_17 : f32 to vector<1x256xf32>
    %20 = arith.mulf %18, %19 : vector<1x256xf32>
    %21 = math.floor %20 : vector<1x256xf32>
    %22 = arith.fptosi %21 : vector<1x256xf32> to vector<1x256xi32>
    %cst_18 = arith.constant -2.000000e+00 : f32
    %23 = vector.broadcast %cst_18 : f32 to vector<1x256xf32>
    %24 = arith.subf %10, %23 : vector<1x256xf32>
    %cst_19 = arith.constant 1.000000e+00 : f32
    %25 = vector.broadcast %cst_19 : f32 to vector<1x256xf32>
    %26 = arith.mulf %24, %25 : vector<1x256xf32>
    %27 = math.floor %26 : vector<1x256xf32>
    %28 = arith.fptosi %27 : vector<1x256xf32> to vector<1x256xi32>
    %c0_i32 = arith.constant 0 : i32
    %29 = vector.broadcast %c0_i32 : i32 to vector<1x256xi32>
    %30 = arith.cmpi sge, %16, %29 : vector<1x256xi32>
    %c16_i32 = arith.constant 16 : i32
    %31 = vector.broadcast %c16_i32 : i32 to vector<1x256xi32>
    %32 = arith.cmpi slt, %16, %31 : vector<1x256xi32>
    %33 = arith.andi %30, %32 : vector<1x256xi1>
    %c0_i32_20 = arith.constant 0 : i32
    %34 = vector.broadcast %c0_i32_20 : i32 to vector<1x256xi32>
    %35 = arith.cmpi sge, %22, %34 : vector<1x256xi32>
    %36 = arith.andi %33, %35 : vector<1x256xi1>
    %c16_i32_21 = arith.constant 16 : i32
    %37 = vector.broadcast %c16_i32_21 : i32 to vector<1x256xi32>
    %38 = arith.cmpi slt, %22, %37 : vector<1x256xi32>
    %39 = arith.andi %36, %38 : vector<1x256xi1>
    %c0_i32_22 = arith.constant 0 : i32
    %40 = vector.broadcast %c0_i32_22 : i32 to vector<1x256xi32>
    %41 = arith.cmpi sge, %28, %40 : vector<1x256xi32>
    %42 = arith.andi %39, %41 : vector<1x256xi1>
    %c4_i32 = arith.constant 4 : i32
    %43 = vector.broadcast %c4_i32 : i32 to vector<1x256xi32>
    %44 = arith.cmpi slt, %28, %43 : vector<1x256xi32>
    %45 = arith.andi %42, %44 : vector<1x256xi1>
    %c16_i32_23 = arith.constant 16 : i32
    %46 = vector.broadcast %c16_i32_23 : i32 to vector<1x256xi32>
    %47 = arith.muli %22, %46 : vector<1x256xi32>
    %48 = arith.addi %47, %16 : vector<1x256xi32>
    %c-1_i32 = arith.constant -1 : i32
    %49 = vector.broadcast %c-1_i32 : i32 to vector<1x256xi32>
    %50 = arith.select %45, %48, %49 : vector<1x256xi1>, vector<1x256xi32>
    %c0_i32_24 = arith.constant 0 : i32
    %51 = vector.broadcast %c0_i32_24 : i32 to vector<1x256xi32>
    %52 = arith.cmpi eq, %28, %51 : vector<1x256xi32>
    %53 = arith.extui %52 : vector<1x256xi1> to vector<1x256xi32>
    %54 = arith.sitofp %53 : vector<1x256xi32> to vector<1x256xf32>
    %55 = vector.extract_strided_slice %0 {offsets = [0, 0, 0], sizes = [1, 32, 1], strides = [1, 1, 1]} : vector<4x32x3xf32> to vector<1x32x1xf32>
    %56 = vector.shape_cast %55 : vector<1x32x1xf32> to vector<32x1xf32>
    %57 = vector.broadcast %56 : vector<32x1xf32> to vector<32x256xf32>
    %58 = vector.broadcast %8 : vector<1x256xf32> to vector<32x256xf32>
    %59 = arith.mulf %57, %58 : vector<32x256xf32>
    %60 = vector.extract_strided_slice %0 {offsets = [0, 0, 1], sizes = [1, 32, 1], strides = [1, 1, 1]} : vector<4x32x3xf32> to vector<1x32x1xf32>
    %61 = vector.shape_cast %60 : vector<1x32x1xf32> to vector<32x1xf32>
    %62 = vector.broadcast %61 : vector<32x1xf32> to vector<32x256xf32>
    %63 = vector.broadcast %9 : vector<1x256xf32> to vector<32x256xf32>
    %64 = arith.mulf %62, %63 : vector<32x256xf32>
    %65 = arith.addf %59, %64 : vector<32x256xf32>
    %66 = vector.extract_strided_slice %0 {offsets = [0, 0, 2], sizes = [1, 32, 1], strides = [1, 1, 1]} : vector<4x32x3xf32> to vector<1x32x1xf32>
    %67 = vector.shape_cast %66 : vector<1x32x1xf32> to vector<32x1xf32>
    %68 = vector.broadcast %67 : vector<32x1xf32> to vector<32x256xf32>
    %69 = vector.broadcast %10 : vector<1x256xf32> to vector<32x256xf32>
    %70 = arith.mulf %68, %69 : vector<32x256xf32>
    %71 = arith.addf %65, %70 : vector<32x256xf32>
    %72 = vector.broadcast %54 : vector<1x256xf32> to vector<32x256xf32>
    %73 = arith.mulf %72, %71 : vector<32x256xf32>
    %c1_i32 = arith.constant 1 : i32
    %74 = vector.broadcast %c1_i32 : i32 to vector<1x256xi32>
    %75 = arith.cmpi eq, %28, %74 : vector<1x256xi32>
    %76 = arith.extui %75 : vector<1x256xi1> to vector<1x256xi32>
    %77 = arith.sitofp %76 : vector<1x256xi32> to vector<1x256xf32>
    %78 = vector.extract_strided_slice %0 {offsets = [1, 0, 0], sizes = [1, 32, 1], strides = [1, 1, 1]} : vector<4x32x3xf32> to vector<1x32x1xf32>
    %79 = vector.shape_cast %78 : vector<1x32x1xf32> to vector<32x1xf32>
    %80 = vector.broadcast %79 : vector<32x1xf32> to vector<32x256xf32>
    %81 = vector.broadcast %8 : vector<1x256xf32> to vector<32x256xf32>
    %82 = arith.mulf %80, %81 : vector<32x256xf32>
    %83 = vector.extract_strided_slice %0 {offsets = [1, 0, 1], sizes = [1, 32, 1], strides = [1, 1, 1]} : vector<4x32x3xf32> to vector<1x32x1xf32>
    %84 = vector.shape_cast %83 : vector<1x32x1xf32> to vector<32x1xf32>
    %85 = vector.broadcast %84 : vector<32x1xf32> to vector<32x256xf32>
    %86 = vector.broadcast %9 : vector<1x256xf32> to vector<32x256xf32>
    %87 = arith.mulf %85, %86 : vector<32x256xf32>
    %88 = arith.addf %82, %87 : vector<32x256xf32>
    %89 = vector.extract_strided_slice %0 {offsets = [1, 0, 2], sizes = [1, 32, 1], strides = [1, 1, 1]} : vector<4x32x3xf32> to vector<1x32x1xf32>
    %90 = vector.shape_cast %89 : vector<1x32x1xf32> to vector<32x1xf32>
    %91 = vector.broadcast %90 : vector<32x1xf32> to vector<32x256xf32>
    %92 = vector.broadcast %10 : vector<1x256xf32> to vector<32x256xf32>
    %93 = arith.mulf %91, %92 : vector<32x256xf32>
    %94 = arith.addf %88, %93 : vector<32x256xf32>
    %95 = vector.broadcast %77 : vector<1x256xf32> to vector<32x256xf32>
    %96 = arith.mulf %95, %94 : vector<32x256xf32>
    %97 = arith.addf %73, %96 : vector<32x256xf32>
    %c2_i32 = arith.constant 2 : i32
    %98 = vector.broadcast %c2_i32 : i32 to vector<1x256xi32>
    %99 = arith.cmpi eq, %28, %98 : vector<1x256xi32>
    %100 = arith.extui %99 : vector<1x256xi1> to vector<1x256xi32>
    %101 = arith.sitofp %100 : vector<1x256xi32> to vector<1x256xf32>
    %102 = vector.extract_strided_slice %0 {offsets = [2, 0, 0], sizes = [1, 32, 1], strides = [1, 1, 1]} : vector<4x32x3xf32> to vector<1x32x1xf32>
    %103 = vector.shape_cast %102 : vector<1x32x1xf32> to vector<32x1xf32>
    %104 = vector.broadcast %103 : vector<32x1xf32> to vector<32x256xf32>
    %105 = vector.broadcast %8 : vector<1x256xf32> to vector<32x256xf32>
    %106 = arith.mulf %104, %105 : vector<32x256xf32>
    %107 = vector.extract_strided_slice %0 {offsets = [2, 0, 1], sizes = [1, 32, 1], strides = [1, 1, 1]} : vector<4x32x3xf32> to vector<1x32x1xf32>
    %108 = vector.shape_cast %107 : vector<1x32x1xf32> to vector<32x1xf32>
    %109 = vector.broadcast %108 : vector<32x1xf32> to vector<32x256xf32>
    %110 = vector.broadcast %9 : vector<1x256xf32> to vector<32x256xf32>
    %111 = arith.mulf %109, %110 : vector<32x256xf32>
    %112 = arith.addf %106, %111 : vector<32x256xf32>
    %113 = vector.extract_strided_slice %0 {offsets = [2, 0, 2], sizes = [1, 32, 1], strides = [1, 1, 1]} : vector<4x32x3xf32> to vector<1x32x1xf32>
    %114 = vector.shape_cast %113 : vector<1x32x1xf32> to vector<32x1xf32>
    %115 = vector.broadcast %114 : vector<32x1xf32> to vector<32x256xf32>
    %116 = vector.broadcast %10 : vector<1x256xf32> to vector<32x256xf32>
    %117 = arith.mulf %115, %116 : vector<32x256xf32>
    %118 = arith.addf %112, %117 : vector<32x256xf32>
    %119 = vector.broadcast %101 : vector<1x256xf32> to vector<32x256xf32>
    %120 = arith.mulf %119, %118 : vector<32x256xf32>
    %121 = arith.addf %97, %120 : vector<32x256xf32>
    %c3_i32 = arith.constant 3 : i32
    %122 = vector.broadcast %c3_i32 : i32 to vector<1x256xi32>
    %123 = arith.cmpi eq, %28, %122 : vector<1x256xi32>
    %124 = arith.extui %123 : vector<1x256xi1> to vector<1x256xi32>
    %125 = arith.sitofp %124 : vector<1x256xi32> to vector<1x256xf32>
    %126 = vector.extract_strided_slice %0 {offsets = [3, 0, 0], sizes = [1, 32, 1], strides = [1, 1, 1]} : vector<4x32x3xf32> to vector<1x32x1xf32>
    %127 = vector.shape_cast %126 : vector<1x32x1xf32> to vector<32x1xf32>
    %128 = vector.broadcast %127 : vector<32x1xf32> to vector<32x256xf32>
    %129 = vector.broadcast %8 : vector<1x256xf32> to vector<32x256xf32>
    %130 = arith.mulf %128, %129 : vector<32x256xf32>
    %131 = vector.extract_strided_slice %0 {offsets = [3, 0, 1], sizes = [1, 32, 1], strides = [1, 1, 1]} : vector<4x32x3xf32> to vector<1x32x1xf32>
    %132 = vector.shape_cast %131 : vector<1x32x1xf32> to vector<32x1xf32>
    %133 = vector.broadcast %132 : vector<32x1xf32> to vector<32x256xf32>
    %134 = vector.broadcast %9 : vector<1x256xf32> to vector<32x256xf32>
    %135 = arith.mulf %133, %134 : vector<32x256xf32>
    %136 = arith.addf %130, %135 : vector<32x256xf32>
    %137 = vector.extract_strided_slice %0 {offsets = [3, 0, 2], sizes = [1, 32, 1], strides = [1, 1, 1]} : vector<4x32x3xf32> to vector<1x32x1xf32>
    %138 = vector.shape_cast %137 : vector<1x32x1xf32> to vector<32x1xf32>
    %139 = vector.broadcast %138 : vector<32x1xf32> to vector<32x256xf32>
    %140 = vector.broadcast %10 : vector<1x256xf32> to vector<32x256xf32>
    %141 = arith.mulf %139, %140 : vector<32x256xf32>
    %142 = arith.addf %136, %141 : vector<32x256xf32>
    %143 = vector.broadcast %125 : vector<1x256xf32> to vector<32x256xf32>
    %144 = arith.mulf %143, %142 : vector<32x256xf32>
    %145 = arith.addf %121, %144 : vector<32x256xf32>
    %146 = tpu.iota {dimensions = array<i32: 0>} : vector<256x256xi32>
    %147 = vector.broadcast %50 : vector<1x256xi32> to vector<256x256xi32>
    %148 = arith.cmpi eq, %146, %147 : vector<256x256xi32>
    %149 = arith.extui %148 : vector<256x256xi1> to vector<256x256xi32>
    %150 = arith.sitofp %149 : vector<256x256xi32> to vector<256x256xf32>
    %151 = arith.truncf %150 : vector<256x256xf32> to vector<256x256xbf16>
    %152 = arith.truncf %145 : vector<32x256xf32> to vector<32x256xbf16>
    "tpu.trace_start"() <{level = 10 : i32, message = "cn,pn->cp"}> : () -> ()
    %cst_25 = arith.constant dense<0.000000e+00> : vector<32x256xf32>
    %153 = tpu.matmul %152, %151, %cst_25 {dimension_numbers = #tpu.dot_dimension_numbers<[1], [1], [0], [0], [0, 0, 1, 0], [], []>} : vector<32x256xbf16>, vector<256x256xbf16>, vector<32x256xf32> -> vector<32x256xf32>
    "tpu.trace_stop"() : () -> ()
    %154 = vector.broadcast %1 : vector<32x1xf32> to vector<32x256xf32>
    %155 = arith.addf %153, %154 : vector<32x256xf32>
    %cst_26 = arith.constant 0.000000e+00 : f32
    %156 = vector.broadcast %cst_26 : f32 to vector<32x256xf32>
    %157 = arith.maximumf %155, %156 : vector<32x256xf32>
    %cst_27 = arith.constant dense<0.000000e+00> : vector<64x256xf32>
    %158 = tpu.matmul %2, %157, %cst_27 {dimension_numbers = #tpu.dot_dimension_numbers<[1], [0], [0], [1], [0, 0, 1, 1], [], []>} : vector<64x32xf32>, vector<32x256xf32>, vector<64x256xf32> -> vector<64x256xf32>
    %159 = vector.broadcast %3 : vector<64x1xf32> to vector<64x256xf32>
    %160 = arith.addf %158, %159 : vector<64x256xf32>
    %cst_28 = arith.constant 0.000000e+00 : f32
    %161 = vector.broadcast %cst_28 : f32 to vector<64x256xf32>
    %162 = arith.maximumf %160, %161 : vector<64x256xf32>
    %cst_29 = arith.constant dense<0.000000e+00> : vector<64x256xf32>
    %163 = tpu.matmul %4, %162, %cst_29 {dimension_numbers = #tpu.dot_dimension_numbers<[1], [0], [0], [1], [0, 0, 1, 1], [], []>} : vector<64x64xf32>, vector<64x256xf32>, vector<64x256xf32> -> vector<64x256xf32>
    %164 = vector.broadcast %5 : vector<64x1xf32> to vector<64x256xf32>
    %165 = arith.addf %163, %164 : vector<64x256xf32>
    %c0_30 = arith.constant 0 : index
    %c0_31 = arith.constant 0 : index
    %c0_32 = arith.constant 0 : index
    %166 = vector.load %arg8[%c0_30, %c0_31, %c0_32] : memref<2x64x256xf32, #tpu.memory_space<vmem>>, vector<1x64x256xf32>
    %167 = vector.shape_cast %166 : vector<1x64x256xf32> to vector<64x256xf32>
    %168 = vector.shape_cast %165 : vector<64x256xf32> to vector<1x64x256xf32>
    tpu.vector_store %arg8[%c0_30, %c0_31, %c0_32], %168 {strides = array<i32>} : memref<2x64x256xf32, #tpu.memory_space<vmem>>, vector<1x64x256xf32>,
    %c1 = arith.constant 1 : index
    %c0_33 = arith.constant 0 : index
    %c0_34 = arith.constant 0 : index
    %169 = vector.load %arg1[%c1, %c0_33, %c0_34] : memref<2x3x256xf32, #tpu.memory_space<vmem>>, vector<1x3x256xf32>
    %170 = vector.shape_cast %169 : vector<1x3x256xf32> to vector<3x256xf32>
    %171 = vector.extract_strided_slice %170 {offsets = [0, 0], sizes = [1, 256], strides = [1, 1]} : vector<3x256xf32> to vector<1x256xf32>
    %172 = vector.extract_strided_slice %170 {offsets = [1, 0], sizes = [1, 256], strides = [1, 1]} : vector<3x256xf32> to vector<1x256xf32>
    %173 = vector.extract_strided_slice %170 {offsets = [2, 0], sizes = [1, 256], strides = [1, 1]} : vector<3x256xf32> to vector<1x256xf32>
    %cst_35 = arith.constant -8.000000e+00 : f32
    %174 = vector.broadcast %cst_35 : f32 to vector<1x256xf32>
    %175 = arith.subf %171, %174 : vector<1x256xf32>
    %cst_36 = arith.constant 1.000000e+00 : f32
    %176 = vector.broadcast %cst_36 : f32 to vector<1x256xf32>
    %177 = arith.mulf %175, %176 : vector<1x256xf32>
    %178 = math.floor %177 : vector<1x256xf32>
    %179 = arith.fptosi %178 : vector<1x256xf32> to vector<1x256xi32>
    %cst_37 = arith.constant -8.000000e+00 : f32
    %180 = vector.broadcast %cst_37 : f32 to vector<1x256xf32>
    %181 = arith.subf %172, %180 : vector<1x256xf32>
    %cst_38 = arith.constant 1.000000e+00 : f32
    %182 = vector.broadcast %cst_38 : f32 to vector<1x256xf32>
    %183 = arith.mulf %181, %182 : vector<1x256xf32>
    %184 = math.floor %183 : vector<1x256xf32>
    %185 = arith.fptosi %184 : vector<1x256xf32> to vector<1x256xi32>
    %cst_39 = arith.constant -2.000000e+00 : f32
    %186 = vector.broadcast %cst_39 : f32 to vector<1x256xf32>
    %187 = arith.subf %173, %186 : vector<1x256xf32>
    %cst_40 = arith.constant 1.000000e+00 : f32
    %188 = vector.broadcast %cst_40 : f32 to vector<1x256xf32>
    %189 = arith.mulf %187, %188 : vector<1x256xf32>
    %190 = math.floor %189 : vector<1x256xf32>
    %191 = arith.fptosi %190 : vector<1x256xf32> to vector<1x256xi32>
    %c0_i32_41 = arith.constant 0 : i32
    %192 = vector.broadcast %c0_i32_41 : i32 to vector<1x256xi32>
    %193 = arith.cmpi sge, %179, %192 : vector<1x256xi32>
    %c16_i32_42 = arith.constant 16 : i32
    %194 = vector.broadcast %c16_i32_42 : i32 to vector<1x256xi32>
    %195 = arith.cmpi slt, %179, %194 : vector<1x256xi32>
    %196 = arith.andi %193, %195 : vector<1x256xi1>
    %c0_i32_43 = arith.constant 0 : i32
    %197 = vector.broadcast %c0_i32_43 : i32 to vector<1x256xi32>
    %198 = arith.cmpi sge, %185, %197 : vector<1x256xi32>
    %199 = arith.andi %196, %198 : vector<1x256xi1>
    %c16_i32_44 = arith.constant 16 : i32
    %200 = vector.broadcast %c16_i32_44 : i32 to vector<1x256xi32>
    %201 = arith.cmpi slt, %185, %200 : vector<1x256xi32>
    %202 = arith.andi %199, %201 : vector<1x256xi1>
    %c0_i32_45 = arith.constant 0 : i32
    %203 = vector.broadcast %c0_i32_45 : i32 to vector<1x256xi32>
    %204 = arith.cmpi sge, %191, %203 : vector<1x256xi32>
    %205 = arith.andi %202, %204 : vector<1x256xi1>
    %c4_i32_46 = arith.constant 4 : i32
    %206 = vector.broadcast %c4_i32_46 : i32 to vector<1x256xi32>
    %207 = arith.cmpi slt, %191, %206 : vector<1x256xi32>
    %208 = arith.andi %205, %207 : vector<1x256xi1>
    %c16_i32_47 = arith.constant 16 : i32
    %209 = vector.broadcast %c16_i32_47 : i32 to vector<1x256xi32>
    %210 = arith.muli %185, %209 : vector<1x256xi32>
    %211 = arith.addi %210, %179 : vector<1x256xi32>
    %c-1_i32_48 = arith.constant -1 : i32
    %212 = vector.broadcast %c-1_i32_48 : i32 to vector<1x256xi32>
    %213 = arith.select %208, %211, %212 : vector<1x256xi1>, vector<1x256xi32>
    %c0_i32_49 = arith.constant 0 : i32
    %214 = vector.broadcast %c0_i32_49 : i32 to vector<1x256xi32>
    %215 = arith.cmpi eq, %191, %214 : vector<1x256xi32>
    %216 = arith.extui %215 : vector<1x256xi1> to vector<1x256xi32>
    %217 = arith.sitofp %216 : vector<1x256xi32> to vector<1x256xf32>
    %218 = vector.extract_strided_slice %0 {offsets = [0, 0, 0], sizes = [1, 32, 1], strides = [1, 1, 1]} : vector<4x32x3xf32> to vector<1x32x1xf32>
    %219 = vector.shape_cast %218 : vector<1x32x1xf32> to vector<32x1xf32>
    %220 = vector.broadcast %219 : vector<32x1xf32> to vector<32x256xf32>
    %221 = vector.broadcast %171 : vector<1x256xf32> to vector<32x256xf32>
    %222 = arith.mulf %220, %221 : vector<32x256xf32>
    %223 = vector.extract_strided_slice %0 {offsets = [0, 0, 1], sizes = [1, 32, 1], strides = [1, 1, 1]} : vector<4x32x3xf32> to vector<1x32x1xf32>
    %224 = vector.shape_cast %223 : vector<1x32x1xf32> to vector<32x1xf32>
    %225 = vector.broadcast %224 : vector<32x1xf32> to vector<32x256xf32>
    %226 = vector.broadcast %172 : vector<1x256xf32> to vector<32x256xf32>
    %227 = arith.mulf %225, %226 : vector<32x256xf32>
    %228 = arith.addf %222, %227 : vector<32x256xf32>
    %229 = vector.extract_strided_slice %0 {offsets = [0, 0, 2], sizes = [1, 32, 1], strides = [1, 1, 1]} : vector<4x32x3xf32> to vector<1x32x1xf32>
    %230 = vector.shape_cast %229 : vector<1x32x1xf32> to vector<32x1xf32>
    %231 = vector.broadcast %230 : vector<32x1xf32> to vector<32x256xf32>
    %232 = vector.broadcast %173 : vector<1x256xf32> to vector<32x256xf32>
    %233 = arith.mulf %231, %232 : vector<32x256xf32>
    %234 = arith.addf %228, %233 : vector<32x256xf32>
    %235 = vector.broadcast %217 : vector<1x256xf32> to vector<32x256xf32>
    %236 = arith.mulf %235, %234 : vector<32x256xf32>
    %c1_i32_50 = arith.constant 1 : i32
    %237 = vector.broadcast %c1_i32_50 : i32 to vector<1x256xi32>
    %238 = arith.cmpi eq, %191, %237 : vector<1x256xi32>
    %239 = arith.extui %238 : vector<1x256xi1> to vector<1x256xi32>
    %240 = arith.sitofp %239 : vector<1x256xi32> to vector<1x256xf32>
    %241 = vector.extract_strided_slice %0 {offsets = [1, 0, 0], sizes = [1, 32, 1], strides = [1, 1, 1]} : vector<4x32x3xf32> to vector<1x32x1xf32>
    %242 = vector.shape_cast %241 : vector<1x32x1xf32> to vector<32x1xf32>
    %243 = vector.broadcast %242 : vector<32x1xf32> to vector<32x256xf32>
    %244 = vector.broadcast %171 : vector<1x256xf32> to vector<32x256xf32>
    %245 = arith.mulf %243, %244 : vector<32x256xf32>
    %246 = vector.extract_strided_slice %0 {offsets = [1, 0, 1], sizes = [1, 32, 1], strides = [1, 1, 1]} : vector<4x32x3xf32> to vector<1x32x1xf32>
    %247 = vector.shape_cast %246 : vector<1x32x1xf32> to vector<32x1xf32>
    %248 = vector.broadcast %247 : vector<32x1xf32> to vector<32x256xf32>
    %249 = vector.broadcast %172 : vector<1x256xf32> to vector<32x256xf32>
    %250 = arith.mulf %248, %249 : vector<32x256xf32>
    %251 = arith.addf %245, %250 : vector<32x256xf32>
    %252 = vector.extract_strided_slice %0 {offsets = [1, 0, 2], sizes = [1, 32, 1], strides = [1, 1, 1]} : vector<4x32x3xf32> to vector<1x32x1xf32>
    %253 = vector.shape_cast %252 : vector<1x32x1xf32> to vector<32x1xf32>
    %254 = vector.broadcast %253 : vector<32x1xf32> to vector<32x256xf32>
    %255 = vector.broadcast %173 : vector<1x256xf32> to vector<32x256xf32>
    %256 = arith.mulf %254, %255 : vector<32x256xf32>
    %257 = arith.addf %251, %256 : vector<32x256xf32>
    %258 = vector.broadcast %240 : vector<1x256xf32> to vector<32x256xf32>
    %259 = arith.mulf %258, %257 : vector<32x256xf32>
    %260 = arith.addf %236, %259 : vector<32x256xf32>
    %c2_i32_51 = arith.constant 2 : i32
    %261 = vector.broadcast %c2_i32_51 : i32 to vector<1x256xi32>
    %262 = arith.cmpi eq, %191, %261 : vector<1x256xi32>
    %263 = arith.extui %262 : vector<1x256xi1> to vector<1x256xi32>
    %264 = arith.sitofp %263 : vector<1x256xi32> to vector<1x256xf32>
    %265 = vector.extract_strided_slice %0 {offsets = [2, 0, 0], sizes = [1, 32, 1], strides = [1, 1, 1]} : vector<4x32x3xf32> to vector<1x32x1xf32>
    %266 = vector.shape_cast %265 : vector<1x32x1xf32> to vector<32x1xf32>
    %267 = vector.broadcast %266 : vector<32x1xf32> to vector<32x256xf32>
    %268 = vector.broadcast %171 : vector<1x256xf32> to vector<32x256xf32>
    %269 = arith.mulf %267, %268 : vector<32x256xf32>
    %270 = vector.extract_strided_slice %0 {offsets = [2, 0, 1], sizes = [1, 32, 1], strides = [1, 1, 1]} : vector<4x32x3xf32> to vector<1x32x1xf32>
    %271 = vector.shape_cast %270 : vector<1x32x1xf32> to vector<32x1xf32>
    %272 = vector.broadcast %271 : vector<32x1xf32> to vector<32x256xf32>
    %273 = vector.broadcast %172 : vector<1x256xf32> to vector<32x256xf32>
    %274 = arith.mulf %272, %273 : vector<32x256xf32>
    %275 = arith.addf %269, %274 : vector<32x256xf32>
    %276 = vector.extract_strided_slice %0 {offsets = [2, 0, 2], sizes = [1, 32, 1], strides = [1, 1, 1]} : vector<4x32x3xf32> to vector<1x32x1xf32>
    %277 = vector.shape_cast %276 : vector<1x32x1xf32> to vector<32x1xf32>
    %278 = vector.broadcast %277 : vector<32x1xf32> to vector<32x256xf32>
    %279 = vector.broadcast %173 : vector<1x256xf32> to vector<32x256xf32>
    %280 = arith.mulf %278, %279 : vector<32x256xf32>
    %281 = arith.addf %275, %280 : vector<32x256xf32>
    %282 = vector.broadcast %264 : vector<1x256xf32> to vector<32x256xf32>
    %283 = arith.mulf %282, %281 : vector<32x256xf32>
    %284 = arith.addf %260, %283 : vector<32x256xf32>
    %c3_i32_52 = arith.constant 3 : i32
    %285 = vector.broadcast %c3_i32_52 : i32 to vector<1x256xi32>
    %286 = arith.cmpi eq, %191, %285 : vector<1x256xi32>
    %287 = arith.extui %286 : vector<1x256xi1> to vector<1x256xi32>
    %288 = arith.sitofp %287 : vector<1x256xi32> to vector<1x256xf32>
    %289 = vector.extract_strided_slice %0 {offsets = [3, 0, 0], sizes = [1, 32, 1], strides = [1, 1, 1]} : vector<4x32x3xf32> to vector<1x32x1xf32>
    %290 = vector.shape_cast %289 : vector<1x32x1xf32> to vector<32x1xf32>
    %291 = vector.broadcast %290 : vector<32x1xf32> to vector<32x256xf32>
    %292 = vector.broadcast %171 : vector<1x256xf32> to vector<32x256xf32>
    %293 = arith.mulf %291, %292 : vector<32x256xf32>
    %294 = vector.extract_strided_slice %0 {offsets = [3, 0, 1], sizes = [1, 32, 1], strides = [1, 1, 1]} : vector<4x32x3xf32> to vector<1x32x1xf32>
    %295 = vector.shape_cast %294 : vector<1x32x1xf32> to vector<32x1xf32>
    %296 = vector.broadcast %295 : vector<32x1xf32> to vector<32x256xf32>
    %297 = vector.broadcast %172 : vector<1x256xf32> to vector<32x256xf32>
    %298 = arith.mulf %296, %297 : vector<32x256xf32>
    %299 = arith.addf %293, %298 : vector<32x256xf32>
    %300 = vector.extract_strided_slice %0 {offsets = [3, 0, 2], sizes = [1, 32, 1], strides = [1, 1, 1]} : vector<4x32x3xf32> to vector<1x32x1xf32>
    %301 = vector.shape_cast %300 : vector<1x32x1xf32> to vector<32x1xf32>
    %302 = vector.broadcast %301 : vector<32x1xf32> to vector<32x256xf32>
    %303 = vector.broadcast %173 : vector<1x256xf32> to vector<32x256xf32>
    %304 = arith.mulf %302, %303 : vector<32x256xf32>
    %305 = arith.addf %299, %304 : vector<32x256xf32>
    %306 = vector.broadcast %288 : vector<1x256xf32> to vector<32x256xf32>
    %307 = arith.mulf %306, %305 : vector<32x256xf32>
    %308 = arith.addf %284, %307 : vector<32x256xf32>
    %309 = tpu.iota {dimensions = array<i32: 0>} : vector<256x256xi32>
    %310 = vector.broadcast %213 : vector<1x256xi32> to vector<256x256xi32>
    %311 = arith.cmpi eq, %309, %310 : vector<256x256xi32>
    %312 = arith.extui %311 : vector<256x256xi1> to vector<256x256xi32>
    %313 = arith.sitofp %312 : vector<256x256xi32> to vector<256x256xf32>
    %314 = arith.truncf %313 : vector<256x256xf32> to vector<256x256xbf16>
    %315 = arith.truncf %308 : vector<32x256xf32> to vector<32x256xbf16>
    "tpu.trace_start"() <{level = 10 : i32, message = "cn,pn->cp"}> : () -> ()
    %cst_53 = arith.constant dense<0.000000e+00> : vector<32x256xf32>
    %316 = tpu.matmul %315, %314, %cst_53 {dimension_numbers = #tpu.dot_dimension_numbers<[1], [1], [0], [0], [0, 0, 1, 0], [], []>} : vector<32x256xbf16>, vector<256x256xbf16>, vector<32x256xf32> -> vector<32x256xf32>
    "tpu.trace_stop"() : () -> ()
    %317 = vector.broadcast %1 : vector<32x1xf32> to vector<32x256xf32>
    %318 = arith.addf %316, %317 : vector<32x256xf32>
    %cst_54 = arith.constant 0.000000e+00 : f32
    %319 = vector.broadcast %cst_54 : f32 to vector<32x256xf32>
    %320 = arith.maximumf %318, %319 : vector<32x256xf32>
    %cst_55 = arith.constant dense<0.000000e+00> : vector<64x256xf32>
    %321 = tpu.matmul %2, %320, %cst_55 {dimension_numbers = #tpu.dot_dimension_numbers<[1], [0], [0], [1], [0, 0, 1, 1], [], []>} : vector<64x32xf32>, vector<32x256xf32>, vector<64x256xf32> -> vector<64x256xf32>
    %322 = vector.broadcast %3 : vector<64x1xf32> to vector<64x256xf32>
    %323 = arith.addf %321, %322 : vector<64x256xf32>
    %cst_56 = arith.constant 0.000000e+00 : f32
    %324 = vector.broadcast %cst_56 : f32 to vector<64x256xf32>
    %325 = arith.maximumf %323, %324 : vector<64x256xf32>
    %cst_57 = arith.constant dense<0.000000e+00> : vector<64x256xf32>
    %326 = tpu.matmul %4, %325, %cst_57 {dimension_numbers = #tpu.dot_dimension_numbers<[1], [0], [0], [1], [0, 0, 1, 1], [], []>} : vector<64x64xf32>, vector<64x256xf32>, vector<64x256xf32> -> vector<64x256xf32>
    %327 = vector.broadcast %5 : vector<64x1xf32> to vector<64x256xf32>
    %328 = arith.addf %326, %327 : vector<64x256xf32>
    %c1_58 = arith.constant 1 : index
    %c0_59 = arith.constant 0 : index
    %c0_60 = arith.constant 0 : index
    %329 = vector.load %arg8[%c1_58, %c0_59, %c0_60] : memref<2x64x256xf32, #tpu.memory_space<vmem>>, vector<1x64x256xf32>
    %330 = vector.shape_cast %329 : vector<1x64x256xf32> to vector<64x256xf32>
    %331 = vector.shape_cast %328 : vector<64x256xf32> to vector<1x64x256xf32>
    tpu.vector_store %arg8[%c1_58, %c0_59, %c0_60], %331 {strides = array<i32>} : memref<2x64x256xf32, #tpu.memory_space<vmem>>, vector<1x64x256xf32>,
    return
  }
  func.func @transform_0(%arg0: i32) -> (i32, i32, i32) {
    %c0_i32 = arith.constant 0 : i32
    %c0_i32_0 = arith.constant 0 : i32
    %c0_i32_1 = arith.constant 0 : i32
    return %arg0, %c0_i32, %c0_i32_0 : i32, i32, i32
  }
  func.func @transform_1(%arg0: i32) -> (i32, i32, i32) {
    %c0_i32 = arith.constant 0 : i32
    %c0_i32_0 = arith.constant 0 : i32
    %c0_i32_1 = arith.constant 0 : i32
    %c0_i32_2 = arith.constant 0 : i32
    return %c0_i32, %c0_i32_0, %c0_i32_1 : i32, i32, i32
  }
  func.func @transform_2(%arg0: i32) -> (i32, i32) {
    %c0_i32 = arith.constant 0 : i32
    %c0_i32_0 = arith.constant 0 : i32
    %c0_i32_1 = arith.constant 0 : i32
    return %c0_i32, %c0_i32_0 : i32, i32
  }
  func.func @transform_3(%arg0: i32) -> (i32, i32) {
    %c0_i32 = arith.constant 0 : i32
    %c0_i32_0 = arith.constant 0 : i32
    %c0_i32_1 = arith.constant 0 : i32
    return %c0_i32, %c0_i32_0 : i32, i32
  }
  func.func @transform_4(%arg0: i32) -> (i32, i32) {
    %c0_i32 = arith.constant 0 : i32
    %c0_i32_0 = arith.constant 0 : i32
    %c0_i32_1 = arith.constant 0 : i32
    return %c0_i32, %c0_i32_0 : i32, i32
  }
  func.func @transform_5(%arg0: i32) -> (i32, i32) {
    %c0_i32 = arith.constant 0 : i32
    %c0_i32_0 = arith.constant 0 : i32
    %c0_i32_1 = arith.constant 0 : i32
    return %c0_i32, %c0_i32_0 : i32, i32
  }
  func.func @transform_6(%arg0: i32) -> (i32, i32) {
    %c0_i32 = arith.constant 0 : i32
    %c0_i32_0 = arith.constant 0 : i32
    %c0_i32_1 = arith.constant 0 : i32
    return %c0_i32, %c0_i32_0 : i32, i32
  }
  func.func @transform_7(%arg0: i32) -> (i32, i32, i32) {
    %c0_i32 = arith.constant 0 : i32
    %c0_i32_0 = arith.constant 0 : i32
    %c0_i32_1 = arith.constant 0 : i32
    return %arg0, %c0_i32, %c0_i32_0 : i32, i32, i32
  }
}

</mosaic_0001>

<bundles_post_ra>
// kernel: lidar2bev_forward.1
= control target key start
LH: loop header
LB: loop body
LE: loop exit
PB: predicated region body
PF: predicated region fallthrough
CT: control target
= control target key end

     0   :  { %v140_v0 = vlaneseq  ;;  %v2813_v1 = vmov 1   ;;  %v4793_v20 = vmov 0   ;;  %v4794_v52 = vmov 2   ;;  %s4785_s1 = inlined_call_operand.vmem [shape: f32[4,32,3], index: 1, kind: input, shape index: {}]   ;;  %s4786_s0 = inlined_call_operand.vmem [shape: f32[2,3,256], index: 0, kind: input, shape index: {}]   ;;  %s4787_s2 = inlined_call_operand.vmem [shape: f32[32,1], index: 2, kind: input, shape index: {}]   ;;  %s4788_s4 = inlined_call_operand.vmem [shape: f32[64,1], index: 4, kind: input, shape index: {}]   ;;  %s4789_s6 = inlined_call_operand.vmem [shape: f32[64,1], index: 6, kind: input, shape index: {}]   ;;  %s4790_s3 = inlined_call_operand.vmem [shape: f32[64,32], index: 3, kind: input, shape index: {}]   ;;  %s4791_s5 = inlined_call_operand.vmem [shape: f32[64,64], index: 5, kind: input, shape index: {}]   ;;  %s4792_s7 = inlined_call_operand.vmem [shape: f32[2,64,256], index: 7, kind: output, shape index: {}]  }
   0x1   :  { %2789 = vset.pattern.permute.xlu0 %v2813_v1  ;;  %2787 = vset.pattern.permute.xlu1 %v2813_v1  ;;  %v2863_v2 = vld [vmem:[%s4785_s1 + $0x20] sm:$0xff]  ;;  %v2880_v5 = vld [vmem:[%s4785_s1 + $0x48] sm:$0xff]  ;;  %v2927_v25 = vld [vmem:[%s4785_s1 + $0x18] sm:$0xff]  ;;  %v4795_v62 = vmov 0.0   ;;  %v4803_v63 = vmov 1.0|1.0  }
   0x2   :  { %v2868_v3 = vld [vmem:[%s4785_s1] sm:$0xff]  ;;  %325 = vperm.xlu0 %2789, %v2863_v2   ;;  %v2885_v6 = vld [vmem:[%s4785_s1 + $0x8] sm:$0xff]  ;;  %v2889_v9 = vshrl.u32 %v140_v0, 7  ;;  %v2951_v39 = vld [vmem:[%s4785_s1 + $0x30] sm:$0xff]  ;;  %1170 = vmatprep.mubr.f32.mxu1 %v4795_v62 }
   0x3   :  { %167 = vperm.xlu1 %2787, %v2868_v3   ;;  %v2875_v4 = vld [vmem:[%s4786_s0] sm:$0x77]  ;;  %v2896_v12 = vld [vmem:[%s4785_s1 + $0x68] sm:$0xff] }
   0x4   :  { %v2395_v7 = vadd.f32 8.0, %v2875_v4  ;;  %v2396_v8 = vadd.f32 2.0, %v2875_v4  ;;  %4904 = vst [vmem:[#allocation2_spill] sm:$0xff] %v2889_v9  ;;  %v2899_v15 = vsub.s32 0, %v2889_v9  ;;  %v2902_v16 = vsub.s32 4, %v2889_v9  ;;  %v2907_v17 = vld [vmem:[%s4785_s1 + $0x28] sm:$0xff] }
   0x5   :  { %v2914_v21 = vsub.s32 1, %v2889_v9  ;;  %v188_v22 = vsub.s32 5, %v2889_v9  ;;  %v2940_v35 = vld [vmem:[%s4786_s0 + $0x8] sm:$0x77]  ;;  %v2991_v56 = vadd.s32 8, %v2889_v9  ;;  %v2995_v57 = vadd.s32 16, %v2889_v9 }
   0x6   :  { %v80_v10 = vfloor.f32 %v2395_v7  ;;  %v83_v11 = vfloor.f32 %v2396_v8  ;;  %459 = vperm.xlu0 %2789, %v2880_v5   ;;  %v143_v23 = vrot.slane %v2875_v4, %v2899_v15  ;;  %v147_v24 = vrot.slane %v2875_v4, %v2902_v16 }
   0x7   :  { %171 = vperm.xlu1 %2787, %v2885_v6   ;;  %v1501_v41 = vrot.slane %v2940_v35, %v2914_v21  ;;  %v1505_v42 = vrot.slane %v2940_v35, %v188_v22  ;;  %v1475_v45 = vrot.slane %v2940_v35, %v2899_v15  ;;  %v1479_v48 = vrot.slane %v2940_v35, %v2902_v16 }
   0x8   :  { %v2774_v13 = vtrunc.f32 %v80_v10  ;;  %v2776_v14 = vtrunc.f32 %v83_v11  ;;  %v2962_v43 = vrot.slane %v143_v23, %v2899_v15  ;;  %v2965_v44 = vrot.slane %v147_v24, %v2899_v15  ;;  %4909 = vst [vmem:[#allocation3_spill] sm:$0xff] %v2991_v56  ;;  %4910 = vst [vmem:[#allocation4_spill] sm:$0xff] %v2995_v57  ;;  %v34_v11 = vld [vmem:[%s4785_s1 + $0x40] sm:$0xff] }
   0x9   :  { %v2973_v47 = vrot.slane %v1501_v41, %v2914_v21  ;;  %v2978_v49 = vrot.slane %v1505_v42, %v2914_v21  ;;  %v2981_v50 = vrot.slane %v1475_v45, %v2899_v15  ;;  %v2985_v53 = vrot.slane %v1479_v48, %v2899_v15  ;;  %v3100_v42 = vld [vmem:[%s4785_s1 + $0x58] sm:$0xff] }
   0xa   :  { %v2775_v18 = vcvt.f32.s32 %v2774_v13  ;;  %v2909_v19 = vcvt.f32.s32 %v2776_v14  ;;  %589 = vperm.xlu0 %2789, %v2896_v12   ;;  %v2998_v58 = vadd.s32 24, %v2889_v9  ;;  %v2552_v61 = vadd.f32 2.0, %v2940_v35  ;;  %v3125_v48 = vld [vmem:[%s4785_s1 + $0x78] sm:$0xff] }
   0xb   :  { %2788 = vset.pattern.permute.xlu1 %v4793_v20  ;;  %v3025_v0 = vadd.s32 32, %v2889_v9  ;;  %v2551_v8 = vadd.f32 8.0, %v2940_v35  ;;  %v3052_v14 = vadd.s32 56, %v2889_v9  ;;  %v3095_v41 = vadd.s32 72, %v2889_v9 }
   0xc   :  { %vm85_vm0 = vcmp.ge.s32.totalorder %v2775_v18, 0  ;;  %vm86_vm1 = vcmp.lt.s32.totalorder %v2775_v18, 16  ;;  %vm98_vm2 = vcmp.ge.s32.totalorder %v2909_v19, 0  ;;  %vm104_vm3 = vcmp.lt.s32.totalorder %v2909_v19, 4  ;;  %303 = vperm.xlu1 %2788, %v2907_v17   ;;  %4911 = vst [vmem:[#allocation5_spill] sm:$0xff] %v2998_v58 }
   0xd   :  { %v88_v26 = vsel %vm85_vm0, 1, %v4793_v20  ;;  %v93_v27 = vsel %vm86_vm1, 1, %v4793_v20  ;;  %v99_v28 = vsel %vm98_vm2, 1, %v4793_v20  ;;  %v105_v29 = vsel %vm104_vm3, 1, %v4793_v20  ;;  %vm2933_vm4 = vmand %vm85_vm0, %vm86_vm1  ;;  %4912 = vst [vmem:[#allocation6_spill] sm:$0xff] %v3025_v0 }
   0xe   :  { %v2397_v31 = vrot.slane %v88_v26, 9  ;;  %v2398_v32 = vrot.slane %v93_v27, 9  ;;  %v2399_v33 = vrot.slane %v99_v28, 10  ;;  %v2400_v34 = vrot.slane %v105_v29, 10  ;;  %179 = vperm.xlu0 %2789, %v2927_v25   ;;  %4915 = vst [vmem:[#allocation9_spill] sm:$0xff] %v3052_v14  ;;  %v3080_v29 = vld [vmem:[%s4785_s1 + $0x10] sm:$0xff] }
   0xf   :  { %v110_v36 = vmul.u32 16, %v2775_v18  ;;  %v111_v37 = vrot.slane %v2775_v18, 7  ;;  %v1435_v7 = vfloor.f32 %v2552_v61  ;;  %v1432_v13 = vfloor.f32 %v2551_v8  ;;  %v3059_v18 = vld [vmem:[%s4785_s1 + $0x60] sm:$0xff]  ;;  %4917 = vst [vmem:[#allocation11_spill] sm:$0xff] %v3095_v41 }
  0x10   :  { %vm91_vm5 = vcmp.ne.s32.totalorder %v2397_v31, 0  ;;  %vm96_vm6 = vcmp.ne.s32.totalorder %v2398_v32, 0  ;;  %vm2943_vm7 = vcmp.ne.s32.totalorder %v2399_v33, 0  ;;  %2790 = vset.pattern.permute.xlu1 %v2813_v1  ;;  %vm108_vm9 = vcmp.ne.s32.totalorder %v2400_v34, 0 }
  0x11   :  { %vm92_vm8 = vmand %vm2933_vm4, %vm91_vm5  ;;  %v112_v40 = vadd.s32 %v111_v37, %v110_v36  ;;  %329 = vperm.xlu1 %2790, %v2907_v17   ;;  %v2780_v10 = vtrunc.f32 %v1435_v7  ;;  %v2778_v23 = vtrunc.f32 %v1432_v13  ;;  %v3131_v61 = vadd.s32 80, %v2889_v9 }
  0x12   :  { %vm97_vm10 = vmand %vm92_vm8, %vm96_vm6  ;;  %333 = vperm.xlu0 %2789, %v2951_v39   ;;  %v3190_v13 = vadd.s32 120, %v2889_v9 }
  0x13   :  { %vm103_vm11 = vmand %vm97_vm10, %vm2943_vm7  ;;  %v2401_v46 = vrot.slane %v112_v40, 9  ;;  %v2779_v24 = vcvt.f32.s32 %v2778_v23  ;;  %v3092_v40 = vadd.s32 64, %v2889_v9  ;;  %4920 = vst [vmem:[#allocation12_spill] sm:$0xff] %v3131_v61  ;;  %v3215_v23 = vadd.s32 136, %v2889_v9 }
  0x14   :  { %vm109_vm12 = vmand %vm103_vm11, %vm108_vm9  ;;  %4927 = vst [vmem:[#allocation19_spill] sm:$0xff] %v3190_v13 }
  0x15   :  { %v115_v51 = vsel %vm109_vm12, %v2401_v46, 4294967295  ;;  %2791 = vset.pattern.permute.xlu1 %v4794_v52  ;;  %v1462_v30 = vmul.u32 16, %v2779_v24  ;;  %v1463_v31 = vrot.slane %v2779_v24, 7  ;;  %4916 = vst [vmem:[#allocation10_spill] sm:$0xff] %v3092_v40  ;;  %4929 = vst [vmem:[#allocation21_spill] sm:$0xff] %v3215_v23 }
  0x16   :  { %v719_v54 = vrot.slane %v115_v51, %v2899_v15  ;;  %v723_v55 = vrot.slane %v115_v51, %v2902_v16  ;;  %217 = vperm.xlu1 %2791, %v2868_v3   ;;  %2801 = vset.pattern.permute.xlu0 %v4793_v20 }
  0x17   :  { %121 = vperm.xlu0 %2801, %v2868_v3   ;;  %v3028_v3 = vadd.s32 40, %v2889_v9  ;;  %v1464_v38 = vadd.s32 %v1463_v31, %v1462_v30  ;;  %v3271_v30 = vadd.s32 184, %v2889_v9  ;;  %v3306_v31 = vadd.s32 208, %v2889_v9 }
  0x18   :  { %v3001_v59 = vrot.slane %v719_v54, %v2899_v15  ;;  %v3004_v60 = vrot.slane %v723_v55, %v2899_v15 }
  0x19   :  { %4913 = vst [vmem:[#allocation7_spill] sm:$0xff] %v3028_v3  ;;  %v2557_v46 = vrot.slane %v1464_v38, 9  ;;  %4935 = vst [vmem:[#allocation27_spill] sm:$0xff] %v3271_v30 }
  0x1a   :  { %357 = vperm.xlu1 %2791, %v2863_v2   ;;  %vm733_vm13 = vcmp.eq.s32.totalorder %v2889_v9, %v3004_v60  ;;  %vm735_vm14 = vcmp.eq.s32.totalorder %v2991_v56, %v3004_v60  ;;  %vm732_vm15 = vcmp.eq.s32.totalorder %v2889_v9, %v3001_v59  ;;  %vm734_vm0 = vcmp.eq.s32.totalorder %v2991_v56, %v3001_v59 }
  0x1b   :  { %vm2470_vm1 = vmpackc.low %vm735_vm14, %vm733_vm13  ;;  %vm737_vm2 = vcmp.eq.s32.totalorder %v2995_v57, %v3004_v60  ;;  %vm739_vm3 = vcmp.eq.s32.totalorder %v2998_v58, %v3004_v60  ;;  %126 = vperm.xlu0 %2801, %v2885_v6   ;;  %vm736_vm6 = vcmp.eq.s32.totalorder %v2995_v57, %v3001_v59  ;;  %vm738_vm7 = vcmp.eq.s32.totalorder %v2998_v58, %v3001_v59 }
  0x1c   :  { %2471 = vmatprep.subr.msk.bf16.mxu0 %vm2470_vm1, %v4803_v63  ;;  %vm2472_vm4 = vmpackc.low %vm734_vm0, %vm732_vm15  ;;  %vm741_vm8 = vcmp.eq.s32.totalorder %v3025_v0, %v3004_v60  ;;  %vm743_vm9 = vcmp.eq.s32.totalorder %v3028_v3, %v3004_v60  ;;  %vm740_vm12 = vcmp.eq.s32.totalorder %v3025_v0, %v3001_v59  ;;  %vm742_vm15 = vcmp.eq.s32.totalorder %v3028_v3, %v3001_v59 }
  0x1d   :  { %2473 = vmatpush1.bf16.xpose.msk.msra.mxu0 %vm2472_vm4, %v4803_v63  ;;  %vm2474_vm5 = vmpackc.low %vm739_vm3, %vm737_vm2  ;;  %vm747_vm1 = vcmp.eq.s32.totalorder %v3052_v14, %v3004_v60  ;;  %vm1437_vm2 = vcmp.ge.s32.totalorder %v2779_v24, 0  ;;  %vm1438_vm3 = vcmp.lt.s32.totalorder %v2779_v24, 16  ;;  %v3233_v24 = vadd.s32 144, %v2889_v9  ;;  %4938 = vst [vmem:[#allocation30_spill] sm:$0xff] %v3306_v31 }
  0x1e   :  { %361 = vperm.xlu1 %2791, %v2907_v17   ;;  %2475 = vmatprep.subr.msk.bf16.mxu0 %vm2474_vm5, %v4803_v63  ;;  %vm2476_vm10 = vmpackc.low %vm738_vm7, %vm736_vm6  ;;  %v3054_v17 = vcvt.f32.s32 %v2780_v10  ;;  %v1440_v32 = vsel %vm1437_vm2, 1, %v4793_v20  ;;  %v1445_v33 = vsel %vm1438_vm3, 1, %v4793_v20  ;;  %v3184_v10 = vld [vmem:[%s4785_s1 + $0x50] sm:$0xff] }
  0x1f   :  { %298 = vperm.xlu0 %2801, %v2863_v2   ;;  %vm2478_vm11 = vmpackc.low %vm743_vm9, %vm741_vm8  ;;  %v3049_v2 = vadd.s32 48, %v2889_v9  ;;  %v2553_v36 = vrot.slane %v1440_v32, 9  ;;  %v2554_v37 = vrot.slane %v1445_v33, 9  ;;  %4930 = vst [vmem:[#allocation22_spill] sm:$0xff] %v3233_v24  ;;  %v3309_v32 = vadd.s32 216, %v2889_v9 }
  0x20   :  { %vm1450_vm13 = vcmp.ge.s32.totalorder %v3054_v17, 0  ;;  %vm1456_vm14 = vcmp.lt.s32.totalorder %v3054_v17, 4  ;;  %vm2480_vm4 = vmpackc.low %vm742_vm15, %vm740_vm12  ;;  %vm749_vm15 = vcmp.eq.s32.totalorder %v3092_v40, %v3004_v60  ;;  %v3325_v33 = vadd.s32 224, %v2889_v9 }
  0x21   :  { %4914 = vst [vmem:[#allocation8_spill] sm:$0xff] %v3049_v2  ;;  %v1451_v26 = vsel %vm1450_vm13, 1, %v4793_v20  ;;  %v1457_v27 = vsel %vm1456_vm14, 1, %v4793_v20  ;;  %vm745_vm0 = vcmp.eq.s32.totalorder %v3049_v2, %v3004_v60  ;;  %vm1439_vm6 = vmand %vm1437_vm2, %vm1438_vm3  ;;  %vm1443_vm7 = vcmp.ne.s32.totalorder %v2553_v36, 0 }
  0x22   :  { %2792 = vset.pattern.permute.xlu1 %v4793_v20  ;;  %v2555_v28 = vrot.slane %v1451_v26, 10  ;;  %v2556_v34 = vrot.slane %v1457_v27, 10  ;;  %vm2482_vm5 = vmpackc.low %vm747_vm1, %vm745_vm0  ;;  %vm1448_vm8 = vcmp.ne.s32.totalorder %v2554_v37, 0  ;;  %vm744_vm12 = vcmp.eq.s32.totalorder %v3049_v2, %v3001_v59  ;;  %4939 = vst [vmem:[#allocation31_spill] sm:$0xff] %v3309_v32 }
  0x23   :  { %433 = vperm.xlu1 %2792, %v2880_v5   ;;  %428 = vperm.xlu0 %2801, %v34_v11   ;;  %vm746_vm13 = vcmp.eq.s32.totalorder %v3052_v14, %v3001_v59  ;;  %vm751_vm0 = vcmp.eq.s32.totalorder %v3095_v41, %v3004_v60  ;;  %v3236_v26 = vadd.s32 152, %v2889_v9  ;;  %v3250_v27 = vadd.s32 160, %v2889_v9  ;;  %4940 = vst [vmem:[#allocation32_spill] sm:$0xff] %v3325_v33 }
  0x24   :  { %vm3105_vm9 = vcmp.ne.s32.totalorder %v2555_v28, 0  ;;  %vm2484_vm3 = vmpackc.low %vm746_vm13, %vm744_vm12  ;;  %v3253_v28 = vadd.s32 168, %v2889_v9  ;;  %v3343_v36 = vsub.s32 2, %v2889_v9 }
  0x25   :  { %2477 = vmatpush1.bf16.xpose.msk.msra.mxu0 %vm2476_vm10, %v4803_v63  ;;  %vm1444_vm10 = vmand %vm1439_vm6, %vm1443_vm7  ;;  %vm750_vm6 = vcmp.eq.s32.totalorder %v3095_v41, %v3001_v59  ;;  %vm753_vm7 = vcmp.eq.s32.totalorder %v3131_v61, %v3004_v60  ;;  %4931 = vst [vmem:[#allocation23_spill] sm:$0xff] %v3236_v26 }
  0x26   :  { %2479 = vmatprep.subr.msk.bf16.mxu0 %vm2478_vm11, %v4803_v63  ;;  %vm1460_vm11 = vcmp.ne.s32.totalorder %v2556_v34, 0  ;;  %vm1449_vm14 = vmand %vm1444_vm10, %vm1448_vm8  ;;  %4932 = vst [vmem:[#allocation24_spill] sm:$0xff] %v3250_v27  ;;  %v3328_v34 = vadd.s32 232, %v2889_v9  ;;  %v1535_v62 = vrot.slane %v2940_v35, %v3343_v36 }
  0x27   :  { %2793 = vset.pattern.permute.xlu1 %v2813_v1  ;;  %558 = vperm.xlu0 %2801, %v3059_v18   ;;  %vm1455_vm1 = vmand %vm1449_vm14, %vm3105_vm9  ;;  %4933 = vst [vmem:[#allocation25_spill] sm:$0xff] %v3253_v28 }
  0x28   :  { %455 = vperm.xlu1 %2793, %v34_v11   ;;  %vm1461_vm2 = vmand %vm1455_vm1, %vm1460_vm11  ;;  %vm752_vm11 = vcmp.eq.s32.totalorder %v3131_v61, %v3001_v59  ;;  %4941 = vst [vmem:[#allocation33_spill] sm:$0xff] %v3328_v34 }
  0x29   :  { %v1467_v51 = vsel %vm1461_vm2, %v2557_v46, 4294967295 }
  0x2a   :  { %v1830_v54 = vrot.slane %v1467_v51, %v2899_v15  ;;  %v1834_v55 = vrot.slane %v1467_v51, %v2902_v16  ;;  %v3162_v16 = vadd.s32 104, %v2889_v9  ;;  %v3368_v51 = vadd.s32 240, %v2889_v9 }
  0x2b   :  { %131 = vperm.xlu0 %2801, %v3080_v29  }
  0x2c   :  { %2794 = vset.pattern.permute.xlu1 %v4794_v52  ;;  %v3139_v7 = vrot.slane %v1830_v54, %v2899_v15  ;;  %v3142_v8 = vrot.slane %v1834_v55, %v2899_v15  ;;  %v3159_v15 = vadd.s32 96, %v2889_v9  ;;  %4925 = vst [vmem:[#allocation17_spill] sm:$0xff] %v3162_v16  ;;  %vm759_vm14 = vcmp.eq.s32.totalorder %v3162_v16, %v3004_v60 }
  0x2d   :  { %487 = vperm.xlu1 %2794, %v34_v11   ;;  %2481 = vmatpush1.bf16.xpose.msk.msra.mxu0 %vm2480_vm4, %v4803_v63  ;;  %vm2486_vm4 = vmpackc.low %vm751_vm0, %vm749_vm15  ;;  %v3187_v11 = vadd.s32 112, %v2889_v9  ;;  %vm758_vm2 = vcmp.eq.s32.totalorder %v3162_v16, %v3001_v59  ;;  %4944 = vst [vmem:[#allocation34_spill] sm:$0xff] %v3368_v51  ;;  %v3371_v54 = vadd.s32 248, %v2889_v9  ;;  %v185_v55 = vrot.slane %v2875_v4, %v2914_v21 }
  0x2e   :  { %2483 = vmatprep.subr.msk.bf16.mxu0 %vm2482_vm5, %v4803_v63  ;;  %4922 = vst [vmem:[#allocation14_spill] sm:$0xff] %v3139_v7  ;;  %4923 = vst [vmem:[#allocation15_spill] sm:$0xff] %v3142_v8  ;;  %vm748_vm5 = vcmp.eq.s32.totalorder %v3092_v40, %v3001_v59  ;;  %vm757_vm13 = vcmp.eq.s32.totalorder %v3159_v15, %v3004_v60  ;;  %vm756_vm1 = vcmp.eq.s32.totalorder %v3159_v15, %v3001_v59 }
  0x2f   :  { %443 = vperm.xlu0 %2801, %v3100_v42   ;;  %vm2488_vm9 = vmpackc.low %vm750_vm6, %vm748_vm5  ;;  %4924 = vst [vmem:[#allocation16_spill] sm:$0xff] %v3159_v15 }
  0x30   :  { %vm2494_vm0 = vmpackc.low %vm759_vm14, %vm757_vm13  ;;  %4926 = vst [vmem:[#allocation18_spill] sm:$0xff] %v3187_v11  ;;  %vm766_vm14 = vcmp.eq.s32.totalorder %v3215_v23, %v3001_v59 }
  0x31   :  { %491 = vperm.xlu1 %2794, %v2880_v5   ;;  %v3134_v5 = vadd.s32 88, %v2889_v9  ;;  %vm2496_vm5 = vmpackc.low %vm758_vm2, %vm756_vm1  ;;  %4945 = vst [vmem:[#allocation35_spill] sm:$0xff] %v3371_v54 }
  0x33   :  { %573 = vperm.xlu0 %2801, %v3125_v48   ;;  %4921 = vst [vmem:[#allocation13_spill] sm:$0xff] %v3134_v5  ;;  %vm755_vm8 = vcmp.eq.s32.totalorder %v3134_v5, %v3004_v60  ;;  %vm754_vm12 = vcmp.eq.s32.totalorder %v3134_v5, %v3001_v59 }
  0x34   :  { %vm2490_vm10 = vmpackc.low %vm755_vm8, %vm753_vm7  ;;  %vm760_vm7 = vcmp.eq.s32.totalorder %v3187_v11, %v3001_v59  ;;  %vm762_vm8 = vcmp.eq.s32.totalorder %v3190_v13, %v3001_v59 }
  0x35   :  { %2795 = vset.pattern.permute.xlu1 %v4793_v20  ;;  %2485 = vmatpush1.bf16.xpose.msk.msra.mxu0 %vm2484_vm3, %v4803_v63  ;;  %vm2492_vm15 = vmpackc.low %vm754_vm12, %vm752_vm11  ;;  %vm761_vm3 = vcmp.eq.s32.totalorder %v3187_v11, %v3004_v60 }
  0x36   :  { %563 = vperm.xlu1 %2795, %v2896_v12   ;;  %2487 = vmatprep.subr.msk.bf16.mxu0 %vm2486_vm4, %v4803_v63  ;;  %vm763_vm4 = vcmp.eq.s32.totalorder %v3190_v13, %v3004_v60  ;;  %vm2500_vm11 = vmpackc.low %vm762_vm8, %vm760_vm7 }
  0x37   :  { %2808 = vset.pattern.permute.xlu0 %v4794_v52  ;;  %vm2498_vm6 = vmpackc.low %vm763_vm4, %vm761_vm3  ;;  %vm768_vm3 = vcmp.eq.s32.totalorder %v3233_v24, %v3001_v59  ;;  %vm770_vm4 = vcmp.eq.s32.totalorder %v3236_v26, %v3001_v59 }
  0x38   :  { %221 = vperm.xlu0 %2808, %v2885_v6   ;;  %v33_v6 = vld [vmem:[%s4785_s1 + $0x38] sm:$0xff]  ;;  %vm2508_vm7 = vmpackc.low %vm770_vm4, %vm768_vm3 }
  0x3a   :  { %2796 = vset.pattern.permute.xlu1 %v2813_v1 }
  0x3b   :  { %585 = vperm.xlu1 %2796, %v3059_v18  }
  0x3c   :  { %225 = vperm.xlu0 %2808, %v3080_v29  }
  0x3d   :  { %2489 = vmatpush1.bf16.xpose.msk.msra.mxu0 %vm2488_vm9, %v4803_v63 }
  0x3e   :  { %2491 = vmatprep.subr.msk.bf16.mxu0 %vm2490_vm10, %v4803_v63  ;;  %vm767_vm10 = vcmp.eq.s32.totalorder %v3215_v23, %v3004_v60 }
  0x3f   :  { %2797 = vset.pattern.permute.xlu1 %v4794_v52 }
  0x40   :  { %617 = vperm.xlu1 %2797, %v3059_v18   ;;  %369 = vperm.xlu0 %2808, %v33_v6   ;;  %v3197_v18 = vld [vmem:[%s4785_s1 + $0x70] sm:$0xff] }
  0x44   :  { %621 = vperm.xlu1 %2797, %v2896_v12   ;;  %495 = vperm.xlu0 %2808, %v3184_v10   ;;  %v3212_v12 = vadd.s32 128, %v2889_v9 }
  0x45   :  { %2493 = vmatpush1.bf16.xpose.msk.msra.mxu0 %vm2492_vm15, %v4803_v63  ;;  %vm769_vm15 = vcmp.eq.s32.totalorder %v3233_v24, %v3004_v60 }
  0x46   :  { %2495 = vmatprep.subr.msk.bf16.mxu0 %vm2494_vm0, %v4803_v63  ;;  %4928 = vst [vmem:[#allocation20_spill] sm:$0xff] %v3212_v12  ;;  %vm765_vm9 = vcmp.eq.s32.totalorder %v3212_v12, %v3004_v60  ;;  %vm764_vm13 = vcmp.eq.s32.totalorder %v3212_v12, %v3001_v59  ;;  %vm771_vm0 = vcmp.eq.s32.totalorder %v3236_v26, %v3004_v60 }
  0x47   :  { %vm2502_vm12 = vmpackc.low %vm767_vm10, %vm765_vm9  ;;  %vm772_vm9 = vcmp.eq.s32.totalorder %v3250_v27, %v3001_v59  ;;  %vm774_vm10 = vcmp.eq.s32.totalorder %v3253_v28, %v3001_v59 }
  0x48   :  { %2798 = vset.pattern.permute.xlu1 %v4793_v20  ;;  %625 = vperm.xlu0 %2808, %v3197_v18   ;;  %vm2504_vm1 = vmpackc.low %vm766_vm14, %vm764_vm13 }
  0x49   :  { %136 = vperm.xlu1 %2798, %v2927_v25   ;;  %vm2506_vm2 = vmpackc.low %vm771_vm0, %vm769_vm15  ;;  %vm778_vm0 = vcmp.eq.s32.totalorder %v3271_v30, %v3001_v59 }
  0x4a   :  { %vm2512_vm13 = vmpackc.low %vm774_vm10, %vm772_vm9 }
  0x4c   :  { %2812 = vset.pattern.permute.xlu0 %v4793_v20 }
  0x4d   :  { %2799 = vset.pattern.permute.xlu1 %v2813_v1  ;;  %2497 = vmatpush1.bf16.xpose.msk.msra.mxu0 %vm2496_vm5, %v4803_v63  ;;  %vm773_vm5 = vcmp.eq.s32.totalorder %v3250_v27, %v3004_v60 }
  0x4e   :  { %175 = vperm.xlu1 %2799, %v3080_v29   ;;  %2499 = vmatprep.subr.msk.bf16.mxu0 %vm2498_vm6, %v4803_v63  ;;  %vm775_vm6 = vcmp.eq.s32.totalorder %v3253_v28, %v3004_v60  ;;  %v3268_v29 = vadd.s32 176, %v2889_v9 }
  0x4f   :  { %vm2510_vm8 = vmpackc.low %vm775_vm6, %vm773_vm5 }
  0x50   :  { %4934 = vst [vmem:[#allocation26_spill] sm:$0xff] %v3268_v29  ;;  %vm776_vm15 = vcmp.eq.s32.totalorder %v3268_v29, %v3001_v59 }
  0x51   :  { %vm2516_vm3 = vmpackc.low %vm778_vm0, %vm776_vm15  ;;  %vm116_vm0 = vcmp.eq.s32.totalorder %v2909_v19, 0 }
  0x52   :  { %2800 = vset.pattern.permute.xlu1 %v4793_v20 }
  0x53   :  { %308 = vperm.xlu1 %2800, %v2951_v39  }
  0x55   :  { %2501 = vmatpush1.bf16.xpose.msk.msra.mxu0 %vm2500_vm11, %v4803_v63  ;;  %vm777_vm11 = vcmp.eq.s32.totalorder %v3268_v29, %v3004_v60 }
  0x56   :  { %2503 = vmatprep.subr.msk.bf16.mxu0 %vm2502_vm12, %v4803_v63  ;;  %vm779_vm12 = vcmp.eq.s32.totalorder %v3271_v30, %v3004_v60 }
  0x57   :  { %313 = vperm.xlu1 %2800, %v33_v6   ;;  %vm2514_vm14 = vmpackc.low %vm779_vm12, %vm777_vm11  ;;  %vm784_vm11 = vcmp.eq.s32.totalorder %v3306_v31, %v3001_v59  ;;  %vm786_vm12 = vcmp.eq.s32.totalorder %v3309_v32, %v3001_v59 }
  0x58   :  { %vm2524_vm15 = vmpackc.low %vm786_vm12, %vm784_vm11  ;;  %vm1671_vm11 = vcmp.eq.s32.totalorder %v3054_v17, 2 }
  0x5b   :  { %2802 = vset.pattern.permute.xlu1 %v2813_v1 }
  0x5c   :  { %337 = vperm.xlu1 %2802, %v33_v6   ;;  %v189_v6 = vrot.slane %v2875_v4, %v188_v22 }
  0x5d   :  { %2505 = vmatpush1.bf16.xpose.msk.msra.mxu0 %vm2504_vm1, %v4803_v63 }
  0x5e   :  { %2507 = vmatprep.subr.msk.bf16.mxu0 %vm2506_vm2, %v4803_v63 }
  0x60   :  { %2803 = vset.pattern.permute.xlu1 %v4794_v52 }
  0x61   :  { %229 = vperm.xlu1 %2803, %v2927_v25   ;;  %v3287_v25 = vadd.s32 192, %v2889_v9 }
  0x63   :  { %4936 = vst [vmem:[#allocation28_spill] sm:$0xff] %v3287_v25  ;;  %vm781_vm1 = vcmp.eq.s32.totalorder %v3287_v25, %v3004_v60  ;;  %vm780_vm5 = vcmp.eq.s32.totalorder %v3287_v25, %v3001_v59  ;;  %v4948_v25 = vmov 2  }
  0x65   :  { %365 = vperm.xlu1 %2803, %v2951_v39   ;;  %2509 = vmatpush1.bf16.xpose.msk.msra.mxu0 %vm2508_vm7, %v4803_v63  ;;  %v3290_v39 = vadd.s32 200, %v2889_v9  ;;  %vm785_vm7 = vcmp.eq.s32.totalorder %v3306_v31, %v3004_v60 }
  0x66   :  { %2511 = vmatprep.subr.msk.bf16.mxu0 %vm2510_vm8, %v4803_v63  ;;  %vm787_vm8 = vcmp.eq.s32.totalorder %v3309_v32, %v3004_v60  ;;  %v4946_v32 = vmov 0.0  }
  0x67   :  { %4937 = vst [vmem:[#allocation29_spill] sm:$0xff] %v3290_v39  ;;  %vm783_vm2 = vcmp.eq.s32.totalorder %v3290_v39, %v3004_v60  ;;  %vm782_vm6 = vcmp.eq.s32.totalorder %v3290_v39, %v3001_v59  ;;  %vm2522_vm10 = vmpackc.low %vm787_vm8, %vm785_vm7  ;;  %v3395_v31 = vsel %vm116_vm0, 1.0, %v4946_v32  ;;  %vm795_vm7 = vcmp.eq.s32.totalorder %v3371_v54, %v3004_v60 }
  0x68   :  { %vm2518_vm4 = vmpackc.low %vm783_vm2, %vm781_vm1  ;;  %vm1468_vm2 = vcmp.eq.s32.totalorder %v3054_v17, 0  ;;  %vm1593_vm8 = vcmp.eq.s32.totalorder %v3054_v17, 1  ;;  %vm794_vm0 = vcmp.eq.s32.totalorder %v3371_v54, %v3001_v59 }
  0x69   :  { %2804 = vset.pattern.permute.xlu1 %v4793_v20  ;;  %vm2520_vm9 = vmpackc.low %vm782_vm6, %vm780_vm5  ;;  %vm293_vm5 = vcmp.eq.s32.totalorder %v2909_v19, 1  ;;  %vm793_vm6 = vcmp.eq.s32.totalorder %v3368_v51, %v3004_v60 }
  0x6a   :  { %438 = vperm.xlu1 %2804, %v3184_v10   ;;  %vm2530_vm12 = vmpackc.low %vm795_vm7, %vm793_vm6  ;;  %vm1275_vm6 = vcmask 523264  }
  0x6d   :  { %2513 = vmatpush1.bf16.xpose.msk.msra.mxu0 %vm2512_vm13, %v4803_v63  ;;  %vm789_vm13 = vcmp.eq.s32.totalorder %v3325_v33, %v3004_v60 }
  0x6e   :  { %2805 = vset.pattern.permute.xlu1 %v2813_v1  ;;  %2515 = vmatprep.subr.msk.bf16.mxu0 %vm2514_vm14, %v4803_v63  ;;  %vm791_vm14 = vcmp.eq.s32.totalorder %v3328_v34, %v3004_v60  ;;  %v4951_v60 = vmov 1.0|1.0  }
  0x6f   :  { %463 = vperm.xlu1 %2805, %v3184_v10   ;;  %vm3358_vm1 = vmpackc.low %vm791_vm14, %vm789_vm13  ;;  %v235_v10 = vrot.slane %v2875_v4, %v3343_v36  ;;  %vm1749_vm13 = vcmp.eq.s32.totalorder %v3054_v17, 3  ;;  %vm553_vm14 = vcmp.eq.s32.totalorder %v2909_v19, 3 }
  0x70   :  { %v2561_v15 = vsel %vm1749_vm13, 1.0, %v4946_v32  ;;  %v2405_v5 = vsel %vm553_vm14, 1.0, %v4946_v32 }
  0x71   :  { %v3435_v29 = vrot.slane %v235_v10, %v3343_v36  ;;  %v1796_v3 = vrot.slane %v2561_v15, %v3343_v36 }
  0x73   :  { %467 = vperm.xlu1 %2805, %v3100_v42  }
  0x75   :  { %2517 = vmatpush1.bf16.xpose.msk.msra.mxu0 %vm2516_vm3, %v4803_v63  ;;  %vm788_vm3 = vcmp.eq.s32.totalorder %v3325_v33, %v3001_v59  ;;  %v2559_v33 = vsel %vm1593_vm8, 1.0, %v4946_v32 }
  0x76   :  { %2519 = vmatprep.subr.msk.bf16.mxu0 %vm2518_vm4, %v4803_v63  ;;  %vm790_vm4 = vcmp.eq.s32.totalorder %v3328_v34, %v3001_v59  ;;  %v3429_v34 = vrot.slane %v189_v6, %v2914_v21  ;;  %v2403_v6 = vsel %vm293_vm5, 1.0, %v4946_v32  ;;  %v1640_v13 = vrot.slane %v2559_v33, %v3343_v36 }
  0x77   :  { %2806 = vset.pattern.permute.xlu1 %v4794_v52  ;;  %v392_v23 = vrot.slane %v2403_v6, %v3343_v36 }
  0x78   :  { %499 = vperm.xlu1 %2806, %v3100_v42   ;;  %v3351_v42 = vsub.s32 6, %v2889_v9 }
  0x7a   :  { %v239_v52 = vrot.slane %v2875_v4, %v3351_v42  ;;  %v1539_v22 = vrot.slane %v2940_v35, %v3351_v42  ;;  %v3407_v4 = vsel %vm1468_vm2, 1.0, %v4946_v32  ;;  %v1644_v11 = vrot.slane %v2559_v33, %v3351_v42 }
  0x7b   :  { %v1570_v28 = vrot.slane %v3407_v4, %v3343_v36  ;;  %v396_v41 = vrot.slane %v2403_v6, %v3351_v42  ;;  %v656_v0 = vrot.slane %v2405_v5, %v3351_v42  ;;  %vm1081_vm2 = vcmask 261120  }
  0x7c   :  { %2807 = vset.pattern.permute.xlu1 %v4793_v20  ;;  %v3466_v10 = vrot.slane %v239_v52, %v3343_v36 }
  0x7d   :  { %568 = vperm.xlu1 %2807, %v3197_v18   ;;  %2521 = vmatpush1.bf16.xpose.msk.msra.mxu0 %vm2520_vm9, %v4803_v63  ;;  %vm423_vm9 = vcmp.eq.s32.totalorder %v2909_v19, 2  ;;  %v3486_v24 = vrot.slane %v1570_v28, %v3343_v36  ;;  %v4955_v28 = vmov 0   ;;  %v274_v19 = vrot.slane %v3395_v31, %v3351_v42 }
  0x7e   :  { %2523 = vmatprep.subr.msk.bf16.mxu0 %vm2522_vm10, %v4803_v63  ;;  %vm2528_vm10 = vmpackc.low %vm790_vm4, %vm788_vm3  ;;  %v2404_v26 = vsel %vm423_vm9, 1.0, %v4946_v32  ;;  %v3576_v61 = vrot.slane %v396_v41, %v3343_v36 }
  0x7f   :  { %4953 = vst [vmem:[#allocation40_spill] sm:$0xff] %v3486_v24  ;;  %v522_v16 = vrot.slane %v2404_v26, %v3343_v36  ;;  %v526_v40 = vrot.slane %v2404_v26, %v3351_v42  ;;  %v652_v26 = vrot.slane %v2405_v5, %v3343_v36 }
  0x80   :  { %4967 = vst [vmem:[#allocation51_spill] sm:$0xff] %v3576_v61 }
  0x81   :  { %2809 = vset.pattern.permute.xlu1 %v2813_v1  ;;  %v3348_v38 = vpop.permute.xlu0 %325  ;;  %v3423_v1 = vrot.slane %v185_v55, %v2914_v21  ;;  %v3451_v55 = vrot.slane %v1535_v62, %v3343_v36  ;;  %v3469_v62 = vrot.slane %v1539_v22, %v3343_v36  ;;  %v1574_v22 = vrot.slane %v3407_v4, %v3351_v42 }
  0x82   :  { %593 = vperm.xlu1 %2809, %v3197_v18   ;;  %v3346_v37 = vpop.permute.xlu1 %167  ;;  %v3364_v46 = vmul.f32 %v2973_v47, %v3348_v38  ;;  %v3617_v56 = vmul.f32 %v3348_v38, %v3429_v34 }
  0x83   :  { %v3355_v45 = vmul.f32 %v2973_v47, %v3346_v37  ;;  %4947 = vst [vmem:[#allocation36_spill] sm:$0xff] %v3423_v1  ;;  %v3540_v58 = vrot.slane %v1574_v22, %v3343_v36  ;;  %v3601_v57 = vmul.f32 %v3429_v34, %v3346_v37  ;;  %v3605_v7 = vmul.f32 %v3348_v38, %v3423_v1 }
  0x85   :  { %2525 = vmatpush1.bf16.xpose.msk.msra.mxu0 %vm2524_vm15, %v4803_v63  ;;  %v3384_v20 = vpop.permute.xlu0 %459  ;;  %vm792_vm15 = vcmp.eq.s32.totalorder %v3368_v51, %v3001_v59  ;;  %4960 = vst [vmem:[#allocation44_spill] sm:$0xff] %v3540_v58 }
  0x86   :  { %597 = vperm.xlu1 %2809, %v3125_v48   ;;  %v3382_v18 = vpop.permute.xlu1 %171  ;;  %2527 = vmatprep.subr.msk.bf16.mxu0 %vm3358_vm1, %v4803_v63  ;;  %v3415_v35 = vmul.f32 %v2973_v47, %v3384_v20  ;;  %v270_v63 = vrot.slane %v3395_v31, %v3343_v36  ;;  %vm3521_vm1 = vmpackc.low %vm794_vm0, %vm792_vm15  ;;  %v3543_v31 = vrot.slane %v392_v23, %v3343_v36 }
  0x87   :  { %v3402_v39 = vmul.f32 %v2973_v47, %v3382_v18  ;;  %v1800_v23 = vrot.slane %v2561_v15, %v3351_v42  ;;  %v3579_v15 = vrot.slane %v526_v40, %v3343_v36  ;;  %v3595_v40 = vrot.slane %v652_v26, %v3343_v36  ;;  %v44_v26 = vld [vmem:[%s4787_s2 + $0x10] sm:$0xff] }
  0x88   :  { %v3475_v27 = vrot.slane %v270_v63, %v3343_v36  ;;  %v2560_v63 = vsel %vm1671_vm11, 1.0, %v4946_v32  ;;  %4961 = vst [vmem:[#allocation45_spill] sm:$0xff] %v3543_v31  ;;  %v1605_v32 = vmul.f32 %v2978_v49, %v3348_v38 }
  0x89   :  { %v3432_v30 = vpop.permute.xlu0 %589  ;;  %v1718_v33 = vrot.slane %v2560_v63, %v3343_v36  ;;  %v1722_v17 = vrot.slane %v2560_v63, %v3351_v42  ;;  %4968 = vst [vmem:[#allocation52_spill] sm:$0xff] %v3579_v15  ;;  %v3582_v42 = vrot.slane %v656_v0, %v3343_v36  ;;  %4970 = vst [vmem:[#allocation54_spill] sm:$0xff] %v3595_v40 }
  0x8a   :  { %2810 = vset.pattern.permute.xlu1 %v4948_v25  ;;  %v3445_v21 = vmul.f32 %v2973_v47, %v3432_v30  ;;  %4950 = vst [vmem:[#allocation38_spill] sm:$0xff] %v3475_v27  ;;  %v200_v0 = vmul.f32 %v3423_v1, %v3346_v37 }
  0x8b   :  { %629 = vperm.xlu1 %2810, %v3125_v48   ;;  %v3448_v25 = vpop.permute.xlu1 %303  ;;  %v3564_v22 = vrot.slane %v1718_v33, %v3343_v36  ;;  %4969 = vst [vmem:[#allocation53_spill] sm:$0xff] %v3582_v42  ;;  %v42_v33 = vld [vmem:[%s4787_s2] sm:$0xff] }
  0x8c   :  { %4949 = vst [vmem:[#allocation37_spill] sm:$0xff] %v3445_v21  ;;  %v1598_v48 = vmul.f32 %v2981_v50, %v3448_v25  ;;  %v1599_v51 = vmul.f32 %v2985_v53, %v3448_v25  ;;  %v318_v15 = vmul.f32 %v3448_v25, %v2962_v43 }
  0x8d   :  { %2529 = vmatpush1.bf16.xpose.msk.msra.mxu0 %vm2528_vm10, %v4951_v60  ;;  %v3481_v52 = vpop.permute.xlu0 %179  ;;  %4964 = vst [vmem:[#allocation48_spill] sm:$0xff] %v3564_v22 }
  0x8e   :  { %4952 = vst [vmem:[#allocation39_spill] sm:$0xff] %v3481_v52  ;;  %2531 = vmatprep.subr.msk.bf16.mxu0 %vm2530_vm12, %v4951_v60  ;;  %v3493_v12 = vmul.f32 %v2973_v47, %v3481_v52 }
  0x8f   :  { %2811 = vset.pattern.permute.xlu1 %v4955_v28 }
  0x90   :  { %4954 = vst [vmem:[#allocation41_spill] sm:$0xff] %v3493_v12  ;;  %v3501_v4 = vpop.permute.xlu1 %329  ;;  %962 = vperm.xlu1 %2811, %v42_v33   ;;  %v3613_v33 = vrot.slane %v1800_v23, %v3343_v36  ;;  %v3633_v23 = vmul.f32 %v3429_v34, %v3382_v18 }
  0x91   :  { %v1606_v59 = vmul.f32 %v2973_v47, %v3501_v4  ;;  %v1607_v28 = vmul.f32 %v2978_v49, %v3501_v4  ;;  %v3518_v54 = vpop.permute.xlu0 %333  ;;  %v342_v40 = vmul.f32 %v3501_v4, %v3423_v1 }
  0x92   :  { %4956 = vst [vmem:[#allocation42_spill] sm:$0xff] %v3518_v54  ;;  %v3537_v63 = vmul.f32 %v2973_v47, %v3518_v54  ;;  %4971 = vst [vmem:[#allocation55_spill] sm:$0xff] %v3613_v33  ;;  %v3649_v54 = vmul.f32 %v3384_v20, %v3429_v34  ;;  %v1685_v33 = vmul.f32 %v2978_v49, %v3384_v20 }
  0x93   :  { %v3529_v14 = vadd.f32 %v1606_v59, %v1598_v48  ;;  %v3531_v2 = vadd.f32 %v1607_v28, %v1599_v51  ;;  %v3549_v51 = vrot.slane %v1640_v13, %v3343_v36  ;;  %v3552_v48 = vrot.slane %v1644_v11, %v3343_v36 }
  0x94   :  { %4959 = vst [vmem:[#allocation43_spill] sm:$0xff] %v3537_v63  ;;  %v3555_v59 = vrot.slane %v522_v16, %v3343_v36  ;;  %v3567_v13 = vrot.slane %v1722_v17, %v3343_v36  ;;  %v3570_v11 = vrot.slane %v274_v19, %v3343_v36  ;;  %v3573_v28 = vrot.slane %v1796_v3, %v3343_v36  ;;  %v43_v17 = vld [vmem:[%s4787_s2 + $0x8] sm:$0xff] }
  0x95   :  { %v3546_v6 = vpop.permute.xlu1 %217  ;;  %4962 = vst [vmem:[#allocation46_spill] sm:$0xff] %v3549_v51  ;;  %2533 = vmatpush1.bf16.xpose.msk.msra.mxu0 %vm3521_vm1, %v4951_v60  ;;  %v1517_v3 = vmul.f32 %v2978_v49, %v3346_v37  ;;  %967 = vperm.xlu0 %2812, %v43_v17   ;;  %v54_v17 = vld [vmem:[%s4788_s4] sm:$0xff]  ;;  %v3629_v36 = vmul.f32 %v3423_v1, %v3382_v18 }
  0x96   :  { %4963 = vst [vmem:[#allocation47_spill] sm:$0xff] %v3555_v59  ;;  %v1550_v5 = vmul.f32 %v3451_v55, %v3546_v6  ;;  %4965 = vst [vmem:[#allocation49_spill] sm:$0xff] %v3567_v13  ;;  %v122_v16 = vpop.permute.xlu0 %121  ;;  %v1551_v37 = vmul.f32 %v3469_v62, %v3546_v6  ;;  %972 = vperm.xlu1 %2811, %v44_v26  }
  0x97   :  { %4966 = vst [vmem:[#allocation50_spill] sm:$0xff] %v3573_v28  ;;  %v1490_v41 = vmul.f32 %v2981_v50, %v122_v16  ;;  %v1491_v19 = vmul.f32 %v2985_v53, %v122_v16 }
  0x99   :  { %v3607_v60 = vpop.permute.xlu1 %357  ;;  %v1524_v9 = vadd.f32 %v3355_v45, %v1490_v41  ;;  %v1525_v8 = vadd.f32 %v1517_v3, %v1491_v19  ;;  %v1519_v3 = vmul.f32 %v2978_v49, %v3382_v18  ;;  %v3643_v41 = vmul.f32 %v3384_v20, %v3423_v1  ;;  %1043 = vperm.xlu0 %2812, %v54_v17  }
  0x9a   :  { %v1620_v63 = vmul.f32 %v3451_v55, %v3607_v60  ;;  %v3637_v45 = vpop.permute.xlu0 %126  ;;  %v3668_v20 = vmul.f32 %v3432_v30, %v3429_v34  ;;  %v3679_v17 = vmul.f32 %v2978_v49, %v3432_v30  ;;  %v1621_v21 = vmul.f32 %v3469_v62, %v3607_v60 }
  0x9b   :  { %v1558_v38 = vadd.f32 %v1550_v5, %v1524_v9  ;;  %v3645_v19 = vadd.f32 %v1551_v37, %v1525_v8  ;;  %v1492_v12 = vmul.f32 %v2981_v50, %v3637_v45  ;;  %v1493_v18 = vmul.f32 %v2985_v53, %v3637_v45  ;;  %v45_v9 = vld [vmem:[%s4787_s2 + $0x18] sm:$0xff]  ;;  %v56_v37 = vld [vmem:[%s4788_s4 + $0x10] sm:$0xff] }
  0x9c   :  { %v3664_v8 = vmul.f32 %v3432_v30, %v3423_v1  ;;  %4973 = vst [vmem:[#allocation57_spill] sm:$0xff] %v3668_v20  ;;  %v158_v5 = vmul.f32 %v2962_v43, %v122_v16  ;;  %4974 = vst [vmem:[#allocation58_spill] sm:$0xff] %v3679_v17  ;;  %977 = vperm.xlu1 %2811, %v45_v9   ;;  %v350_v17 = vadd.f32 %v342_v40, %v318_v15 }
  0x9d   :  { %v3657_v13 = vpop.permute.xlu1 %361  ;;  %v3672_v26 = vmul.f32 %v3486_v24, %v1558_v38  ;;  %v3684_v42 = vadd.f32 %v3402_v39, %v1492_v12  ;;  %v3686_v28 = vadd.f32 %v1519_v3, %v1493_v18  ;;  %v343_v38 = vmul.f32 %v3501_v4, %v3429_v34  ;;  %v55_v4 = vld [vmem:[%s4788_s4 + $0x8] sm:$0xff]  ;;  %1053 = vperm.xlu0 %2812, %v56_v37  }
  0x9e   :  { %4972 = vst [vmem:[#allocation56_spill] sm:$0xff] %v3664_v8  ;;  %v299_v20 = vpop.permute.xlu0 %298  ;;  %v159_v8 = vmul.f32 %v2965_v44, %v122_v16  ;;  %v1622_v24 = vmul.f32 %v3451_v55, %v3657_v13  ;;  %v1623_v30 = vmul.f32 %v3469_v62, %v3657_v13  ;;  %v319_v12 = vmul.f32 %v3448_v25, %v2965_v44 }
  0x9f   :  { %4975 = vst [vmem:[#allocation59_spill] sm:$0xff] %v3684_v42  ;;  %4976 = vst [vmem:[#allocation60_spill] sm:$0xff] %v3686_v28  ;;  %v1596_v39 = vmul.f32 %v2981_v50, %v299_v20  ;;  %v1597_v3 = vmul.f32 %v2985_v53, %v299_v20  ;;  %v3706_v16 = vmul.f32 %v2978_v49, %v3481_v52  ;;  %v58_v42 = vld [vmem:[%s4788_s4 + $0x20] sm:$0xff] }
  0xa0   :  { %v208_v18 = vadd.f32 %v200_v0, %v158_v5  ;;  %v1630_v9 = vadd.f32 %v1622_v24, %v3529_v14  ;;  %v3710_v28 = vadd.f32 %v1623_v30, %v3531_v2  ;;  %v351_v0 = vadd.f32 %v343_v38, %v319_v12  ;;  %1048 = vperm.xlu1 %2811, %v55_v4  }
  0xa1   :  { %4977 = vst [vmem:[#allocation61_spill] sm:$0xff] %v3706_v16  ;;  %v1612_v37 = vadd.f32 %v3364_v46, %v1596_v39  ;;  %v1613_v59 = vadd.f32 %v1605_v32, %v1597_v3  ;;  %v250_v14 = vmul.f32 %v3435_v29, %v3546_v6  ;;  %v209_v2 = vadd.f32 %v3601_v57, %v159_v8  ;;  %v57_v32 = vld [vmem:[%s4788_s4 + $0x18] sm:$0xff] }
  0xa2   :  { %4978 = vst [vmem:[#allocation62_spill] sm:$0xff] %v3710_v28  ;;  %v434_v25 = vpop.permute.xlu1 %433  ;;  %v3718_v52 = vpop.permute.xlu0 %428  ;;  %v3724_v24 = vmul.f32 %v3549_v51, %v1630_v9  ;;  %v251_v15 = vmul.f32 %v3466_v10, %v3546_v6  ;;  %v316_v40 = vmul.f32 %v299_v20, %v2962_v43  ;;  %1063 = vperm.xlu0 %2812, %v58_v42   ;;  %v60_v6 = vld [vmem:[%s4788_s4 + $0x30] sm:$0xff] }
  0xa3   :  { %v1628_v5 = vadd.f32 %v1620_v63, %v1612_v37  ;;  %v3729_v46 = vadd.f32 %v1621_v21, %v1613_v59  ;;  %v258_v38 = vadd.f32 %v250_v14, %v208_v18  ;;  %v372_v57 = vmul.f32 %v3607_v60, %v3435_v29 }
  0xa4   :  { %v1676_v8 = vmul.f32 %v2981_v50, %v434_v25  ;;  %v1677_v30 = vmul.f32 %v2985_v53, %v434_v25  ;;  %v373_v21 = vmul.f32 %v3607_v60, %v3466_v10  ;;  %v374_v63 = vmul.f32 %v3657_v13, %v3435_v29  ;;  %1058 = vperm.xlu1 %2811, %v57_v32  }
  0xa5   :  { %v317_v59 = vmul.f32 %v299_v20, %v2965_v44  ;;  %v1655_v42 = vmul.f32 %v3549_v51, %v1628_v5  ;;  %v3749_v3 = vadd.f32 %v251_v15, %v209_v2  ;;  %v1674_v60 = vmul.f32 %v2981_v50, %v3718_v52 }
  0xa6   :  { %v3747_v39 = vpop.permute.xlu0 %558  ;;  %v3752_v4 = vadd.f32 %v3415_v35, %v1676_v8  ;;  %v3754_v18 = vadd.f32 %v1685_v33, %v1677_v30  ;;  %v160_v9 = vmul.f32 %v2962_v43, %v3637_v45  ;;  %v348_v20 = vadd.f32 %v3605_v7, %v316_v40  ;;  %v59_v35 = vld [vmem:[%s4788_s4 + $0x28] sm:$0xff]  ;;  %1073 = vperm.xlu0 %2812, %v60_v6   ;;  %v70_v40 = vld [vmem:[%s4789_s6] sm:$0xff] }
  0xa7   :  { %v456_v12 = vpop.permute.xlu1 %455  ;;  %v1675_v37 = vmul.f32 %v2985_v53, %v3718_v52  ;;  %v3768_v33 = vmul.f32 %v3475_v27, %v258_v38  ;;  %v161_v2 = vmul.f32 %v2965_v44, %v3637_v45  ;;  %v3775_v7 = vmul.f32 %v2981_v50, %v3747_v39 }
  0xa8   :  { %v1682_v14 = vmul.f32 %v2973_v47, %v456_v12  ;;  %v1683_v15 = vmul.f32 %v2978_v49, %v456_v12  ;;  %v375_v5 = vmul.f32 %v3657_v13, %v3466_v10  ;;  %v382_v32 = vadd.f32 %v374_v63, %v350_v17  ;;  %1068 = vperm.xlu1 %2811, %v59_v35  }
  0xa9   :  { %v349_v38 = vadd.f32 %v3617_v56, %v317_v59  ;;  %v3787_v45 = vmul.f32 %v3540_v58, %v3645_v19  ;;  %v448_v6 = vmul.f32 %v434_v25, %v2962_v43  ;;  %v3795_v13 = vadd.f32 %v3629_v36, %v160_v9  ;;  %v61_v19 = vld [vmem:[%s4788_s4 + $0x38] sm:$0xff] }
  0xaa   :  { %v1690_v8 = vadd.f32 %v1682_v14, %v1674_v60  ;;  %v3783_v30 = vpop.permute.xlu0 %131  ;;  %v1691_v51 = vadd.f32 %v1683_v15, %v1675_v37  ;;  %v380_v56 = vadd.f32 %v372_v57, %v348_v20  ;;  %v449_v17 = vmul.f32 %v434_v25, %v2965_v44  ;;  %1237 = vperm.xlu0 %2812, %v70_v40   ;;  %v72_v25 = vld [vmem:[%s4789_s6 + $0x10] sm:$0xff] }
  0xab   :  { %v3792_v28 = vmul.f32 %v2981_v50, %v3783_v30  ;;  %v1663_v63 = vadd.f32 %v1655_v42, %v3672_v26  ;;  %v446_v59 = vmul.f32 %v3718_v52, %v2962_v43  ;;  %v470_v60 = vmul.f32 %v456_v12, %v3423_v1 }
  0xac   :  { %v488_v16 = vpop.permute.xlu1 %487  ;;  %v3811_v26 = vadd.f32 %v3633_v23, %v161_v2  ;;  %v383_v57 = vadd.f32 %v375_v5, %v351_v0  ;;  %v3814_v42 = vmul.f32 %v3543_v31, %v382_v32  ;;  %v381_v9 = vadd.f32 %v373_v21, %v349_v38  ;;  %1078 = vperm.xlu1 %2811, %v61_v19  }
  0xad   :  { %4979 = vst [vmem:[#allocation63_spill] sm:$0xff] %v3792_v28  ;;  %v1698_v37 = vmul.f32 %v3451_v55, %v488_v16  ;;  %v1699_v36 = vmul.f32 %v3469_v62, %v488_v16  ;;  %v480_v14 = vadd.f32 %v3643_v41, %v448_v6  ;;  %v502_v35 = vmul.f32 %v488_v16, %v3435_v29  ;;  %v71_v41 = vld [vmem:[%s4789_s6 + $0x8] sm:$0xff] }
  0xae   :  { %v3816_v20 = vpop.permute.xlu0 %443  ;;  %v3823_v58 = vadd.f32 %v3649_v54, %v449_v17  ;;  %v447_v23 = vmul.f32 %v3718_v52, %v2965_v44  ;;  %v471_v0 = vmul.f32 %v456_v12, %v3429_v34  ;;  %1247 = vperm.xlu0 %2812, %v72_v25   ;;  %v478_v2 = vadd.f32 %v470_v60, %v446_v59  ;;  %v74_v52 = vld [vmem:[%s4789_s6 + $0x20] sm:$0xff] }
  0xaf   :  { %4980 = vst [vmem:[#allocation64_spill] sm:$0xff] %v3816_v20  ;;  %v1706_v15 = vadd.f32 %v1698_v37, %v1690_v8  ;;  %v3820_v40 = vadd.f32 %v1699_v36, %v1691_v51  ;;  %v3830_v21 = vmul.f32 %v2981_v50, %v3816_v20  ;;  %v407_v51 = vmul.f32 %v3543_v31, %v380_v56 }
  0xb0   :  { %v492_v28 = vpop.permute.xlu1 %491  ;;  %v1656_v12 = vmul.f32 %v3552_v48, %v3729_v46  ;;  %v576_v32 = vmul.f32 %v3747_v39, %v2962_v43  ;;  %v503_v38 = vmul.f32 %v488_v16, %v3466_v10  ;;  %v510_v56 = vadd.f32 %v502_v35, %v478_v2  ;;  %1242 = vperm.xlu1 %2811, %v71_v41  }
  0xb1   :  { %4981 = vst [vmem:[#allocation65_spill] sm:$0xff] %v3830_v21  ;;  %v1733_v54 = vmul.f32 %v3564_v22, %v1706_v15  ;;  %v1700_v5 = vmul.f32 %v3451_v55, %v492_v28  ;;  %v1701_v8 = vmul.f32 %v3469_v62, %v492_v28  ;;  %v504_v19 = vmul.f32 %v492_v28, %v3435_v29  ;;  %v76_v15 = vld [vmem:[%s4789_s6 + $0x30] sm:$0xff] }
  0xb2   :  { %v3847_v6 = vpop.permute.xlu0 %573  ;;  %v479_v60 = vadd.f32 %v471_v0, %v447_v23  ;;  %v577_v46 = vmul.f32 %v3747_v39, %v2965_v44  ;;  %1257 = vperm.xlu0 %2812, %v74_v52   ;;  %v286_v35 = vmul.f32 %v3570_v11, %v3749_v3  ;;  %v410_v2 = vmul.f32 %v3576_v61, %v383_v57 }
  0xb3   :  { %4982 = vst [vmem:[#allocation66_spill] sm:$0xff] %v3847_v6  ;;  %v3849_v17 = vadd.f32 %v1733_v54, %v1663_v63  ;;  %v1708_v59 = vadd.f32 %v1700_v5, %v3752_v4  ;;  %v3856_v37 = vadd.f32 %v1701_v8, %v3754_v18  ;;  %v3860_v16 = vmul.f32 %v2981_v50, %v3847_v6  ;;  %v73_v63 = vld [vmem:[%s4789_s6 + $0x18] sm:$0xff]  ;;  %v4984_v54 = vld [vmem:[#allocation47_spill] sm:$0xff] }
  0xb4   :  { %v1753_v4 = vmul.f32 %v2985_v53, %v3747_v39  ;;  %v408_v18 = vmul.f32 %v3576_v61, %v381_v9  ;;  %v511_v23 = vadd.f32 %v503_v38, %v479_v60  ;;  %v3878_v39 = vmul.f32 %v4984_v54, %v510_v56  ;;  %1252 = vperm.xlu1 %2811, %v73_v63   ;;  %v4985_v8 = vld [vmem:[#allocation37_spill] sm:$0xff]  ;;  %v4986_v38 = vld [vmem:[#allocation58_spill] sm:$0xff] }
  0xb5   :  { %4983 = vst [vmem:[#allocation67_spill] sm:$0xff] %v3860_v16  ;;  %v564_v36 = vpop.permute.xlu1 %563  ;;  %v1735_v25 = vmul.f32 %v3564_v22, %v1708_v59  ;;  %v505_v5 = vmul.f32 %v492_v28, %v3466_v10  ;;  %v512_v52 = vadd.f32 %v504_v19, %v480_v14  ;;  %v3882_v9 = vadd.f32 %v407_v51, %v3768_v33  ;;  %v75_v28 = vld [vmem:[%s4789_s6 + $0x28] sm:$0xff] }
  0xb6   :  { %v1754_v0 = vmul.f32 %v2981_v50, %v564_v36  ;;  %v1755_v41 = vmul.f32 %v2985_v53, %v564_v36  ;;  %1267 = vperm.xlu0 %2812, %v76_v15   ;;  %v416_v56 = vadd.f32 %v408_v18, %v286_v35  ;;  %v3898_v19 = vadd.f32 %v1656_v12, %v3787_v45  ;;  %v4988_v15 = vld [vmem:[#allocation60_spill] sm:$0xff] }
  0xb7   :  { %v222_v3 = vpop.permute.xlu0 %221  ;;  %v513_v45 = vadd.f32 %v505_v5, %v3823_v58  ;;  %v4989_v12 = vld [vmem:[#allocation52_spill] sm:$0xff] }
  0xb8   :  { %v3885_v59 = vadd.f32 %v4985_v8, %v1754_v0  ;;  %v3888_v60 = vadd.f32 %v4986_v38, %v1755_v41  ;;  %v252_v16 = vmul.f32 %v3435_v29, %v222_v3  ;;  %v253_v57 = vmul.f32 %v3466_v10, %v222_v3  ;;  %v4987_v38 = vld [vmem:[#allocation59_spill] sm:$0xff]  ;;  %1262 = vperm.xlu1 %2811, %v75_v28  }
  0xb9   :  { %v1552_v14 = vmul.f32 %v3451_v55, %v222_v3  ;;  %v1553_v33 = vmul.f32 %v3469_v62, %v222_v3 }
  0xba   :  { %v586_v51 = vpop.permute.xlu1 %585  ;;  %v260_v63 = vadd.f32 %v252_v16, %v3795_v13  ;;  %v261_v0 = vadd.f32 %v253_v57, %v3811_v26  ;;  %v578_v13 = vmul.f32 %v564_v36, %v2962_v43  ;;  %v579_v26 = vmul.f32 %v564_v36, %v2965_v44  ;;  %v77_v57 = vld [vmem:[%s4789_s6 + $0x38] sm:$0xff] }
  0xbb   :  { %v600_v41 = vmul.f32 %v586_v51, %v3423_v1  ;;  %v601_v8 = vmul.f32 %v586_v51, %v3429_v34  ;;  %v1560_v6 = vadd.f32 %v1552_v14, %v4987_v38  ;;  %v3906_v21 = vadd.f32 %v1553_v33, %v4988_v15  ;;  %v3910_v18 = vpop.permute.xlu0 %225  ;;  %v4990_v33 = vld [vmem:[#allocation40_spill] sm:$0xff] }
  0xbc   :  { %v1760_v3 = vmul.f32 %v2973_v47, %v586_v51  ;;  %v1761_v35 = vmul.f32 %v2978_v49, %v586_v51  ;;  %v538_v16 = vmul.f32 %v4989_v12, %v511_v23  ;;  %v287_v14 = vmul.f32 %v3475_v27, %v260_v63  ;;  %1272 = vperm.xlu1 %2811, %v77_v57  }
  0xbd   :  { %v1587_v38 = vmul.f32 %v4990_v33, %v1560_v6  ;;  %v608_v28 = vadd.f32 %v600_v41, %v576_v32  ;;  %v609_v22 = vadd.f32 %v601_v8, %v577_v46  ;;  %v288_v5 = vmul.f32 %v3570_v11, %v261_v0  ;;  %v4991_v32 = vld [vmem:[#allocation56_spill] sm:$0xff] }
  0xbe   :  { %v1768_v51 = vadd.f32 %v1760_v3, %v3775_v7  ;;  %v1769_v15 = vadd.f32 %v1761_v35, %v1753_v4  ;;  %v3925_v36 = vmul.f32 %v3451_v55, %v3910_v18  ;;  %v539_v7 = vmul.f32 %v4984_v54, %v512_v52  ;;  %v4993_v52 = vld [vmem:[#allocation50_spill] sm:$0xff] }
  0xbf   :  { %v618_v58 = vpop.permute.xlu1 %617  ;;  %v1665_v23 = vadd.f32 %v3724_v24, %v1587_v38  ;;  %v610_v46 = vadd.f32 %v4991_v32, %v578_v13  ;;  %v540_v0 = vmul.f32 %v4989_v12, %v513_v45  ;;  %v3935_v24 = vpop.permute.xlu0 %369  ;;  %v4992_v38 = vld [vmem:[#allocation57_spill] sm:$0xff]  ;;  %v418_v1 = vadd.f32 %v410_v2, %v288_v5 }
  0xc0   :  { %v632_v20 = vmul.f32 %v618_v58, %v3435_v29  ;;  %v633_v63 = vmul.f32 %v618_v58, %v3466_v10  ;;  %v1776_v6 = vmul.f32 %v3451_v55, %v618_v58  ;;  %v1777_v4 = vmul.f32 %v3469_v62, %v618_v58 }
  0xc1   :  { %v1743_v3 = vadd.f32 %v1735_v25, %v1665_v23  ;;  %v611_v31 = vadd.f32 %v4992_v38, %v579_v26  ;;  %v417_v57 = vadd.f32 %v3814_v42, %v287_v14  ;;  %v3948_v26 = vmul.f32 %v3451_v55, %v3935_v24 }
  0xc2   :  { %v640_v41 = vadd.f32 %v632_v20, %v608_v28  ;;  %v1784_v8 = vadd.f32 %v1776_v6, %v1768_v51  ;;  %v641_v35 = vadd.f32 %v633_v63, %v609_v22  ;;  %v1785_v27 = vadd.f32 %v1777_v4, %v1769_v15  ;;  %v4994_v22 = vld [vmem:[#allocation53_spill] sm:$0xff]  ;;  %v4995_v51 = vld [vmem:[#allocation54_spill] sm:$0xff] }
  0xc3   :  { %v622_v61 = vpop.permute.xlu1 %621  ;;  %v546_v23 = vadd.f32 %v538_v16, %v416_v56  ;;  %v548_v63 = vadd.f32 %v540_v0, %v418_v1  ;;  %v4999_v0 = vld [vmem:[#allocation44_spill] sm:$0xff] }
  0xc4   :  { %v1811_v54 = vmul.f32 %v4993_v52, %v1784_v8  ;;  %v634_v13 = vmul.f32 %v622_v61, %v3435_v29  ;;  %v635_v58 = vmul.f32 %v622_v61, %v3466_v10  ;;  %v1778_v20 = vmul.f32 %v3451_v55, %v622_v61 }
  0xc5   :  { %v1779_v25 = vmul.f32 %v3469_v62, %v622_v61  ;;  %v668_v45 = vmul.f32 %v4994_v22, %v641_v35  ;;  %v667_v28 = vmul.f32 %v4995_v51, %v640_v41  ;;  %v545_v61 = vadd.f32 %v3878_v39, %v3882_v9  ;;  %v3968_v39 = vpop.permute.xlu0 %495  ;;  %v5000_v35 = vld [vmem:[#allocation41_spill] sm:$0xff] }
  0xc6   :  { %v3951_v42 = vadd.f32 %v1811_v54, %v3849_v17  ;;  %v642_v2 = vadd.f32 %v634_v13, %v610_v46  ;;  %v1786_v14 = vadd.f32 %v1778_v20, %v3885_v59  ;;  %v643_v15 = vadd.f32 %v635_v58, %v611_v31 }
  0xc7   :  { %v1787_v5 = vadd.f32 %v1779_v25, %v3888_v60  ;;  %v547_v41 = vadd.f32 %v539_v7, %v417_v57  ;;  %v163_v54 = vmul.f32 %v2965_v44, %v3783_v30  ;;  %v676_v59 = vadd.f32 %v668_v45, %v546_v23  ;;  %v4998_v7 = vld [vmem:[#allocation49_spill] sm:$0xff]  ;;  %v5002_v45 = vld [vmem:[#allocation62_spill] sm:$0xff] }
  0xc8   :  { %4996 = vst [vmem:[#allocation37_spill] sm:$0xff] %v3951_v42  ;;  %v1813_v6 = vmul.f32 %v4993_v52, %v1786_v14  ;;  %v3958_v32 = vpop.permute.xlu1 %136  ;;  %v670_v4 = vmul.f32 %v4994_v22, %v643_v15  ;;  %v669_v17 = vmul.f32 %v4995_v51, %v642_v2  ;;  %v675_v56 = vadd.f32 %v667_v28, %v545_v61  ;;  %v5001_v57 = vld [vmem:[#allocation61_spill] sm:$0xff] }
  0xc9   :  { %v1496_v31 = vmul.f32 %v2981_v50, %v3958_v32  ;;  %v1497_v1 = vmul.f32 %v2985_v53, %v3958_v32  ;;  %v1734_v46 = vmul.f32 %v4998_v7, %v3820_v40  ;;  %v1588_v8 = vmul.f32 %v4999_v0, %v3906_v21 }
  0xca   :  { %v3970_v9 = vadd.f32 %v1813_v6, %v1743_v3  ;;  %v678_v60 = vadd.f32 %v670_v4, %v548_v63  ;;  %v677_v16 = vadd.f32 %v669_v17, %v547_v41  ;;  %v1495_v58 = vmul.f32 %v2985_v53, %v3783_v30  ;;  %v5003_v4 = vld [vmem:[#allocation55_spill] sm:$0xff] }
  0xcb   :  { %v3977_v38 = vadd.f32 %v5000_v35, %v1496_v31  ;;  %v3980_v13 = vadd.f32 %v5001_v57, %v1497_v1  ;;  %v3986_v25 = vmul.f32 %v3451_v55, %v3968_v39  ;;  %v1658_v40 = vmul.f32 %v3552_v48, %v5002_v45  ;;  %v5004_v31 = vld [vmem:[#allocation63_spill] sm:$0xff] }
  0xcc   :  { %4997 = vst [vmem:[#allocation58_spill] sm:$0xff] %v3970_v9  ;;  %v957_v3 = vpack.c.bf16 %v678_v60, %v676_v59  ;;  %v956_v20 = vpack.c.bf16 %v677_v16, %v675_v56  ;;  %v1736_v21 = vmul.f32 %v4998_v7, %v3856_v37  ;;  %v255_v2 = vmul.f32 %v3466_v10, %v3910_v18 }
  0xcd   :  { %v176_v28 = vpop.permute.xlu1 %175  ;;  %v1555_v63 = vmul.f32 %v3469_v62, %v3910_v18  ;;  %v1666_v61 = vadd.f32 %v1658_v40, %v1588_v8  ;;  %v1742_v6 = vadd.f32 %v1734_v46, %v3898_v19  ;;  %v1812_v37 = vmul.f32 %v5003_v4, %v1785_v27  ;;  %v5006_v46 = vld [vmem:[#allocation42_spill] sm:$0xff] }
  0xce   :  { %v205_v14 = vmul.f32 %v3429_v34, %v176_v28  ;;  %v1520_v15 = vmul.f32 %v2973_v47, %v176_v28  ;;  %v1521_v23 = vmul.f32 %v2978_v49, %v176_v28  ;;  %1012 = vmatprep.mubr.bf16.mxu0 %v957_v3  ;;  %v1814_v41 = vmul.f32 %v5003_v4, %v1787_v5 }
  0xcf   :  { %1013 = vmatmul.mubr.bf16.vlgmr.msra.gmra.mrb[0].mxu0 %v956_v20  ;;  %v1744_v60 = vadd.f32 %v1736_v21, %v1666_v61  ;;  %v4003_v56 = vadd.f32 %v1812_v37, %v1742_v6  ;;  %v1609_v27 = vmul.f32 %v2978_v49, %v5006_v46  ;;  %v5007_v20 = vld [vmem:[#allocation43_spill] sm:$0xff]  ;;  %v379_v37 = vmul.f32 %v3935_v24, %v3466_v10 }
  0xd0   :  { %v213_v17 = vadd.f32 %v205_v14, %v163_v54  ;;  %v1528_v1 = vadd.f32 %v1520_v15, %v5004_v31  ;;  %v1529_v59 = vadd.f32 %v1521_v23, %v1495_v58  ;;  %v162_v15 = vmul.f32 %v2962_v43, %v3783_v30  ;;  %v5009_v23 = vld [vmem:[#allocation36_spill] sm:$0xff] }
  0xd1   :  { %5005 = vst [vmem:[#allocation59_spill] sm:$0xff] %v4003_v56  ;;  %v4023_v21 = vadd.f32 %v1814_v41, %v1744_v60  ;;  %v1627_v41 = vmul.f32 %v3469_v62, %v3935_v24 }
  0xd2   :  { %v263_v35 = vadd.f32 %v255_v2, %v213_v17  ;;  %v1562_v57 = vadd.f32 %v3925_v36, %v1528_v1  ;;  %v4008_v8 = vadd.f32 %v1555_v63, %v1529_v59  ;;  %v309_v19 = vpop.permute.xlu1 %308  ;;  %v204_v63 = vmul.f32 %v5009_v23, %v176_v28 }
  0xd3   :  { %v1600_v5 = vmul.f32 %v2981_v50, %v309_v19  ;;  %v1601_v54 = vmul.f32 %v2985_v53, %v309_v19  ;;  %5008 = vst [vmem:[#allocation60_spill] sm:$0xff] %v4023_v21  ;;  %v165_v1 = vmul.f32 %v2965_v44, %v3958_v32  ;;  %v321_v16 = vmul.f32 %v309_v19, %v2965_v44 }
  0xd4   :  { %v4015_v58 = vmul.f32 %v3570_v11, %v263_v35  ;;  %v4018_v3 = vmul.f32 %v4990_v33, %v1562_v57  ;;  %v5010_v57 = vld [vmem:[#allocation39_spill] sm:$0xff] }
  0xd5   :  { %v1616_v45 = vadd.f32 %v5007_v20, %v1600_v5  ;;  %v1617_v40 = vadd.f32 %v1609_v27, %v1601_v54  ;;  %v207_v27 = vmul.f32 %v3429_v34, %v5010_v57  ;;  %v212_v5 = vadd.f32 %v204_v63, %v162_v15  ;;  %v5011_v63 = vld [vmem:[#allocation46_spill] sm:$0xff] }
  0xd6   :  { %v4021_v36 = vpop.permute.xlu1 %313  ;;  %v254_v54 = vmul.f32 %v3435_v29, %v3910_v18  ;;  %v320_v20 = vmul.f32 %v309_v19, %v2962_v43  ;;  %v344_v15 = vmul.f32 %v5006_v46, %v5009_v23  ;;  %v345_v18 = vmul.f32 %v5006_v46, %v3429_v34 }
  0xd7   :  { %v1602_v2 = vmul.f32 %v2981_v50, %v4021_v36  ;;  %v323_v61 = vmul.f32 %v4021_v36, %v2965_v44  ;;  %v1603_v17 = vmul.f32 %v2985_v53, %v4021_v36  ;;  %v215_v21 = vadd.f32 %v207_v27, %v165_v1  ;;  %v5012_v1 = vld [vmem:[#allocation51_spill] sm:$0xff] }
  0xdb   :  { %v4034_v6 = vpop.permute.xlu1 %337 }
  0xdc   :  { %v347_v31 = vmul.f32 %v4034_v6, %v3429_v34  ;;  %v1610_v30 = vmul.f32 %v2973_v47, %v4034_v6  ;;  %v1611_v28 = vmul.f32 %v2978_v49, %v4034_v6 }
  0xde   :  { %v355_v59 = vadd.f32 %v347_v31, %v323_v61  ;;  %v1618_v60 = vadd.f32 %v1610_v30, %v1602_v2  ;;  %v1619_v35 = vadd.f32 %v1611_v28, %v1603_v17  ;;  %v262_v31 = vadd.f32 %v254_v54, %v212_v5 }
  0xdf   :  { %v352_v30 = vadd.f32 %v344_v15, %v320_v20  ;;  %v353_v28 = vadd.f32 %v345_v18, %v321_v16  ;;  %v5013_v20 = vld [vmem:[#allocation38_spill] sm:$0xff]  ;;  %v5014_v15 = vld [vmem:[#allocation45_spill] sm:$0xff] }
  0xe0   :  { %v387_v14 = vadd.f32 %v379_v37, %v355_v59  ;;  %v1634_v42 = vadd.f32 %v3948_v26, %v1618_v60  ;;  %v1635_v9 = vadd.f32 %v1627_v41, %v1619_v35  ;;  %v230_v56 = vpop.permute.xlu1 %229 }
  0xe1   :  { %v257_v2 = vmul.f32 %v3466_v10, %v230_v56  ;;  %v1556_v61 = vmul.f32 %v3451_v55, %v230_v56  ;;  %v1557_v17 = vmul.f32 %v3469_v62, %v230_v56 }
  0xe2   :  { %v1661_v19 = vmul.f32 %v5011_v63, %v1634_v42  ;;  %v414_v59 = vmul.f32 %v5012_v1, %v387_v14  ;;  %v1662_v35 = vmul.f32 %v3552_v48, %v1635_v9 }
  0xe3   :  { %v265_v37 = vadd.f32 %v257_v2, %v215_v21  ;;  %v1564_v26 = vadd.f32 %v1556_v61, %v3977_v38  ;;  %v1565_v41 = vadd.f32 %v1557_v17, %v3980_v13  ;;  %v289_v2 = vmul.f32 %v5013_v20, %v262_v31 }
  0xe4   :  { %v366_v60 = vpop.permute.xlu1 %365  ;;  %v1590_v61 = vmul.f32 %v4999_v0, %v4008_v8  ;;  %v346_v31 = vmul.f32 %v4034_v6, %v5009_v23 }
  0xe5   :  { %v292_v27 = vmul.f32 %v3570_v11, %v265_v37  ;;  %v1591_v51 = vmul.f32 %v4990_v33, %v1564_v26  ;;  %v1592_v46 = vmul.f32 %v4999_v0, %v1565_v41  ;;  %v376_v42 = vmul.f32 %v366_v60, %v3435_v29 }
  0xe6   :  { %v377_v38 = vmul.f32 %v366_v60, %v3466_v10  ;;  %v1624_v13 = vmul.f32 %v3451_v55, %v366_v60  ;;  %v1625_v21 = vmul.f32 %v3469_v62, %v366_v60 }
  0xe7   :  { %v4076_v16 = vadd.f32 %v414_v59, %v292_v27  ;;  %v4078_v14 = vadd.f32 %v1662_v35, %v1592_v46  ;;  %v4080_v5 = vadd.f32 %v1661_v19, %v1591_v51  ;;  %v384_v9 = vadd.f32 %v376_v42, %v352_v30  ;;  %v5015_v46 = vld [vmem:[#allocation64_spill] sm:$0xff] }
  0xe8   :  { %v385_v11 = vadd.f32 %v377_v38, %v353_v28  ;;  %v1632_v54 = vadd.f32 %v1624_v13, %v1616_v45  ;;  %v1633_v33 = vadd.f32 %v1625_v21, %v1617_v40  ;;  %v164_v19 = vmul.f32 %v2962_v43, %v3958_v32 }
  0xe9   :  { %v4085_v17 = vpop.permute.xlu1 %438  ;;  %v411_v18 = vmul.f32 %v5014_v15, %v384_v9  ;;  %v1703_v30 = vmul.f32 %v3469_v62, %v3968_v39  ;;  %v452_v42 = vmul.f32 %v5015_v46, %v2962_v43 }
  0xea   :  { %v412_v37 = vmul.f32 %v5012_v1, %v385_v11  ;;  %v1659_v26 = vmul.f32 %v5011_v63, %v1632_v54  ;;  %v1660_v51 = vmul.f32 %v3552_v48, %v1633_v33  ;;  %v1678_v45 = vmul.f32 %v2981_v50, %v4085_v17 }
  0xeb   :  { %v4098_v0 = vadd.f32 %v411_v18, %v289_v2  ;;  %v206_v48 = vmul.f32 %v5009_v23, %v5010_v57  ;;  %v256_v63 = vmul.f32 %v3435_v29, %v230_v56  ;;  %v1679_v28 = vmul.f32 %v2985_v53, %v4085_v17  ;;  %v5016_v2 = vld [vmem:[#allocation48_spill] sm:$0xff] }
  0xec   :  { %v4096_v40 = vadd.f32 %v412_v37, %v4015_v58  ;;  %v1668_v8 = vadd.f32 %v1660_v51, %v1590_v61  ;;  %v1667_v41 = vadd.f32 %v1659_v26, %v4018_v3  ;;  %v322_v58 = vmul.f32 %v4021_v36, %v2962_v43 }
  0xed   :  { %v214_v6 = vadd.f32 %v206_v48, %v164_v19  ;;  %v378_v57 = vmul.f32 %v3935_v24, %v3435_v29  ;;  %v1681_v36 = vmul.f32 %v2985_v53, %v5015_v46  ;;  %v453_v54 = vmul.f32 %v5015_v46, %v2965_v44 }
  0xee   :  { %v464_v32 = vpop.permute.xlu1 %463  ;;  %v354_v59 = vadd.f32 %v346_v31, %v322_v58 }
  0xef   :  { %v1686_v3 = vmul.f32 %v2973_v47, %v464_v32  ;;  %v1687_v1 = vmul.f32 %v2978_v49, %v464_v32  ;;  %v264_v35 = vadd.f32 %v256_v63, %v214_v6 }
  0xf0   :  { %v386_v33 = vadd.f32 %v378_v57, %v354_v59 }
  0xf1   :  { %v1694_v56 = vadd.f32 %v1686_v3, %v1678_v45  ;;  %v1695_v60 = vadd.f32 %v1687_v1, %v1679_v28  ;;  %v291_v37 = vmul.f32 %v5013_v20, %v264_v35 }
  0xf2   :  { %v468_v27 = vpop.permute.xlu1 %467  ;;  %v413_v20 = vmul.f32 %v5014_v15, %v386_v33  ;;  %v475_v15 = vmul.f32 %v464_v32, %v3429_v34 }
  0xf3   :  { %v1710_v38 = vadd.f32 %v3986_v25, %v1694_v56  ;;  %v1711_v13 = vadd.f32 %v1703_v30, %v1695_v60  ;;  %v476_v21 = vmul.f32 %v468_v27, %v5009_v23  ;;  %v477_v9 = vmul.f32 %v468_v27, %v3429_v34  ;;  %v5017_v25 = vld [vmem:[#allocation65_spill] sm:$0xff]  ;;  %v5018_v60 = vld [vmem:[#allocation47_spill] sm:$0xff] }
  0xf4   :  { %v1688_v11 = vmul.f32 %v2973_v47, %v468_v27  ;;  %v1689_v24 = vmul.f32 %v2978_v49, %v468_v27  ;;  %v474_v56 = vmul.f32 %v464_v32, %v5009_v23  ;;  %v506_v32 = vmul.f32 %v3968_v39, %v3435_v29 }
  0xf5   :  { %v1737_v61 = vmul.f32 %v5016_v2, %v1710_v38  ;;  %v1738_v18 = vmul.f32 %v4998_v7, %v1711_v13  ;;  %v484_v19 = vadd.f32 %v476_v21, %v452_v42  ;;  %v485_v45 = vadd.f32 %v477_v9, %v453_v54 }
  0xf6   :  { %v1696_v26 = vadd.f32 %v1688_v11, %v5017_v25  ;;  %v1697_v51 = vadd.f32 %v1689_v24, %v1681_v36  ;;  %v450_v36 = vmul.f32 %v4085_v17, %v2962_v43  ;;  %v5019_v25 = vld [vmem:[#allocation66_spill] sm:$0xff] }
  0xf7   :  { %v500_v31 = vpop.permute.xlu1 %499  ;;  %v4131_v48 = vadd.f32 %v1738_v18, %v1668_v8  ;;  %v4133_v63 = vadd.f32 %v1737_v61, %v1667_v41  ;;  %v421_v8 = vadd.f32 %v413_v20, %v291_v37 }
  0xf8   :  { %v508_v30 = vmul.f32 %v500_v31, %v3435_v29  ;;  %v509_v58 = vmul.f32 %v500_v31, %v3466_v10  ;;  %v1704_v28 = vmul.f32 %v3451_v55, %v500_v31  ;;  %v1705_v3 = vmul.f32 %v3469_v62, %v500_v31 }
  0xf9   :  { %v482_v24 = vadd.f32 %v474_v56, %v450_v36 }
  0xfa   :  { %v516_v1 = vadd.f32 %v508_v30, %v484_v19  ;;  %v517_v6 = vadd.f32 %v509_v58, %v485_v45  ;;  %v1712_v59 = vadd.f32 %v1704_v28, %v1696_v26  ;;  %v1713_v57 = vadd.f32 %v1705_v3, %v1697_v51 }
  0xfb   :  { %v583_v58 = vmul.f32 %v5019_v25, %v2965_v44  ;;  %v1759_v28 = vmul.f32 %v2985_v53, %v5019_v25  ;;  %v514_v3 = vadd.f32 %v506_v32, %v482_v24 }
  0xfc   :  { %v543_v41 = vmul.f32 %v5018_v60, %v516_v1  ;;  %v544_v35 = vmul.f32 %v4989_v12, %v517_v6  ;;  %v1739_v27 = vmul.f32 %v5016_v2, %v1712_v59  ;;  %v1740_v46 = vmul.f32 %v4998_v7, %v1713_v57  ;;  %v569_v42 = vpop.permute.xlu1 %568 }
  0xfd   :  { %v1756_v38 = vmul.f32 %v2981_v50, %v569_v42  ;;  %v451_v7 = vmul.f32 %v4085_v17, %v2965_v44  ;;  %v507_v50 = vmul.f32 %v3968_v39, %v3466_v10  ;;  %v580_v33 = vmul.f32 %v569_v42, %v2962_v43 }
  0xfe   :  { %v4150_v13 = vadd.f32 %v544_v35, %v4076_v16  ;;  %v4152_v21 = vadd.f32 %v543_v41, %v421_v8  ;;  %v4155_v9 = vadd.f32 %v1740_v46, %v4078_v14  ;;  %v4158_v11 = vadd.f32 %v1739_v27, %v4080_v5  ;;  %v626_v16 = vpop.permute.xlu0 %625 }
  0xff   :  { %v483_v54 = vadd.f32 %v475_v15, %v451_v7  ;;  %v581_v14 = vmul.f32 %v569_v42, %v2965_v44  ;;  %v1757_v2 = vmul.f32 %v2985_v53, %v569_v42  ;;  %v582_v39 = vmul.f32 %v5019_v25, %v2962_v43  ;;  %v5020_v15 = vld [vmem:[#allocation67_spill] sm:$0xff] }
 0x100   :  { %v1780_v26 = vmul.f32 %v3451_v55, %v626_v16  ;;  %v1781_v51 = vmul.f32 %v3469_v62, %v626_v16  ;;  %v636_v6 = vmul.f32 %v626_v16, %v3435_v29  ;;  %v637_v43 = vmul.f32 %v626_v16, %v3466_v10 }
 0x101   :  { %v594_v5 = vpop.permute.xlu1 %593  ;;  %v515_v20 = vadd.f32 %v507_v50, %v483_v54  ;;  %v541_v42 = vmul.f32 %v5018_v60, %v514_v3  ;;  %v5021_v54 = vld [vmem:[#allocation54_spill] sm:$0xff] }
 0x102   :  { %v604_v61 = vmul.f32 %v594_v5, %v5009_v23  ;;  %v605_v17 = vmul.f32 %v594_v5, %v3429_v34  ;;  %v1764_v18 = vmul.f32 %v2973_v47, %v594_v5  ;;  %v1765_v37 = vmul.f32 %v2978_v49, %v594_v5 }
 0x103   :  { %v542_v36 = vmul.f32 %v4989_v12, %v515_v20 }
 0x104   :  { %v612_v19 = vadd.f32 %v604_v61, %v580_v33  ;;  %v613_v45 = vadd.f32 %v605_v17, %v581_v14  ;;  %v1772_v31 = vadd.f32 %v1764_v18, %v1756_v38  ;;  %v1773_v30 = vadd.f32 %v1765_v37, %v1757_v2 }
 0x105   :  { %v598_v1 = vpop.permute.xlu1 %597  ;;  %v550_v61 = vadd.f32 %v542_v36, %v4096_v40 }
 0x106   :  { %v1788_v59 = vadd.f32 %v1780_v26, %v1772_v31  ;;  %v1789_v57 = vadd.f32 %v1781_v51, %v1773_v30  ;;  %v606_v56 = vmul.f32 %v598_v1, %v5009_v23  ;;  %v607_v8 = vmul.f32 %v598_v1, %v3429_v34 }
 0x107   :  { %v1766_v41 = vmul.f32 %v2973_v47, %v598_v1  ;;  %v1767_v44 = vmul.f32 %v2978_v49, %v598_v1  ;;  %v644_v35 = vadd.f32 %v636_v6, %v612_v19  ;;  %v645_v27 = vadd.f32 %v637_v43, %v613_v45 }
 0x108   :  { %v1816_v53 = vmul.f32 %v5003_v4, %v1789_v57  ;;  %v1815_v46 = vmul.f32 %v4993_v52, %v1788_v59  ;;  %v614_v23 = vadd.f32 %v606_v56, %v582_v39  ;;  %v615_v24 = vadd.f32 %v607_v8, %v583_v58 }
 0x109   :  { %v1774_v38 = vadd.f32 %v1766_v41, %v5020_v15  ;;  %v1775_v7 = vadd.f32 %v1767_v44, %v1759_v28  ;;  %v672_v16 = vmul.f32 %v4994_v22, %v645_v27  ;;  %v671_v33 = vmul.f32 %v5021_v54, %v644_v35 }
 0x10a   :  { %v630_v34 = vpop.permute.xlu1 %629  ;;  %v4193_v47 = vadd.f32 %v1816_v53, %v4131_v48  ;;  %v4196_v49 = vadd.f32 %v1815_v46, %v4133_v63  ;;  %v549_v63 = vadd.f32 %v541_v42, %v4098_v0 }
 0x10b   :  { %v638_v32 = vmul.f32 %v630_v34, %v3435_v29  ;;  %v639_v50 = vmul.f32 %v630_v34, %v3466_v10  ;;  %v1782_v60 = vmul.f32 %v3451_v55, %v630_v34  ;;  %v1783_v12 = vmul.f32 %v3469_v62, %v630_v34  ;;  %v4250_v34 = vld [vmem:[%s4790_s3 + $0x8] sm:$0xff] }
 0x10c   :  { %v680_v17 = vadd.f32 %v672_v16, %v550_v61  ;;  %v679_v18 = vadd.f32 %v671_v33, %v549_v63  ;;  %v4290_v16 = vld [vmem:[%s4790_s3 + $0x30] sm:$0xff] }
 0x10d   :  { %v646_v14 = vadd.f32 %v638_v32, %v614_v23  ;;  %v647_v2 = vadd.f32 %v639_v50, %v615_v24  ;;  %v1790_v5 = vadd.f32 %v1782_v60, %v1774_v38  ;;  %v1791_v48 = vadd.f32 %v1783_v12, %v1775_v7  ;;  %v4242_v24 = vld [vmem:[%s4790_s3] sm:$0xff]  ;;  %v4258_v32 = vld [vmem:[%s4790_s3 + $0x10] sm:$0xff]  ;;  %v4266_v50 = vld [vmem:[%s4790_s3 + $0x18] sm:$0xff] }
 0x10e   :  { %v4274_v60 = vld [vmem:[%s4790_s3 + $0x20] sm:$0xff]  ;;  %v4282_v12 = vld [vmem:[%s4790_s3 + $0x28] sm:$0xff] }
 0x10f   :  { %v674_v29 = vmul.f32 %v4994_v22, %v647_v2  ;;  %v673_v10 = vmul.f32 %v5021_v54, %v646_v14  ;;  %v1818_v55 = vmul.f32 %v5003_v4, %v1791_v48  ;;  %v1817_v62 = vmul.f32 %v4993_v52, %v1790_v5  ;;  %v4298_v54 = vld [vmem:[%s4790_s3 + $0x38] sm:$0xff] }
 0x110   :  { %v5022_v4 = vmov 0.0  }
 0x111   :  { %v682_v37 = vadd.f32 %v674_v29, %v4150_v13  ;;  %v681_v25 = vadd.f32 %v673_v10, %v4152_v21  ;;  %v4213_v39 = vadd.f32 %v1818_v55, %v4155_v9  ;;  %v4216_v40 = vadd.f32 %v1817_v62, %v4158_v11  ;;  %v4223_v13 = vpop.permute.xlu1 %962 }
 0x113   :  { %v959_v0 = vpack.c.bf16 %v682_v37, %v680_v17  ;;  %v958_v22 = vpack.c.bf16 %v681_v25, %v679_v18  ;;  %v2070_v26 = vpack.c.bf16 %v4213_v39, %v4193_v47  ;;  %v2069_v52 = vpack.c.bf16 %v4216_v40, %v4196_v49 }
 0x114   :  { %v4225_v9 = vpop.permute.xlu0 %967 }
 0x115   :  { %1022 = vmatprep.mubr.bf16.mxu0 %v959_v0  ;;  %v4231_v59 = vpop.permute.xlu1 %972 }
 0x116   :  { %1023 = vmatmul.mubr.bf16.gmra.mrb[4].mxu0 %v958_v22 }
 0x117   :  { %2196 = vmatprep.mubr.f32.mxu0 %v5022_v4 }
 0x118   :  { %v4303_v2 = vpop.permute.xlu0 %1043 }
 0x11b   :  { %v4234_v41 = vpop.permute.xlu1 %977 }
 0x11f   :  { %v4306_v48 = vpop.permute.xlu1 %1048 }
 0x1a2   :  { %v1014_v21 = vpop.f32.mrb[0].mxu0 }
 0x1a3   :  { %v1015_v11 = vadd.f32 %v1014_v21, %v4223_v13  ;;  %v1016_v51 = vpop.f32.mrb[1].mxu0  ;;  %v4311_v21 = vpop.permute.xlu0 %1053 }
 0x1a4   :  { %v1017_v19 = vadd.f32 %v1016_v51, %v4223_v13  ;;  %v1018_v45 = vpop.f32.mrb[2].mxu0 }
 0x1a5   :  { %v1019_v31 = vadd.f32 %v1018_v45, %v4225_v9  ;;  %v1020_v30 = vpop.f32.mrb[3].mxu0  ;;  %v1033_v28 = vmax.f32 %v1015_v11, 0.0 }
 0x1a6   :  { %v1021_v58 = vadd.f32 %v1020_v30, %v4225_v9  ;;  %v1034_v20 = vmax.f32 %v1017_v19, 0.0  ;;  %v4314_v19 = vpop.permute.xlu1 %1058 }
 0x1a7   :  { %v1035_v3 = vmax.f32 %v1019_v31, 0.0 }
 0x1a8   :  { %v1036_v1 = vmax.f32 %v1021_v58, 0.0 }
 0x1a9   :  { %v2724_v6 = vpack.c.bf16 %v1035_v3, %v1033_v28 }
 0x1aa   :  { %v2722_v43 = vpack.c.bf16 %v1036_v1, %v1034_v20 }
 0x1ac   :  { %2723 = vmatprep.subr.bf16.mxu1 %v2722_v43 }
 0x1ad   :  { %2725 = vmatpush1.bf16.msra.mxu1 %v2724_v6 }
 0x1e9   :  { %v1024_v57 = vpop.f32.mrb[4].mxu0 }
 0x1ea   :  { %v1025_v56 = vadd.f32 %v1024_v57, %v4231_v59  ;;  %v1026_v8 = vpop.f32.mrb[5].mxu0 }
 0x1eb   :  { %v1027_v44 = vadd.f32 %v1026_v8, %v4231_v59  ;;  %v1028_v35 = vpop.f32.mrb[6].mxu0  ;;  %v4319_v8 = vpop.permute.xlu0 %1063 }
 0x1ec   :  { %v1029_v27 = vadd.f32 %v1028_v35, %v4234_v41  ;;  %v1030_v53 = vpop.f32.mrb[7].mxu0  ;;  %v1037_v42 = vmax.f32 %v1025_v56, 0.0 }
 0x1ed   :  { %v1031_v46 = vadd.f32 %v1030_v53, %v4234_v41  ;;  %v1038_v15 = vmax.f32 %v1027_v44, 0.0 }
 0x1ee   :  { %v1039_v36 = vmax.f32 %v1029_v27, 0.0  ;;  %v4322_v27 = vpop.permute.xlu1 %1068 }
 0x1ef   :  { %v1040_v38 = vmax.f32 %v1031_v46, 0.0 }
 0x1f0   :  { %v2728_v7 = vpack.c.bf16 %v1039_v36, %v1037_v42 }
 0x1f1   :  { %v2726_v23 = vpack.c.bf16 %v1040_v38, %v1038_v15 }
 0x1f3   :  { %2727 = vmatprep.subr.bf16.mxu1 %v2726_v23 }
 0x1f4   :  { %2729 = vmatpush1.bf16.msra.mxu1 %v2728_v7 }
 0x1f7   :  { %2534 = vmatmul.mubr.msk.f32.vlgmr.msra.gmra.mrb[0].mxu1 %vm1081_vm2, %v4242_v24 }
 0x1f8   :  { %1176 = vmatprep.mubr.f32.mxu1 %v5022_v4 }
 0x1fb   :  { %2535 = vmatmul.mubr.msk.f32.gmra.mrb[2].mxu1 %vm1081_vm2, %v4250_v34 }
 0x1fc   :  { %1182 = vmatprep.mubr.f32.mxu1 %v5022_v4 }
 0x1ff   :  { %2536 = vmatmul.mubr.msk.f32.gmra.mrb[4].mxu1 %vm1081_vm2, %v4258_v32 }
 0x200   :  { %1188 = vmatprep.mubr.f32.mxu1 %v5022_v4 }
 0x203   :  { %2537 = vmatmul.mubr.msk.f32.gmra.mrb[6].mxu1 %vm1081_vm2, %v4266_v50 }
 0x204   :  { %1194 = vmatprep.mubr.f32.mxu1 %v5022_v4 }
 0x207   :  { %2538 = vmatmul.mubr.msk.f32.gmra.mrb[8].mxu1 %vm1081_vm2, %v4274_v60 }
 0x208   :  { %1200 = vmatprep.mubr.f32.mxu1 %v5022_v4 }
 0x20b   :  { %2539 = vmatmul.mubr.msk.f32.gmra.mrb[10].mxu1 %vm1081_vm2, %v4282_v12 }
 0x20c   :  { %1206 = vmatprep.mubr.f32.mxu1 %v5022_v4 }
 0x20f   :  { %2540 = vmatmul.mubr.msk.f32.gmra.mrb[12].mxu1 %vm1081_vm2, %v4290_v16 }
 0x210   :  { %1212 = vmatprep.mubr.f32.mxu1 %v5022_v4 }
 0x213   :  { %2541 = vmatmul.mubr.msk.f32.gmra.mrb[14].mxu1 %vm1081_vm2, %v4298_v54 }
 0x214   :  { %1364 = vmatprep.mubr.f32.mxu1 %v5022_v4 }
 0x2ca   :  { %v1172_v33 = vpop.f32.mrb[0].mxu1 }
 0x2cb   :  { %v1174_v14 = vpop.f32.mrb[1].mxu1  ;;  %v1173_v5 = vadd.f32 %v1172_v33, %v4303_v2 }
 0x2cc   :  { %v1175_v61 = vadd.f32 %v1174_v14, %v4303_v2 }
 0x2cd   :  { %v1219_v62 = vmax.f32 %v1173_v5, 0.0 }
 0x2ce   :  { %v1178_v63 = vpop.f32.mrb[2].mxu1  ;;  %v1220_v18 = vmax.f32 %v1175_v61, 0.0 }
 0x2cf   :  { %v1179_v29 = vadd.f32 %v1178_v63, %v4306_v48  ;;  %v1180_v10 = vpop.f32.mrb[3].mxu1  ;;  %v4327_v63 = vpop.permute.xlu0 %1073 }
 0x2d0   :  { %v1181_v55 = vadd.f32 %v1180_v10, %v4306_v48 }
 0x2d1   :  { %v1221_v17 = vmax.f32 %v1179_v29, 0.0 }
 0x2d2   :  { %v1222_v37 = vmax.f32 %v1181_v55, 0.0  ;;  %v1184_v25 = vpop.f32.mrb[4].mxu1  ;;  %v4330_v55 = vpop.permute.xlu1 %1078 }
 0x2d3   :  { %v2732_v0 = vpack.c.bf16 %v1221_v17, %v1219_v62  ;;  %v1186_v22 = vpop.f32.mrb[5].mxu1  ;;  %v1185_v51 = vadd.f32 %v1184_v25, %v4311_v21 }
 0x2d4   :  { %v2730_v11 = vpack.c.bf16 %v1222_v37, %v1220_v18  ;;  %v1187_v45 = vadd.f32 %v1186_v22, %v4311_v21 }
 0x2d5   :  { %v1223_v3 = vmax.f32 %v1185_v51, 0.0 }
 0x2d6   :  { %v1190_v31 = vpop.f32.mrb[6].mxu1  ;;  %2731 = vmatprep.subr.bf16.mxu1 %v2730_v11  ;;  %v1224_v1 = vmax.f32 %v1187_v45, 0.0  ;;  %v5023_v45 = vld [vmem:[#allocation15_spill] sm:$0xff]  ;;  %v4578_v47 = vpop.permute.xlu1 %1242 }
 0x2d7   :  { %v1191_v30 = vadd.f32 %v1190_v31, %v4314_v19  ;;  %v1192_v58 = vpop.f32.mrb[7].mxu1  ;;  %2733 = vmatpush1.bf16.msra.mxu1 %v2732_v0  ;;  %v5024_v31 = vld [vmem:[#allocation2_spill] sm:$0xff] }
 0x2d8   :  { %v1193_v28 = vadd.f32 %v1192_v58, %v4314_v19  ;;  %vm1844_vm3 = vcmp.eq.s32.totalorder %v5024_v31, %v5023_v45 }
 0x2d9   :  { %v1225_v20 = vmax.f32 %v1191_v30, 0.0  ;;  %v5025_v30 = vld [vmem:[#allocation3_spill] sm:$0xff] }
 0x2da   :  { %v1226_v6 = vmax.f32 %v1193_v28, 0.0  ;;  %v1196_v43 = vpop.f32.mrb[8].mxu1  ;;  %vm1846_vm4 = vcmp.eq.s32.totalorder %v5025_v30, %v5023_v45 }
 0x2db   :  { %v2736_v57 = vpack.c.bf16 %v1225_v20, %v1223_v3  ;;  %v1198_v56 = vpop.f32.mrb[9].mxu1  ;;  %v1197_v35 = vadd.f32 %v1196_v43, %v4319_v8  ;;  %vm2626_vm5 = vmpackc.low %vm1846_vm4, %vm1844_vm3  ;;  %v4342_v3 = vld [vmem:[%s4791_s5] sm:$0xff]  ;;  %v5026_v20 = vmov 1.0|1.0   ;;  %v5028_v43 = vld [vmem:[#allocation4_spill] sm:$0xff] }
 0x2dc   :  { %v2734_v44 = vpack.c.bf16 %v1226_v6, %v1224_v1  ;;  %v1199_v53 = vadd.f32 %v1198_v56, %v4319_v8  ;;  %v5027_v1 = vld [vmem:[#allocation14_spill] sm:$0xff]  ;;  %v4355_v6 = vld [vmem:[%s4791_s5 + $0x8] sm:$0xff]  ;;  %vm1848_vm9 = vcmp.eq.s32.totalorder %v5028_v43, %v5023_v45  ;;  %v4367_v56 = vld [vmem:[%s4791_s5 + $0x10] sm:$0xff] }
 0x2dd   :  { %v1227_v38 = vmax.f32 %v1197_v35, 0.0  ;;  %vm1843_vm7 = vcmp.eq.s32.totalorder %v5024_v31, %v5027_v1  ;;  %vm1845_vm8 = vcmp.eq.s32.totalorder %v5025_v30, %v5027_v1  ;;  %vm1847_vm13 = vcmp.eq.s32.totalorder %v5028_v43, %v5027_v1  ;;  %v5030_v35 = vld [vmem:[#allocation6_spill] sm:$0xff]  ;;  %v5050_v31 = vld [vmem:[#allocation25_spill] sm:$0xff] }
 0x2de   :  { %v1202_v46 = vpop.f32.mrb[10].mxu1  ;;  %2735 = vmatprep.subr.bf16.mxu1 %v2734_v44  ;;  %v1228_v23 = vmax.f32 %v1199_v53, 0.0  ;;  %vm2628_vm11 = vmpackc.low %vm1845_vm8, %vm1843_vm7  ;;  %v4381_v44 = vld [vmem:[%s4791_s5 + $0x18] sm:$0xff]  ;;  %vm1852_vm15 = vcmp.eq.s32.totalorder %v5030_v35, %v5023_v45  ;;  %v5031_v53 = vld [vmem:[#allocation7_spill] sm:$0xff]  ;;  %vm1851_vm4 = vcmp.eq.s32.totalorder %v5030_v35, %v5027_v1 }
 0x2df   :  { %v1203_v42 = vadd.f32 %v1202_v46, %v4322_v27  ;;  %v1204_v36 = vpop.f32.mrb[11].mxu1  ;;  %2737 = vmatpush1.bf16.msra.mxu1 %v2736_v57  ;;  %v5029_v57 = vld [vmem:[#allocation5_spill] sm:$0xff]  ;;  %vm1854_vm0 = vcmp.eq.s32.totalorder %v5031_v53, %v5023_v45  ;;  %v4393_v46 = vld [vmem:[%s4791_s5 + $0x20] sm:$0xff]  ;;  %v5056_v35 = vld [vmem:[#allocation31_spill] sm:$0xff] }
 0x2e0   :  { %v1205_v15 = vadd.f32 %v1204_v36, %v4322_v27  ;;  %vm1850_vm10 = vcmp.eq.s32.totalorder %v5029_v57, %v5023_v45  ;;  %vm1849_vm14 = vcmp.eq.s32.totalorder %v5029_v57, %v5027_v1  ;;  %vm2634_vm3 = vmpackc.low %vm1854_vm0, %vm1852_vm15  ;;  %v5032_v36 = vld [vmem:[#allocation8_spill] sm:$0xff]  ;;  %v5051_v30 = vld [vmem:[#allocation26_spill] sm:$0xff] }
 0x2e1   :  { %v1229_v7 = vmax.f32 %v1203_v42, 0.0  ;;  %vm2630_vm12 = vmpackc.low %vm1850_vm10, %vm1848_vm9  ;;  %v4407_v42 = vld [vmem:[%s4791_s5 + $0x28] sm:$0xff]  ;;  %vm1856_vm7 = vcmp.eq.s32.totalorder %v5032_v36, %v5023_v45  ;;  %v5054_v43 = vld [vmem:[#allocation29_spill] sm:$0xff] }
 0x2e2   :  { %v1230_v33 = vmax.f32 %v1205_v15, 0.0  ;;  %v1208_v14 = vpop.f32.mrb[12].mxu1  ;;  %vm2632_vm1 = vmpackc.low %vm1849_vm14, %vm1847_vm13  ;;  %v5033_v15 = vld [vmem:[#allocation9_spill] sm:$0xff]  ;;  %v5055_v57 = vld [vmem:[#allocation30_spill] sm:$0xff] }
 0x2e3   :  { %v2740_v5 = vpack.c.bf16 %v1229_v7, %v1227_v38  ;;  %v1210_v61 = vpop.f32.mrb[13].mxu1  ;;  %v1209_v10 = vadd.f32 %v1208_v14, %v4327_v63  ;;  %vm1858_vm8 = vcmp.eq.s32.totalorder %v5033_v15, %v5023_v45  ;;  %v4419_v38 = vld [vmem:[%s4791_s5 + $0x30] sm:$0xff]  ;;  %v4433_v7 = vld [vmem:[%s4791_s5 + $0x38] sm:$0xff] }
 0x2e4   :  { %v2738_v29 = vpack.c.bf16 %v1230_v33, %v1228_v23  ;;  %v1211_v62 = vadd.f32 %v1210_v61, %v4327_v63  ;;  %vm2638_vm10 = vmpackc.low %vm1858_vm8, %vm1856_vm7  ;;  %v5034_v23 = vld [vmem:[#allocation10_spill] sm:$0xff]  ;;  %v5035_v33 = vld [vmem:[#allocation11_spill] sm:$0xff] }
 0x2e5   :  { %v1231_v0 = vmax.f32 %v1209_v10, 0.0  ;;  %vm1860_vm13 = vcmp.eq.s32.totalorder %v5034_v23, %v5023_v45  ;;  %vm1862_vm14 = vcmp.eq.s32.totalorder %v5035_v33, %v5023_v45  ;;  %v5036_v14 = vld [vmem:[#allocation60_spill] sm:$0xff]  ;;  %v5040_v10 = vld [vmem:[#allocation13_spill] sm:$0xff] }
 0x2e6   :  { %v1214_v17 = vpop.f32.mrb[14].mxu1  ;;  %2739 = vmatprep.subr.bf16.mxu1 %v2738_v29  ;;  %v1232_v11 = vmax.f32 %v1211_v62, 0.0  ;;  %vm2642_vm0 = vmpackc.low %vm1862_vm14, %vm1860_vm13  ;;  %v5039_v29 = vld [vmem:[#allocation12_spill] sm:$0xff] }
 0x2e7   :  { %v1215_v18 = vadd.f32 %v1214_v17, %v4330_v55  ;;  %v1216_v37 = vpop.f32.mrb[15].mxu1  ;;  %2741 = vmatpush1.bf16.msra.mxu1 %v2740_v5  ;;  %v5037_v5 = vld [vmem:[#allocation59_spill] sm:$0xff]  ;;  %v5041_v62 = vld [vmem:[#allocation16_spill] sm:$0xff]  ;;  %v5042_v17 = vld [vmem:[#allocation17_spill] sm:$0xff] }
 0x2e8   :  { %v1217_v25 = vadd.f32 %v1216_v37, %v4330_v55  ;;  %v5038_v61 = vpack.c.bf16 %v5036_v14, %v5037_v5  ;;  %v5044_v37 = vld [vmem:[#allocation19_spill] sm:$0xff]  ;;  %v5062_v14 = vld [vmem:[#allocation37_spill] sm:$0xff] }
 0x2e9   :  { %v1233_v22 = vmax.f32 %v1215_v18, 0.0  ;;  %v5043_v18 = vld [vmem:[#allocation18_spill] sm:$0xff] }
 0x2ea   :  { %v1234_v51 = vmax.f32 %v1217_v25, 0.0  ;;  %v5045_v25 = vld [vmem:[#allocation20_spill] sm:$0xff] }
 0x2eb   :  { %v2744_v58 = vpack.c.bf16 %v1233_v22, %v1231_v0  ;;  %v5046_v0 = vld [vmem:[#allocation21_spill] sm:$0xff]  ;;  %v5047_v22 = vld [vmem:[#allocation22_spill] sm:$0xff] }
 0x2ec   :  { %v2742_v28 = vpack.c.bf16 %v1234_v51, %v1232_v11  ;;  %v5048_v11 = vld [vmem:[#allocation23_spill] sm:$0xff]  ;;  %v5049_v51 = vld [vmem:[#allocation24_spill] sm:$0xff] }
 0x2ee   :  { %2743 = vmatprep.subr.bf16.mxu1 %v2742_v28  ;;  %v5053_v28 = vld [vmem:[#allocation28_spill] sm:$0xff] }
 0x2ef   :  { %2745 = vmatpush1.bf16.msra.mxu1 %v2744_v58  ;;  %v5052_v58 = vld [vmem:[#allocation27_spill] sm:$0xff] }
 0x2f0   :  { %2627 = vmatprep.subr.msk.bf16.mxu1 %vm2626_vm5, %v5026_v20  ;;  %vm1853_vm5 = vcmp.eq.s32.totalorder %v5031_v53, %v5027_v1  ;;  %v5057_v53 = vld [vmem:[#allocation32_spill] sm:$0xff] }
 0x2f1   :  { %vm2636_vm9 = vmpackc.low %vm1853_vm5, %vm1851_vm4  ;;  %vm1864_vm4 = vcmp.eq.s32.totalorder %v5039_v29, %v5023_v45  ;;  %vm1866_vm5 = vcmp.eq.s32.totalorder %v5040_v10, %v5023_v45 }
 0x2f2   :  { %2542 = vmatmul.mubr.msk.f32.vlgmr.msra.gmra.mrb[16].mxu1 %vm1275_vm6, %v4342_v3  ;;  %vm2646_vm8 = vmpackc.low %vm1866_vm5, %vm1864_vm4 }
 0x2f3   :  { %1370 = vmatprep.mubr.f32.mxu1 %v5022_v4 }
 0x2f6   :  { %2543 = vmatmul.mubr.msk.f32.gmra.mrb[18].mxu1 %vm1275_vm6, %v4355_v6 }
 0x2f7   :  { %1376 = vmatprep.mubr.f32.mxu1 %v5022_v4 }
 0x2f8   :  { %2629 = vmatpush1.bf16.xpose.msk.msra.mxu1 %vm2628_vm11, %v5026_v20  ;;  %vm1855_vm11 = vcmp.eq.s32.totalorder %v5032_v36, %v5027_v1  ;;  %v5058_v36 = vld [vmem:[#allocation33_spill] sm:$0xff] }
 0x2f9   :  { %2631 = vmatprep.subr.msk.bf16.mxu1 %vm2630_vm12, %v5026_v20  ;;  %vm1857_vm12 = vcmp.eq.s32.totalorder %v5033_v15, %v5027_v1  ;;  %v5059_v15 = vld [vmem:[#allocation34_spill] sm:$0xff] }
 0x2fa   :  { %2544 = vmatmul.mubr.msk.f32.gmra.mrb[20].mxu1 %vm1275_vm6, %v4367_v56  ;;  %vm2640_vm15 = vmpackc.low %vm1857_vm12, %vm1855_vm11  ;;  %vm1868_vm11 = vcmp.eq.s32.totalorder %v5041_v62, %v5023_v45  ;;  %vm1870_vm12 = vcmp.eq.s32.totalorder %v5042_v17, %v5023_v45 }
 0x2fb   :  { %1382 = vmatprep.mubr.f32.mxu1 %v5022_v4  ;;  %vm2650_vm14 = vmpackc.low %vm1870_vm12, %vm1868_vm11 }
 0x2fe   :  { %2545 = vmatmul.mubr.msk.f32.gmra.mrb[22].mxu1 %vm1275_vm6, %v4381_v44 }
 0x2ff   :  { %1388 = vmatprep.mubr.f32.mxu1 %v5022_v4 }
 0x300   :  { %2633 = vmatpush1.bf16.xpose.msk.msra.mxu1 %vm2632_vm1, %v5026_v20  ;;  %vm1859_vm1 = vcmp.eq.s32.totalorder %v5034_v23, %v5027_v1  ;;  %v5060_v23 = vld [vmem:[#allocation35_spill] sm:$0xff] }
 0x301   :  { %2635 = vmatprep.subr.msk.bf16.mxu1 %vm2634_vm3, %v5026_v20  ;;  %vm1861_vm3 = vcmp.eq.s32.totalorder %v5035_v33, %v5027_v1  ;;  %v5061_v33 = vld [vmem:[#allocation58_spill] sm:$0xff] }
 0x302   :  { %2546 = vmatmul.mubr.msk.f32.gmra.mrb[24].mxu1 %vm1275_vm6, %v4393_v46  ;;  %vm2644_vm7 = vmpackc.low %vm1861_vm3, %vm1859_vm1  ;;  %vm1872_vm1 = vcmp.eq.s32.totalorder %v5043_v18, %v5023_v45  ;;  %vm1874_vm3 = vcmp.eq.s32.totalorder %v5044_v37, %v5023_v45  ;;  %v5063_v5 = vpack.c.bf16 %v5061_v33, %v5062_v14 }
 0x303   :  { %1394 = vmatprep.mubr.f32.mxu1 %v5022_v4  ;;  %vm2654_vm5 = vmpackc.low %vm1874_vm3, %vm1872_vm1 }
 0x306   :  { %2547 = vmatmul.mubr.msk.f32.gmra.mrb[26].mxu1 %vm1275_vm6, %v4407_v42 }
 0x307   :  { %1400 = vmatprep.mubr.f32.mxu1 %v5022_v4 }
 0x308   :  { %2637 = vmatpush1.bf16.xpose.msk.msra.mxu1 %vm2636_vm9, %v5026_v20  ;;  %vm1863_vm9 = vcmp.eq.s32.totalorder %v5039_v29, %v5027_v1 }
 0x309   :  { %2639 = vmatprep.subr.msk.bf16.mxu1 %vm2638_vm10, %v5026_v20  ;;  %vm1865_vm10 = vcmp.eq.s32.totalorder %v5040_v10, %v5027_v1 }
 0x30a   :  { %2548 = vmatmul.mubr.msk.f32.gmra.mrb[28].mxu1 %vm1275_vm6, %v4419_v38  ;;  %vm2648_vm13 = vmpackc.low %vm1865_vm10, %vm1863_vm9  ;;  %vm1876_vm9 = vcmp.eq.s32.totalorder %v5045_v25, %v5023_v45  ;;  %vm1878_vm10 = vcmp.eq.s32.totalorder %v5046_v0, %v5023_v45 }
 0x30b   :  { %1406 = vmatprep.mubr.f32.mxu1 %v5022_v4  ;;  %vm2658_vm12 = vmpackc.low %vm1878_vm10, %vm1876_vm9 }
 0x30e   :  { %2549 = vmatmul.mubr.msk.f32.gmra.mrb[30].mxu1 %vm1275_vm6, %v4433_v7 }
 0x30f   :  { %2103 = vmatprep.mubr.bf16.mxu1 %v5038_v61 }
 0x310   :  { %2641 = vmatpush1.bf16.xpose.msk.msra.mxu1 %vm2640_vm15, %v5026_v20  ;;  %vm1867_vm15 = vcmp.eq.s32.totalorder %v5041_v62, %v5027_v1 }
 0x311   :  { %2643 = vmatprep.subr.msk.bf16.mxu1 %vm2642_vm0, %v5026_v20  ;;  %vm1869_vm0 = vcmp.eq.s32.totalorder %v5042_v17, %v5027_v1 }
 0x312   :  { %vm2652_vm4 = vmpackc.low %vm1869_vm0, %vm1867_vm15  ;;  %vm1880_vm15 = vcmp.eq.s32.totalorder %v5047_v22, %v5023_v45  ;;  %vm1882_vm0 = vcmp.eq.s32.totalorder %v5048_v11, %v5023_v45 }
 0x313   :  { %vm2662_vm3 = vmpackc.low %vm1882_vm0, %vm1880_vm15 }
 0x318   :  { %2645 = vmatpush1.bf16.xpose.msk.msra.mxu1 %vm2644_vm7, %v5026_v20  ;;  %vm1871_vm7 = vcmp.eq.s32.totalorder %v5043_v18, %v5027_v1 }
 0x319   :  { %2647 = vmatprep.subr.msk.bf16.mxu1 %vm2646_vm8, %v5026_v20  ;;  %vm1873_vm8 = vcmp.eq.s32.totalorder %v5044_v37, %v5027_v1  ;;  %v4598_v37 = vpop.permute.xlu1 %1252 }
 0x31a   :  { %vm2656_vm11 = vmpackc.low %vm1873_vm8, %vm1871_vm7  ;;  %vm1884_vm7 = vcmp.eq.s32.totalorder %v5049_v51, %v5023_v45  ;;  %vm1886_vm8 = vcmp.eq.s32.totalorder %v5050_v31, %v5023_v45 }
 0x31b   :  { %vm2666_vm10 = vmpackc.low %vm1886_vm8, %vm1884_vm7 }
 0x320   :  { %2649 = vmatpush1.bf16.xpose.msk.msra.mxu1 %vm2648_vm13, %v5026_v20  ;;  %vm1875_vm13 = vcmp.eq.s32.totalorder %v5045_v25, %v5027_v1 }
 0x321   :  { %2651 = vmatprep.subr.msk.bf16.mxu1 %vm2650_vm14, %v5026_v20  ;;  %vm1877_vm14 = vcmp.eq.s32.totalorder %v5046_v0, %v5027_v1 }
 0x322   :  { %vm2660_vm1 = vmpackc.low %vm1877_vm14, %vm1875_vm13  ;;  %vm1888_vm13 = vcmp.eq.s32.totalorder %v5051_v30, %v5023_v45  ;;  %vm1890_vm14 = vcmp.eq.s32.totalorder %v5052_v58, %v5023_v45 }
 0x323   :  { %vm2670_vm0 = vmpackc.low %vm1890_vm14, %vm1888_vm13 }
 0x328   :  { %2653 = vmatpush1.bf16.xpose.msk.msra.mxu1 %vm2652_vm4, %v5026_v20  ;;  %vm1879_vm4 = vcmp.eq.s32.totalorder %v5047_v22, %v5027_v1 }
 0x329   :  { %2655 = vmatprep.subr.msk.bf16.mxu1 %vm2654_vm5, %v5026_v20  ;;  %vm1881_vm5 = vcmp.eq.s32.totalorder %v5048_v11, %v5027_v1 }
 0x32a   :  { %vm2664_vm9 = vmpackc.low %vm1881_vm5, %vm1879_vm4  ;;  %vm1892_vm4 = vcmp.eq.s32.totalorder %v5053_v28, %v5023_v45  ;;  %vm1894_vm5 = vcmp.eq.s32.totalorder %v5054_v43, %v5023_v45 }
 0x32b   :  { %vm2674_vm8 = vmpackc.low %vm1894_vm5, %vm1892_vm4 }
 0x330   :  { %2657 = vmatpush1.bf16.xpose.msk.msra.mxu1 %vm2656_vm11, %v5026_v20  ;;  %vm1883_vm11 = vcmp.eq.s32.totalorder %v5049_v51, %v5027_v1 }
 0x331   :  { %2659 = vmatprep.subr.msk.bf16.mxu1 %vm2658_vm12, %v5026_v20  ;;  %vm1885_vm12 = vcmp.eq.s32.totalorder %v5050_v31, %v5027_v1 }
 0x332   :  { %vm2668_vm15 = vmpackc.low %vm1885_vm12, %vm1883_vm11  ;;  %vm1896_vm11 = vcmp.eq.s32.totalorder %v5055_v57, %v5023_v45  ;;  %vm1898_vm12 = vcmp.eq.s32.totalorder %v5056_v35, %v5023_v45 }
 0x333   :  { %vm2678_vm14 = vmpackc.low %vm1898_vm12, %vm1896_vm11 }
 0x338   :  { %2661 = vmatpush1.bf16.xpose.msk.msra.mxu1 %vm2660_vm1, %v5026_v20  ;;  %vm1887_vm1 = vcmp.eq.s32.totalorder %v5051_v30, %v5027_v1 }
 0x339   :  { %2663 = vmatprep.subr.msk.bf16.mxu1 %vm2662_vm3, %v5026_v20  ;;  %vm1889_vm3 = vcmp.eq.s32.totalorder %v5052_v58, %v5027_v1 }
 0x33a   :  { %vm2672_vm7 = vmpackc.low %vm1889_vm3, %vm1887_vm1  ;;  %vm1900_vm1 = vcmp.eq.s32.totalorder %v5057_v53, %v5023_v45  ;;  %vm1902_vm3 = vcmp.eq.s32.totalorder %v5058_v36, %v5023_v45 }
 0x33b   :  { %vm2682_vm5 = vmpackc.low %vm1902_vm3, %vm1900_vm1 }
 0x340   :  { %2665 = vmatpush1.bf16.xpose.msk.msra.mxu1 %vm2664_vm9, %v5026_v20  ;;  %vm1891_vm9 = vcmp.eq.s32.totalorder %v5053_v28, %v5027_v1 }
 0x341   :  { %2667 = vmatprep.subr.msk.bf16.mxu1 %vm2666_vm10, %v5026_v20  ;;  %vm1893_vm10 = vcmp.eq.s32.totalorder %v5054_v43, %v5027_v1  ;;  %v4618_v43 = vpop.permute.xlu1 %1262 }
 0x342   :  { %vm2676_vm13 = vmpackc.low %vm1893_vm10, %vm1891_vm9  ;;  %vm1904_vm9 = vcmp.eq.s32.totalorder %v5059_v15, %v5023_v45  ;;  %vm1906_vm10 = vcmp.eq.s32.totalorder %v5060_v23, %v5023_v45  ;;  %v4571_v45 = vpop.permute.xlu0 %1237 }
 0x343   :  { %vm2686_vm12 = vmpackc.low %vm1906_vm10, %vm1904_vm9 }
 0x348   :  { %2669 = vmatpush1.bf16.xpose.msk.msra.mxu1 %vm2668_vm15, %v5026_v20  ;;  %vm1895_vm15 = vcmp.eq.s32.totalorder %v5055_v57, %v5027_v1 }
 0x349   :  { %2671 = vmatprep.subr.msk.bf16.mxu1 %vm2670_vm0, %v5026_v20  ;;  %vm1897_vm0 = vcmp.eq.s32.totalorder %v5056_v35, %v5027_v1 }
 0x34a   :  { %vm2680_vm4 = vmpackc.low %vm1897_vm0, %vm1895_vm15 }
 0x350   :  { %2673 = vmatpush1.bf16.xpose.msk.msra.mxu1 %vm2672_vm7, %v5026_v20  ;;  %vm1899_vm7 = vcmp.eq.s32.totalorder %v5057_v53, %v5027_v1 }
 0x351   :  { %2675 = vmatprep.subr.msk.bf16.mxu1 %vm2674_vm8, %v5026_v20  ;;  %vm1901_vm8 = vcmp.eq.s32.totalorder %v5058_v36, %v5027_v1 }
 0x352   :  { %vm2684_vm11 = vmpackc.low %vm1901_vm8, %vm1899_vm7 }
 0x358   :  { %2677 = vmatpush1.bf16.xpose.msk.msra.mxu1 %vm2676_vm13, %v5026_v20  ;;  %vm1903_vm13 = vcmp.eq.s32.totalorder %v5059_v15, %v5027_v1 }
 0x359   :  { %2679 = vmatprep.subr.msk.bf16.mxu1 %vm2678_vm14, %v5026_v20  ;;  %vm1905_vm14 = vcmp.eq.s32.totalorder %v5060_v23, %v5027_v1 }
 0x35a   :  { %vm2688_vm15 = vmpackc.low %vm1905_vm14, %vm1903_vm13 }
 0x360   :  { %2681 = vmatpush1.bf16.xpose.msk.msra.mxu1 %vm2680_vm4, %v5026_v20 }
 0x361   :  { %2683 = vmatprep.subr.msk.bf16.mxu1 %vm2682_vm5, %v5026_v20 }
 0x368   :  { %2685 = vmatpush1.bf16.xpose.msk.msra.mxu1 %vm2684_vm11, %v5026_v20 }
 0x369   :  { %2687 = vmatprep.subr.msk.bf16.mxu1 %vm2686_vm12, %v5026_v20 }
 0x370   :  { %2689 = vmatpush1.bf16.xpose.msk.msra.mxu1 %vm2688_vm15, %v5026_v20 }
 0x377   :  { %2104 = vmatmul.mubr.bf16.vlgmr.msra.gmra.mrb[32].mxu1 %v5063_v5 }
 0x378   :  { %2113 = vmatprep.mubr.bf16.mxu1 %v2070_v26 }
 0x37f   :  { %2114 = vmatmul.mubr.bf16.gmra.mrb[36].mxu1 %v2069_v52  ;;  %v4588_v52 = vpop.permute.xlu0 %1247 }
 0x380   :  { %2226 = vmatprep.mubr.f32.mxu1 %v5022_v4 }
 0x383   :  { %v4608_v51 = vpop.permute.xlu0 %1257 }
 0x387   :  { %v4628_v15 = vpop.permute.xlu0 %1267 }
 0x3c5   :  { %v1366_v1 = vpop.f32.mrb[16].mxu1 }
 0x3c6   :  { %v1367_v61 = vadd.f32 %v1366_v1, %v4571_v45  ;;  %v1368_v20 = vpop.f32.mrb[17].mxu1  ;;  %v4638_v1 = vpop.permute.xlu1 %1272 }
 0x3c7   :  { %v1369_v29 = vadd.f32 %v1368_v20, %v4571_v45 }
 0x3c8   :  { %1413 = vst [vmem:[%s4792_s7] sm:$0xff] %v1367_v61 }
 0x3c9   :  { %1414 = vst [vmem:[%s4792_s7 + $0x8] sm:$0xff] %v1369_v29  ;;  %v1372_v49 = vpop.f32.mrb[18].mxu1 }
 0x3ca   :  { %v1373_v39 = vadd.f32 %v1372_v49, %v4578_v47  ;;  %v1374_v40 = vpop.f32.mrb[19].mxu1 }
 0x3cb   :  { %v1375_v26 = vadd.f32 %v1374_v40, %v4578_v47 }
 0x3cc   :  { %1415 = vst [vmem:[%s4792_s7 + $0x10] sm:$0xff] %v1373_v39 }
 0x3cd   :  { %1416 = vst [vmem:[%s4792_s7 + $0x18] sm:$0xff] %v1375_v26  ;;  %v1378_v10 = vpop.f32.mrb[20].mxu1 }
 0x3ce   :  { %v1379_v62 = vadd.f32 %v1378_v10, %v4588_v52  ;;  %v1380_v17 = vpop.f32.mrb[21].mxu1 }
 0x3cf   :  { %v1381_v18 = vadd.f32 %v1380_v17, %v4588_v52 }
 0x3d0   :  { %1417 = vst [vmem:[%s4792_s7 + $0x20] sm:$0xff] %v1379_v62 }
 0x3d1   :  { %1418 = vst [vmem:[%s4792_s7 + $0x28] sm:$0xff] %v1381_v18  ;;  %v1384_v25 = vpop.f32.mrb[22].mxu1 }
 0x3d2   :  { %v1385_v0 = vadd.f32 %v1384_v25, %v4598_v37  ;;  %v1386_v22 = vpop.f32.mrb[23].mxu1 }
 0x3d3   :  { %v1387_v11 = vadd.f32 %v1386_v22, %v4598_v37 }
 0x3d4   :  { %1419 = vst [vmem:[%s4792_s7 + $0x30] sm:$0xff] %v1385_v0 }
 0x3d5   :  { %1420 = vst [vmem:[%s4792_s7 + $0x38] sm:$0xff] %v1387_v11  ;;  %v1390_v31 = vpop.f32.mrb[24].mxu1 }
 0x3d6   :  { %v1391_v30 = vadd.f32 %v1390_v31, %v4608_v51  ;;  %v1392_v58 = vpop.f32.mrb[25].mxu1 }
 0x3d7   :  { %v1393_v28 = vadd.f32 %v1392_v58, %v4608_v51 }
 0x3d8   :  { %1421 = vst [vmem:[%s4792_s7 + $0x40] sm:$0xff] %v1391_v30 }
 0x3d9   :  { %1422 = vst [vmem:[%s4792_s7 + $0x48] sm:$0xff] %v1393_v28  ;;  %v1396_v57 = vpop.f32.mrb[26].mxu1 }
 0x3da   :  { %v1397_v35 = vadd.f32 %v1396_v57, %v4618_v43  ;;  %v1398_v53 = vpop.f32.mrb[27].mxu1 }
 0x3db   :  { %v1399_v36 = vadd.f32 %v1398_v53, %v4618_v43 }
 0x3dc   :  { %1423 = vst [vmem:[%s4792_s7 + $0x50] sm:$0xff] %v1397_v35 }
 0x3dd   :  { %1424 = vst [vmem:[%s4792_s7 + $0x58] sm:$0xff] %v1399_v36  ;;  %v1402_v23 = vpop.f32.mrb[28].mxu1 }
 0x3de   :  { %v1403_v33 = vadd.f32 %v1402_v23, %v4628_v15  ;;  %v1404_v14 = vpop.f32.mrb[29].mxu1 }
 0x3df   :  { %v1405_v5 = vadd.f32 %v1404_v14, %v4628_v15 }
 0x3e0   :  { %1425 = vst [vmem:[%s4792_s7 + $0x60] sm:$0xff] %v1403_v33 }
 0x3e1   :  { %1426 = vst [vmem:[%s4792_s7 + $0x68] sm:$0xff] %v1405_v5  ;;  %v1408_v61 = vpop.f32.mrb[30].mxu1 }
 0x3e2   :  { %v1409_v20 = vadd.f32 %v1408_v61, %v4638_v1  ;;  %v1410_v29 = vpop.f32.mrb[31].mxu1 }
 0x3e3   :  { %v1411_v49 = vadd.f32 %v1410_v29, %v4638_v1 }
 0x3e4   :  { %1427 = vst [vmem:[%s4792_s7 + $0x70] sm:$0xff] %v1409_v20 }
 0x3e5   :  { %1428 = vst [vmem:[%s4792_s7 + $0x78] sm:$0xff] %v1411_v49 }
 0x44a   :  { %v2105_v39 = vpop.f32.mrb[32].mxu1 }
 0x44b   :  { %v2106_v40 = vadd.f32 %v2105_v39, %v4223_v13  ;;  %v2107_v26 = vpop.f32.mrb[33].mxu1 }
 0x44c   :  { %v2108_v10 = vadd.f32 %v2107_v26, %v4223_v13  ;;  %v2109_v62 = vpop.f32.mrb[34].mxu1 }
 0x44d   :  { %v2110_v17 = vadd.f32 %v2109_v62, %v4225_v9  ;;  %v2111_v18 = vpop.f32.mrb[35].mxu1  ;;  %v2124_v0 = vmax.f32 %v2106_v40, 0.0 }
 0x44e   :  { %v2112_v25 = vadd.f32 %v2111_v18, %v4225_v9  ;;  %v2125_v11 = vmax.f32 %v2108_v10, 0.0 }
 0x44f   :  { %v2126_v22 = vmax.f32 %v2110_v17, 0.0 }
 0x450   :  { %v2127_v31 = vmax.f32 %v2112_v25, 0.0 }
 0x451   :  { %v2748_v30 = vpack.c.bf16 %v2126_v22, %v2124_v0 }
 0x452   :  { %v2746_v58 = vpack.c.bf16 %v2127_v31, %v2125_v11  ;;  %v2115_v28 = vpop.f32.mrb[36].mxu1 }
 0x453   :  { %v2116_v57 = vadd.f32 %v2115_v28, %v4231_v59  ;;  %v2117_v35 = vpop.f32.mrb[37].mxu1 }
 0x454   :  { %v2118_v53 = vadd.f32 %v2117_v35, %v4231_v59  ;;  %v2119_v36 = vpop.f32.mrb[38].mxu1  ;;  %2747 = vmatprep.subr.bf16.mxu0 %v2746_v58  ;;  %2770 = vmatprep.subr.bf16.mxu1 %v2746_v58 }
 0x455   :  { %v2120_v13 = vadd.f32 %v2119_v36, %v4234_v41  ;;  %v2121_v23 = vpop.f32.mrb[39].mxu1  ;;  %2749 = vmatpush1.bf16.msra.mxu0 %v2748_v30  ;;  %2772 = vmatpush1.bf16.msra.mxu1 %v2748_v30  ;;  %v2128_v33 = vmax.f32 %v2116_v57, 0.0 }
 0x456   :  { %v2122_v9 = vadd.f32 %v2121_v23, %v4234_v41  ;;  %v2129_v5 = vmax.f32 %v2118_v53, 0.0 }
 0x457   :  { %v2130_v14 = vmax.f32 %v2120_v13, 0.0 }
 0x458   :  { %v2131_v61 = vmax.f32 %v2122_v9, 0.0 }
 0x459   :  { %v2752_v20 = vpack.c.bf16 %v2130_v14, %v2128_v33 }
 0x45a   :  { %v2750_v29 = vpack.c.bf16 %v2131_v61, %v2129_v5 }
 0x45c   :  { %2751 = vmatprep.subr.bf16.mxu0 %v2750_v29  ;;  %2771 = vmatprep.subr.bf16.mxu1 %v2750_v29 }
 0x45d   :  { %2753 = vmatpush1.bf16.msra.mxu0 %v2752_v20  ;;  %2773 = vmatpush1.bf16.msra.mxu1 %v2752_v20 }
 0x460   :  { %2690 = vmatmul.mubr.msk.f32.vlgmr.msra.gmra.mrb[8].mxu0 %vm1081_vm2, %v4242_v24  ;;  %2695 = vmatmul.mubr.msk.f32.vlgmr.msra.gmra.mrb[40].mxu1 %vm1081_vm2, %v4282_v12 }
 0x461   :  { %2202 = vmatprep.mubr.f32.mxu0 %v5022_v4  ;;  %2232 = vmatprep.mubr.f32.mxu1 %v5022_v4 }
 0x464   :  { %2691 = vmatmul.mubr.msk.f32.gmra.mrb[10].mxu0 %vm1081_vm2, %v4250_v34  ;;  %2696 = vmatmul.mubr.msk.f32.gmra.mrb[42].mxu1 %vm1081_vm2, %v4290_v16 }
 0x465   :  { %2208 = vmatprep.mubr.f32.mxu0 %v5022_v4  ;;  %2238 = vmatprep.mubr.f32.mxu1 %v5022_v4 }
 0x468   :  { %2692 = vmatmul.mubr.msk.f32.gmra.mrb[12].mxu0 %vm1081_vm2, %v4258_v32  ;;  %2697 = vmatmul.mubr.msk.f32.gmra.mrb[44].mxu1 %vm1081_vm2, %v4298_v54 }
 0x469   :  { %2214 = vmatprep.mubr.f32.mxu0 %v5022_v4 }
 0x46c   :  { %2693 = vmatmul.mubr.msk.f32.gmra.mrb[14].mxu0 %vm1081_vm2, %v4266_v50 }
 0x46d   :  { %2220 = vmatprep.mubr.f32.mxu0 %v5022_v4 }
 0x470   :  { %2694 = vmatmul.mubr.msk.f32.gmra.mrb[16].mxu0 %vm1081_vm2, %v4274_v60 }
 0x471   :  { %2325 = vmatprep.mubr.f32.mxu0 %v5022_v4 }
 0x533   :  { %v2198_v59 = vpop.f32.mrb[8].mxu0  ;;  %v2228_v41 = vpop.f32.mrb[40].mxu1 }
 0x534   :  { %v2200_v24 = vpop.f32.mrb[9].mxu0  ;;  %v2230_v34 = vpop.f32.mrb[41].mxu1  ;;  %v2199_v32 = vadd.f32 %v2198_v59, %v4303_v2 }
 0x535   :  { %v2201_v12 = vadd.f32 %v2200_v24, %v4303_v2  ;;  %v2231_v20 = vadd.f32 %v2230_v34, %v4322_v27 }
 0x536   :  { %v2245_v26 = vmax.f32 %v2199_v32, 0.0 }
 0x537   :  { %v2204_v16 = vpop.f32.mrb[10].mxu0  ;;  %v2234_v54 = vpop.f32.mrb[42].mxu1  ;;  %v2246_v62 = vmax.f32 %v2201_v12, 0.0 }
 0x538   :  { %v2205_v49 = vadd.f32 %v2204_v16, %v4306_v48  ;;  %v2206_v50 = vpop.f32.mrb[11].mxu0  ;;  %v2236_v39 = vpop.f32.mrb[43].mxu1  ;;  %v2235_v10 = vadd.f32 %v2234_v54, %v4327_v63 }
 0x539   :  { %v2207_v40 = vadd.f32 %v2206_v50, %v4306_v48  ;;  %v2237_v18 = vadd.f32 %v2236_v39, %v4327_v63  ;;  %v2256_v39 = vmax.f32 %v2231_v20, 0.0 }
 0x53a   :  { %v2247_v60 = vmax.f32 %v2205_v49, 0.0  ;;  %v2257_v28 = vmax.f32 %v2235_v10, 0.0 }
 0x53b   :  { %v2248_v17 = vmax.f32 %v2207_v40, 0.0  ;;  %v2210_v25 = vpop.f32.mrb[12].mxu0  ;;  %v2240_v0 = vpop.f32.mrb[44].mxu1  ;;  %v2258_v35 = vmax.f32 %v2237_v18, 0.0 }
 0x53c   :  { %v2756_v22 = vpack.c.bf16 %v2247_v60, %v2245_v26  ;;  %v2241_v2 = vadd.f32 %v2240_v0, %v4330_v55  ;;  %v2212_v11 = vpop.f32.mrb[13].mxu0  ;;  %v2242_v31 = vpop.f32.mrb[45].mxu1  ;;  %v2211_v48 = vadd.f32 %v2210_v25, %v4311_v21 }
 0x53d   :  { %v2754_v30 = vpack.c.bf16 %v2248_v17, %v2246_v62  ;;  %v2243_v58 = vadd.f32 %v2242_v31, %v4330_v55  ;;  %v2213_v53 = vadd.f32 %v2212_v11, %v4311_v21  ;;  %v2229_v55 = vadd.f32 %v2228_v41, %v4322_v27 }
 0x53e   :  { %v2259_v57 = vmax.f32 %v2241_v2, 0.0  ;;  %v2249_v5 = vmax.f32 %v2211_v48, 0.0 }
 0x53f   :  { %v2260_v36 = vmax.f32 %v2243_v58, 0.0  ;;  %v2216_v13 = vpop.f32.mrb[14].mxu0  ;;  %2755 = vmatprep.subr.bf16.mxu0 %v2754_v30  ;;  %v2250_v29 = vmax.f32 %v2213_v53, 0.0  ;;  %v2255_v49 = vmax.f32 %v2229_v55, 0.0 }
 0x540   :  { %v2768_v63 = vpack.c.bf16 %v2259_v57, %v2257_v28  ;;  %v2217_v23 = vadd.f32 %v2216_v13, %v4314_v19  ;;  %v2218_v9 = vpop.f32.mrb[15].mxu0  ;;  %2757 = vmatpush1.bf16.msra.mxu0 %v2756_v22 }
 0x541   :  { %v2766_v33 = vpack.c.bf16 %v2260_v36, %v2258_v35  ;;  %v2219_v14 = vadd.f32 %v2218_v9, %v4314_v19 }
 0x542   :  { %v2251_v61 = vmax.f32 %v2217_v23, 0.0 }
 0x543   :  { %v2252_v59 = vmax.f32 %v2219_v14, 0.0  ;;  %v2222_v21 = vpop.f32.mrb[16].mxu0 }
 0x544   :  { %v2760_v24 = vpack.c.bf16 %v2251_v61, %v2249_v5  ;;  %v2223_v32 = vadd.f32 %v2222_v21, %v4319_v8  ;;  %v2224_v12 = vpop.f32.mrb[17].mxu0 }
 0x545   :  { %v2758_v16 = vpack.c.bf16 %v2252_v59, %v2250_v29  ;;  %v2225_v54 = vadd.f32 %v2224_v12, %v4319_v8 }
 0x546   :  { %v2253_v50 = vmax.f32 %v2223_v32, 0.0 }
 0x547   :  { %v2254_v19 = vmax.f32 %v2225_v54, 0.0  ;;  %2759 = vmatprep.subr.bf16.mxu0 %v2758_v16 }
 0x548   :  { %v2764_v41 = vpack.c.bf16 %v2255_v49, %v2253_v50  ;;  %2761 = vmatpush1.bf16.msra.mxu0 %v2760_v24 }
 0x549   :  { %v2762_v40 = vpack.c.bf16 %v2256_v39, %v2254_v19 }
 0x54b   :  { %2763 = vmatprep.subr.bf16.mxu0 %v2762_v40 }
 0x54c   :  { %2765 = vmatpush1.bf16.msra.mxu0 %v2764_v41 }
 0x54d   :  { %2767 = vmatprep.subr.bf16.mxu0 %v2766_v33 }
 0x550   :  { %2769 = vmatpush1.bf16.msra.mxu0 %v2768_v63 }
 0x553   :  { %2698 = vmatmul.mubr.msk.f32.vlgmr.msra.gmra.mrb[18].mxu0 %vm1275_vm6, %v4342_v3 }
 0x554   :  { %2331 = vmatprep.mubr.f32.mxu0 %v5022_v4 }
 0x557   :  { %2699 = vmatmul.mubr.msk.f32.gmra.mrb[20].mxu0 %vm1275_vm6, %v4355_v6 }
 0x558   :  { %2337 = vmatprep.mubr.f32.mxu0 %v5022_v4 }
 0x55b   :  { %2700 = vmatmul.mubr.msk.f32.gmra.mrb[22].mxu0 %vm1275_vm6, %v4367_v56 }
 0x55c   :  { %2343 = vmatprep.mubr.f32.mxu0 %v5022_v4 }
 0x55f   :  { %2701 = vmatmul.mubr.msk.f32.gmra.mrb[24].mxu0 %vm1275_vm6, %v4381_v44 }
 0x560   :  { %2349 = vmatprep.mubr.f32.mxu0 %v5022_v4 }
 0x563   :  { %2702 = vmatmul.mubr.msk.f32.gmra.mrb[26].mxu0 %vm1275_vm6, %v4393_v46 }
 0x564   :  { %2355 = vmatprep.mubr.f32.mxu0 %v5022_v4 }
 0x567   :  { %2703 = vmatmul.mubr.msk.f32.gmra.mrb[28].mxu0 %vm1275_vm6, %v4407_v42 }
 0x568   :  { %2361 = vmatprep.mubr.f32.mxu0 %v5022_v4 }
 0x56b   :  { %2704 = vmatmul.mubr.msk.f32.gmra.mrb[30].mxu0 %vm1275_vm6, %v4419_v38 }
 0x56c   :  { %2367 = vmatprep.mubr.f32.mxu0 %v5022_v4 }
 0x56f   :  { %2705 = vmatmul.mubr.msk.f32.gmra.mrb[32].mxu0 %vm1275_vm6, %v4433_v7 }
 0x626   :  { %v2327_v8 = vpop.f32.mrb[18].mxu0 }
 0x627   :  { %v2328_v27 = vadd.f32 %v2327_v8, %v4571_v45  ;;  %v2329_v3 = vpop.f32.mrb[19].mxu0 }
 0x628   :  { %v2330_v6 = vadd.f32 %v2329_v3, %v4571_v45 }
 0x629   :  { %2706 = vst [vmem:[%s4792_s7 + $0x80] sm:$0xff] %v2328_v27 }
 0x62a   :  { %2707 = vst [vmem:[%s4792_s7 + $0x88] sm:$0xff] %v2330_v6  ;;  %v2333_v56 = vpop.f32.mrb[20].mxu0 }
 0x62b   :  { %v2334_v4 = vadd.f32 %v2333_v56, %v4578_v47  ;;  %v2335_v44 = vpop.f32.mrb[21].mxu0 }
 0x62c   :  { %v2336_v46 = vadd.f32 %v2335_v44, %v4578_v47 }
 0x62d   :  { %2708 = vst [vmem:[%s4792_s7 + $0x90] sm:$0xff] %v2334_v4 }
 0x62e   :  { %2709 = vst [vmem:[%s4792_s7 + $0x98] sm:$0xff] %v2336_v46  ;;  %v2339_v42 = vpop.f32.mrb[22].mxu0 }
 0x62f   :  { %v2340_v38 = vadd.f32 %v2339_v42, %v4588_v52  ;;  %v2341_v7 = vpop.f32.mrb[23].mxu0 }
 0x630   :  { %v2342_v45 = vadd.f32 %v2341_v7, %v4588_v52 }
 0x631   :  { %2710 = vst [vmem:[%s4792_s7 + $0xa0] sm:$0xff] %v2340_v38 }
 0x632   :  { %2711 = vst [vmem:[%s4792_s7 + $0xa8] sm:$0xff] %v2342_v45  ;;  %v2345_v47 = vpop.f32.mrb[24].mxu0 }
 0x633   :  { %v2346_v34 = vadd.f32 %v2345_v47, %v4598_v37  ;;  %v2347_v26 = vpop.f32.mrb[25].mxu0 }
 0x634   :  { %v2348_v60 = vadd.f32 %v2347_v26, %v4598_v37 }
 0x635   :  { %2712 = vst [vmem:[%s4792_s7 + $0xb0] sm:$0xff] %v2346_v34 }
 0x636   :  { %2713 = vst [vmem:[%s4792_s7 + $0xb8] sm:$0xff] %v2348_v60  ;;  %v2351_v52 = vpop.f32.mrb[26].mxu0 }
 0x637   :  { %v2352_v10 = vadd.f32 %v2351_v52, %v4608_v51  ;;  %v2353_v62 = vpop.f32.mrb[27].mxu0 }
 0x638   :  { %v2354_v17 = vadd.f32 %v2353_v62, %v4608_v51 }
 0x639   :  { %2714 = vst [vmem:[%s4792_s7 + $0xc0] sm:$0xff] %v2352_v10 }
 0x63a   :  { %2715 = vst [vmem:[%s4792_s7 + $0xc8] sm:$0xff] %v2354_v17  ;;  %v2357_v37 = vpop.f32.mrb[28].mxu0 }
 0x63b   :  { %v2358_v18 = vadd.f32 %v2357_v37, %v4618_v43  ;;  %v2359_v25 = vpop.f32.mrb[29].mxu0 }
 0x63c   :  { %v2360_v0 = vadd.f32 %v2359_v25, %v4618_v43 }
 0x63d   :  { %2716 = vst [vmem:[%s4792_s7 + $0xd0] sm:$0xff] %v2358_v18 }
 0x63e   :  { %2717 = vst [vmem:[%s4792_s7 + $0xd8] sm:$0xff] %v2360_v0  ;;  %v2363_v51 = vpop.f32.mrb[30].mxu0 }
 0x63f   :  { %v2364_v22 = vadd.f32 %v2363_v51, %v4628_v15  ;;  %v2365_v2 = vpop.f32.mrb[31].mxu0 }
 0x640   :  { %v2366_v11 = vadd.f32 %v2365_v2, %v4628_v15 }
 0x641   :  { %2718 = vst [vmem:[%s4792_s7 + $0xe0] sm:$0xff] %v2364_v22 }
 0x642   :  { %2719 = vst [vmem:[%s4792_s7 + $0xe8] sm:$0xff] %v2366_v11  ;;  %v2369_v43 = vpop.f32.mrb[32].mxu0 }
 0x643   :  { %v2370_v31 = vadd.f32 %v2369_v43, %v4638_v1  ;;  %v2371_v30 = vpop.f32.mrb[33].mxu0 }
 0x644   :  { %v2372_v58 = vadd.f32 %v2371_v30, %v4638_v1 }
 0x645   :  { %2720 = vst [vmem:[%s4792_s7 + $0xf0] sm:$0xff] %v2370_v31 }
 0x646   :  { %2721 = vst [vmem:[%s4792_s7 + $0xf8] sm:$0xff] %v2372_v58 }

</bundles_post_ra>
